<compile_context>
chip_gen: v7x
topology: tpu7x:2x2x1
jax: 0.10.0
libtpu: 0.0.40
codegen_flags: <defaults>
</compile_context>

<pallas_src>
import functools

import jax
import jax.numpy as jnp
from jax.experimental import pallas as pl
from jax.experimental.pallas import tpu as pltpu

_VMEM_LIMIT = 32 * 1024 * 1024      # safe on v5e/v6e/v7x (<= physical everywhere)
_SQRT_HALF = 0.7071067811865476
_LN_EPS = 1e-5


def _round_up(x, m):
    return (x + m - 1) // m * m


def _ln_rows(x, gamma):
    """LayerNorm over last dim (biased var, eps=1e-5) * (gamma + 1)."""
    mu = jnp.mean(x, axis=-1, keepdims=True)
    var = jnp.mean(jnp.square(x - mu), axis=-1, keepdims=True)
    return (x - mu) * jax.lax.rsqrt(var + _LN_EPS) * (gamma + 1.0)


# ----------------------------------------------------------------------------
# Fused linear kernel:
#   [LayerNorm ->] matmul (bf16 MXU, f32 acc) [-> +bias] [-> GELU]
#   [-> +residual] [-> LayerNorm] -> out
# ----------------------------------------------------------------------------

def _fused_linear_kernel(*refs, has_ln, has_bias, has_res, has_out_ln, gelu):
    it = iter(refs)
    x_ref = next(it)
    g_ref = next(it) if has_ln else None
    w_ref = next(it)
    b_ref = next(it) if has_bias else None
    r_ref = next(it) if has_res else None
    og_ref = next(it) if has_out_ln else None
    o_ref = next(it)
    acc_ref = next(it)

    k = pl.program_id(2)

    @pl.when(k == 0)
    def _():
        acc_ref[...] = jnp.zeros_like(acc_ref)

    a = x_ref[...].astype(jnp.float32)
    if has_ln:
        a = _ln_rows(a, g_ref[...].astype(jnp.float32))
    acc_ref[...] += jnp.dot(a.astype(jnp.bfloat16),
                            w_ref[...].astype(jnp.bfloat16),
                            preferred_element_type=jnp.float32)

    @pl.when(k == pl.num_programs(2) - 1)
    def _():
        y = acc_ref[...]
        if has_bias:
            y = y + b_ref[...].astype(jnp.float32)
        if gelu:
            # exact GELU (erf form), matching nn.GELU() default
            y = 0.5 * y * (1.0 + jax.lax.erf(y * _SQRT_HALF))
        if has_res:
            y = y + r_ref[...].astype(jnp.float32)
        if has_out_ln:
            y = _ln_rows(y, og_ref[...].astype(jnp.float32))
        o_ref[...] = y.astype(o_ref.dtype)


def fused_linear(x, w, bias=None, residual=None, ln_gamma=None,
                 out_ln_gamma=None, gelu=False, out_dtype=jnp.float32,
                 tm=256, tn=256, tk=512):
    """(M,K) @ (K,N) with optional fused input-LN / bias / GELU / residual / output-LN."""
    M, K = x.shape
    Kw, N = w.shape
    assert K == Kw
    has_ln = ln_gamma is not None
    has_out_ln = out_ln_gamma is not None
    has_bias = bias is not None
    has_res = residual is not None
    if has_res:
        assert residual.shape == (M, N)

    # Tile sizes: K stays whole when the input LN is fused, N stays whole when
    # the output LN is fused (both need full rows in one block). Tiles are
    # (8,128)-aligned or full-extent, so BlockSpecs are always legal.
    tk_ = K if (has_ln or K <= tk) else tk
    tn_ = N if (has_out_ln or N <= tn) else tn
    tm_ = M if M <= tm else tm
    Mp, Kp, Np = _round_up(M, tm_), _round_up(K, tk_), _round_up(N, tn_)

    if (Mp, Kp) != (M, K):
        x = jnp.pad(x, ((0, Mp - M), (0, Kp - K)))
    if (Kp, Np) != (K, N):
        w = jnp.pad(w, ((0, Kp - K), (0, Np - N)))

    inputs = [x]
    in_specs = [pl.BlockSpec((tm_, tk_), lambda i, j, k: (i, k))]
    if has_ln:
        inputs.append(ln_gamma.reshape(1, K).astype(jnp.float32))
        in_specs.append(pl.BlockSpec((1, K), lambda i, j, k: (0, 0)))
    inputs.append(w)
    in_specs.append(pl.BlockSpec((tk_, tn_), lambda i, j, k: (k, j)))
    if has_bias:
        b2 = bias.reshape(1, N).astype(jnp.float32)
        if Np != N:
            b2 = jnp.pad(b2, ((0, 0), (0, Np - N)))
        inputs.append(b2)
        in_specs.append(pl.BlockSpec((1, tn_), lambda i, j, k: (0, j)))
    if has_res:
        r = residual
        if (Mp, Np) != r.shape:
            r = jnp.pad(r, ((0, Mp - M), (0, Np - N)))
        inputs.append(r)
        in_specs.append(pl.BlockSpec((tm_, tn_), lambda i, j, k: (i, j)))
    if has_out_ln:
        inputs.append(out_ln_gamma.reshape(1, N).astype(jnp.float32))
        in_specs.append(pl.BlockSpec((1, N), lambda i, j, k: (0, 0)))

    out = pl.pallas_call(
        functools.partial(_fused_linear_kernel, has_ln=has_ln, has_bias=has_bias,
                          has_res=has_res, has_out_ln=has_out_ln, gelu=gelu),
        out_shape=jax.ShapeDtypeStruct((Mp, Np), out_dtype),
        grid_spec=pltpu.PrefetchScalarGridSpec(
            num_scalar_prefetch=0,
            grid=(Mp // tm_, Np // tn_, Kp // tk_),
            in_specs=in_specs,
            out_specs=pl.BlockSpec((tm_, tn_), lambda i, j, k: (i, j)),
            scratch_shapes=[pltpu.VMEM((tm_, tn_), jnp.float32)]),
        compiler_params=pltpu.CompilerParams(
            dimension_semantics=("parallel", "parallel", "arbitrary"),
            vmem_limit_bytes=_VMEM_LIMIT),
    )(*inputs)

    if (Mp, Np) != (M, N):
        out = out[:M, :N]
    return out


# ----------------------------------------------------------------------------
# Stand-alone LayerNorm kernel (M-tiled)
# ----------------------------------------------------------------------------

def _layernorm_kernel(x_ref, g_ref, o_ref):
    o_ref[...] = _ln_rows(x_ref[...].astype(jnp.float32),
                          g_ref[...].astype(jnp.float32)).astype(o_ref.dtype)


def pallas_layernorm(x2d, gamma, tm=512):
    M, D = x2d.shape
    tm_ = M if M <= tm else tm
    Mp = _round_up(M, tm_)
    if Mp != M:
        x2d = jnp.pad(x2d, ((0, Mp - M), (0, 0)))
    out = pl.pallas_call(
        _layernorm_kernel,
        out_shape=jax.ShapeDtypeStruct((Mp, D), jnp.float32),
        grid=(Mp // tm_,),
        in_specs=[pl.BlockSpec((tm_, D), lambda i: (i, 0)),
                  pl.BlockSpec((1, D), lambda i: (0, 0))],
        out_specs=pl.BlockSpec((tm_, D), lambda i: (i, 0)),
        compiler_params=pltpu.CompilerParams(
            dimension_semantics=("parallel",),
            vmem_limit_bytes=_VMEM_LIMIT),
    )(x2d, gamma.reshape(1, D).astype(jnp.float32))
    return out[:M] if Mp != M else out


# ----------------------------------------------------------------------------
# Multi-head attention kernels (grid over batch; heads sliced in-kernel so no
# HBM head-major transposes are needed)
# ----------------------------------------------------------------------------

def _attn_core_kernel(*refs, heads, dqk, dv, packed_v, with_sim):
    if packed_v:
        qk_ref, o_ref = refs[0], refs[1]
        s_ref = refs[2] if with_sim else None
        qk = qk_ref[0]
        v_all = qk
        v_base = 2 * heads * dqk
    else:
        qk_ref, v_ref, o_ref = refs[0], refs[1], refs[2]
        s_ref = refs[3] if with_sim else None
        qk = qk_ref[0]
        v_all = v_ref[0]
        v_base = 0

    k_base = heads * dqk
    for h in range(heads):
        qh = qk[:, h * dqk:(h + 1) * dqk].astype(jnp.bfloat16)
        kh = qk[:, k_base + h * dqk:k_base + (h + 1) * dqk].astype(jnp.bfloat16)
        vh = v_all[:, v_base + h * dv:v_base + (h + 1) * dv].astype(jnp.bfloat16)
        # q @ k^T (the dim_head**-0.5 scale is folded into the q projection)
        s = jax.lax.dot_general(qh, kh, (((1,), (1,)), ((), ())),
                                preferred_element_type=jnp.float32)
        m = jnp.max(s, axis=-1, keepdims=True)
        e = jnp.exp(s - m)
        p = e * pl.reciprocal(jnp.sum(e, axis=-1, keepdims=True), approx=True)
        o = jnp.dot(p.astype(jnp.bfloat16), vh, preferred_element_type=jnp.float32)
        o_ref[0, :, h * dv:(h + 1) * dv] = o.astype(o_ref.dtype)
        if with_sim:
            s_ref[0, h] = s.astype(s_ref.dtype)


def pallas_mh_attention(qk, v, *, heads, dim_head, with_sim):
    """softmax(q k^T) v per head.  qk: (b, n, 2*heads*dh) packed [q|k];
    v: (b, n, heads*dh).  Optionally also returns qk_sim (b, heads, n, n) bf16."""
    b, n, _ = qk.shape
    hv = v.shape[-1]
    assert v.shape[1] == n, "reference requires token count == highres token count"
    out_shapes = [jax.ShapeDtypeStruct((b, n, hv), jnp.bfloat16)]
    out_specs = [pl.BlockSpec((1, n, hv), lambda i: (i, 0, 0))]
    if with_sim:
        out_shapes.append(jax.ShapeDtypeStruct((b, heads, n, n), jnp.bfloat16))
        out_specs.append(pl.BlockSpec((1, heads, n, n), lambda i: (i, 0, 0, 0)))
    return pl.pallas_call(
        functools.partial(_attn_core_kernel, heads=heads, dqk=dim_head,
                          dv=hv // heads, packed_v=False, with_sim=with_sim),
        out_shape=tuple(out_shapes) if with_sim else out_shapes[0],
        grid=(b,),
        in_specs=[pl.BlockSpec((1, n, qk.shape[-1]), lambda i: (i, 0, 0)),
                  pl.BlockSpec((1, n, hv), lambda i: (i, 0, 0))],
        out_specs=tuple(out_specs) if with_sim else out_specs[0],
        compiler_params=pltpu.CompilerParams(
            dimension_semantics=("parallel",),
            vmem_limit_bytes=_VMEM_LIMIT),
    )(qk, v)


def pallas_mh_self_attention(qkv, *, heads, dim_head):
    """Self-attention on a packed [q|k|v] projection (single input tensor)."""
    b, n, width = qkv.shape
    hv = heads * dim_head
    return pl.pallas_call(
        functools.partial(_attn_core_kernel, heads=heads, dqk=dim_head,
                          dv=dim_head, packed_v=True, with_sim=False),
        out_shape=jax.ShapeDtypeStruct((b, n, hv), jnp.bfloat16),
        grid=(b,),
        in_specs=[pl.BlockSpec((1, n, width), lambda i: (i, 0, 0))],
        out_specs=pl.BlockSpec((1, n, hv), lambda i: (i, 0, 0)),
        compiler_params=pltpu.CompilerParams(
            dimension_semantics=("parallel",),
            vmem_limit_bytes=_VMEM_LIMIT),
    )(qkv)


def _reuse_attn_kernel(s_ref, v_ref, o_ref, *, heads, dv):
    v_all = v_ref[0]
    for h in range(heads):
        s = s_ref[0, h].astype(jnp.float32)          # un-transposed lookup sim (n, n)
        # softmax(sim^T, -1) == column-softmax of sim;  out = softmax(sim^T) @ v
        m = jnp.max(s, axis=0, keepdims=True)
        e = jnp.exp(s - m)
        p = e * pl.reciprocal(jnp.sum(e, axis=0, keepdims=True), approx=True)
        vh = v_all[:, h * dv:(h + 1) * dv].astype(jnp.bfloat16)
        o = jax.lax.dot_general(p.astype(jnp.bfloat16), vh,
                                (((0,), (0,)), ((), ())),
                                preferred_element_type=jnp.float32)
        o_ref[0, :, h * dv:(h + 1) * dv] = o.astype(o_ref.dtype)


def pallas_reuse_attention(sim, v, *, heads, dim_head):
    """Attention reusing the lookup qk_sim; the reference's transpose(-2,-1)
    is folded into a column-wise softmax so the (b,h,n,n) tensor is never
    transposed / copied in HBM."""
    b, _, n, _ = sim.shape
    hv = heads * dim_head
    return pl.pallas_call(
        functools.partial(_reuse_attn_kernel, heads=heads, dv=dim_head),
        out_shape=jax.ShapeDtypeStruct((b, n, hv), jnp.bfloat16),
        grid=(b,),
        in_specs=[pl.BlockSpec((1, heads, n, n), lambda i: (i, 0, 0, 0)),
                  pl.BlockSpec((1, n, hv), lambda i: (i, 0, 0))],
        out_specs=pl.BlockSpec((1, n, hv), lambda i: (i, 0, 0)),
        compiler_params=pltpu.CompilerParams(
            dimension_semantics=("parallel",),
            vmem_limit_bytes=_VMEM_LIMIT),
    )(sim, v)


# ----------------------------------------------------------------------------
# Model glue (plain JAX around the Pallas kernels)
# ----------------------------------------------------------------------------

def position_embed_sin_cos(w, h, dim, temperature=1000):
    # Faithful reproduction of the reference (incl. inf/NaN from underflow).
    y, x = jnp.meshgrid(jnp.arange(h, dtype=jnp.float32),
                        jnp.arange(w, dtype=jnp.float32), indexing='ij')
    omega = jnp.arange(dim // 4, dtype=jnp.float32) / (dim // 4 - 1)
    omega = 1.0 / omega ** temperature
    y = y.reshape(-1, 1) * omega.reshape(1, -1)
    x = x.reshape(-1, 1) * omega.reshape(1, -1)
    pe = jnp.concatenate((jnp.sin(x), jnp.cos(x), jnp.sin(y), jnp.cos(y)), axis=1)
    return pe.astype(jnp.float32)


def bilinear_interpolate_nchw(x, out_size):
    """F.interpolate(mode='bilinear', align_corners=False) semantics (NCHW)."""
    b, c, ih, iw = x.shape
    oh = ow = out_size

    def coords(osz, isz):
        scale = isz / osz
        s = (jnp.arange(osz, dtype=jnp.float32) + 0.5) * scale - 0.5
        s = jnp.maximum(s, 0.0)
        i0 = jnp.minimum(jnp.floor(s).astype(jnp.int32), isz - 1)
        i1 = jnp.minimum(i0 + 1, isz - 1)
        frac = s - i0.astype(jnp.float32)
        return i0, i1, frac

    y0, y1, fy = coords(oh, ih)
    x0, x1, fx = coords(ow, iw)
    r0 = x[:, :, y0, :]
    r1 = x[:, :, y1, :]

    def mix_w(r):
        return r[..., x0] * (1.0 - fx) + r[..., x1] * fx

    r0 = mix_w(r0)
    r1 = mix_w(r1)
    fy_b = fy[None, None, :, None]
    return r0 * (1.0 - fy_b) + r1 * fy_b


def lookup_cross_attention(tokens, higher, p, *, heads, dim_head):
    """Cross Attention (tokens attend; v from higher) with residual fused; also
    returns qk_sim (bf16, b x heads x n x n)."""
    b, n, dim = tokens.shape
    qk = fused_linear(tokens.reshape(-1, dim), p['wqk'],
                      ln_gamma=p['norm_gamma'], out_dtype=jnp.bfloat16)
    v = fused_linear(higher.reshape(-1, dim), p['wv'],
                     ln_gamma=p['norm_ctx_gamma'], out_dtype=jnp.bfloat16)
    core, sim = pallas_mh_attention(qk.reshape(b, n, -1),
                                    v.reshape(b, higher.shape[1], -1),
                                    heads=heads, dim_head=dim_head, with_sim=True)
    out = fused_linear(core.reshape(b * n, -1), p['wo'],
                       residual=tokens.reshape(-1, dim))     # to_out + residual
    return out.reshape(b, n, dim), sim


def self_attention(tokens, p, *, heads, dim_head):
    b, n, dim = tokens.shape
    qkv = fused_linear(tokens.reshape(-1, dim), p['wqkv'],
                       ln_gamma=p['norm_gamma'], out_dtype=jnp.bfloat16)
    core = pallas_mh_self_attention(qkv.reshape(b, n, -1),
                                    heads=heads, dim_head=dim_head)
    out = fused_linear(core.reshape(b * n, -1), p['wo'],
                       residual=tokens.reshape(-1, dim))     # to_out + residual
    return out.reshape(b, n, dim)


def reuse_attention_block(higher, tokens, sim, p, out_ln_gamma, *, heads, dim_head):
    """highres reuse-attention + to_out + residual + highres_norm, fused."""
    b, n_hi, dim = higher.shape
    v = fused_linear(tokens.reshape(-1, dim), p['wv'],
                     ln_gamma=p['norm_ctx_gamma'], out_dtype=jnp.bfloat16)
    core = pallas_reuse_attention(sim, v.reshape(b, tokens.shape[1], -1),
                                  heads=heads, dim_head=dim_head)
    out = fused_linear(core.reshape(b * n_hi, -1), p['wo'],
                       residual=higher.reshape(-1, dim),
                       out_ln_gamma=out_ln_gamma)
    return out.reshape(b, n_hi, dim)


def mlp_block(x, p):
    """LN -> Linear -> GELU -> Linear (+bias) with the residual add fused."""
    b, n, dim = x.shape
    h = fused_linear(x.reshape(-1, dim), p['w1'], bias=p['b1'],
                     ln_gamma=p['ln_gamma'], gelu=True, out_dtype=jnp.bfloat16)
    out = fused_linear(h, p['w2'], bias=p['b2'], residual=x.reshape(-1, dim))
    return out.reshape(b, n, dim)


def look_vit_forward(params, x, cfg):
    b, c, h, w = x.shape
    dim = cfg['dim']
    p = cfg['highres_patch_size']
    K = cfg['patch_conv_kernel_size']
    pad = K // 2

    # --- patchify exactly like the reference ---
    xr = x.reshape(b, c, h // p, p, w // p, p).transpose(0, 3, 5, 1, 2, 4)
    xr = xr.reshape(b, p * p * c, h // p, w // p)            # (b, patch_dim, gh, gw)
    gh, gw = h // p, w // p

    # --- Conv2d(kernel=K, padding=K//2) via XLA conv (avoids 49x im2col blow-up);
    #     output directly NHWC to skip a full-tensor transpose ---
    conv = jax.lax.conv_general_dilated(
        xr.astype(jnp.float32), params['conv_w'],
        window_strides=(1, 1), padding=((pad, pad), (pad, pad)),
        dimension_numbers=('NCHW', 'OIHW', 'NHWC'))
    higher = conv + params['conv_b'][None, None, None, :]

    # LayerNorm constructed inside forward (gamma=0 -> affine factor 1)
    higher = pallas_layernorm(higher.reshape(-1, dim),
                              jnp.zeros((dim,), jnp.float32)).reshape(b, gh, gw, dim)

    size = higher.shape[-2]
    pe = position_embed_sin_cos(w=gw, h=gh, dim=dim)
    higher = higher + pe.reshape(size, -1, dim)

    higher2 = higher.transpose(0, 3, 1, 2)                   # (b, dim, gh, gw)
    tokens = bilinear_interpolate_nchw(higher2, w // cfg['patch_size'])
    tokens = tokens.transpose(0, 2, 3, 1).reshape(b, -1, dim)
    higher = higher.reshape(b, -1, dim)

    for lp in params['layers']:
        tokens, qk_sim = lookup_cross_attention(
            tokens, higher, lp['lookup'],
            heads=cfg['cross_attn_heads'], dim_head=cfg['cross_attn_dim_head'])
        tokens = self_attention(tokens, lp['attn'],
                                heads=cfg['heads'], dim_head=cfg['dim_head'])
        tokens = mlp_block(tokens, lp['mlp'])
        higher = reuse_attention_block(
            higher, tokens, qk_sim, lp['highres_attn'],
            out_ln_gamma=lp['highres_norm_gamma'],
            heads=cfg['cross_attn_heads'], dim_head=cfg['cross_attn_dim_head'])
        higher = mlp_block(higher, lp['highres_mlp'])

    tokens = pallas_layernorm(tokens.reshape(-1, dim), params['norm_gamma'])
    higher = pallas_layernorm(higher.reshape(-1, dim), params['highres_norm_gamma'])
    tokens = jnp.mean(tokens.reshape(b, -1, dim), axis=1)
    higher = jnp.mean(higher.reshape(b, -1, dim), axis=1)
    return fused_linear(tokens + higher, params['logits_w'])


# ----------------------------------------------------------------------------
# Deterministic parameter init (shapes from the module __init__).
# Matmul weights are stored bf16 (MXU-native); q/k(/v) are pre-packed along N
# with the dim_head**-0.5 scale folded into wq.  Biases / gammas stay f32.
# ----------------------------------------------------------------------------

def init_params(key, cfg):
    dim = cfg['dim']
    cin = cfg['highres_patch_size'] ** 2 * cfg['channels']
    K = cfg['patch_conv_kernel_size']
    hidden = dim * cfg['mlp_factor']
    hhidden = dim * cfg['highres_mlp_factor']

    keys = iter(jax.random.split(key, 512))

    def nrm(shape, scale=0.02, dtype=jnp.float32):
        v = scale * jax.random.normal(next(keys), shape, dtype=jnp.float32)
        return v.astype(dtype)

    def zeros(shape):
        return jnp.zeros(shape, jnp.float32)

    def attn_params(heads, dim_head, cross=False, reuse=False):
        inner = heads * dim_head
        wv = nrm((dim, inner))
        d = {'wo': nrm((inner, dim), dtype=jnp.bfloat16)}
        if not reuse:
            d['norm_gamma'] = zeros((dim,))
            wq = nrm((dim, inner)) * (dim_head ** -0.5)      # scale folded into wq
            wk = nrm((dim, inner))
            if cross:
                d['wqk'] = jnp.concatenate([wq, wk], axis=1).astype(jnp.bfloat16)
                d['wv'] = wv.astype(jnp.bfloat16)
            else:
                d['wqkv'] = jnp.concatenate([wq, wk, wv], axis=1).astype(jnp.bfloat16)
        else:
            d['wv'] = wv.astype(jnp.bfloat16)
        if cross:
            d['norm_ctx_gamma'] = zeros((dim,))
        return d

    def mlp_params(hdim):
        return {'ln_gamma': zeros((dim,)),
                'w1': nrm((dim, hdim), dtype=jnp.bfloat16), 'b1': nrm((hdim,)),
                'w2': nrm((hdim, dim), dtype=jnp.bfloat16), 'b2': nrm((dim,))}

    layers = []
    for _ in range(cfg['depth']):
        layers.append({
            'attn': attn_params(cfg['heads'], cfg['dim_head']),
            'mlp': mlp_params(hidden),
            'lookup': attn_params(cfg['cross_attn_heads'],
                                  cfg['cross_attn_dim_head'], cross=True),
            'highres_attn': attn_params(cfg['cross_attn_heads'],
                                        cfg['cross_attn_dim_head'],
                                        cross=True, reuse=True),
            'highres_norm_gamma': zeros((dim,)),
            'highres_mlp': mlp_params(hhidden),
        })

    return {
        'conv_w': nrm((dim, cin, K, K)),
        'conv_b': nrm((dim,)),
        'layers': layers,
        'norm_gamma': zeros((dim,)),
        'highres_norm_gamma': zeros((dim,)),
        'logits_w': nrm((dim, cfg['num_classes']), dtype=jnp.bfloat16),
    }


# ----------------------------------------------------------------------------

if __name__ == "__main__":
    cfg = dict(
        dim=32, image_size=32, num_classes=10, depth=2,
        patch_size=8, heads=2, mlp_factor=4, dim_head=16,
        highres_patch_size=8, highres_mlp_factor=4,
        cross_attn_heads=2, cross_attn_dim_head=16,
        patch_conv_kernel_size=7, channels=3,
    )
    key = jax.random.PRNGKey(0)
    pkey, xkey = jax.random.split(key)
    params = init_params(pkey, cfg)
    x = jax.random.normal(
        xkey, (2, cfg['channels'], cfg['image_size'], cfg['image_size']),
        dtype=jnp.float32)

    fwd = jax.jit(functools.partial(look_vit_forward, cfg=cfg))
    logits = fwd(params, x)
    logits = jax.block_until_ready(logits)
    assert logits.shape == (2, cfg['num_classes'])
    print("KERNEL_OK")
</pallas_src>

<mosaic_0001>
module attributes {stable_mosaic.version = 11 : i64} {
  func.func @_layernorm_kernel(%arg0: i32, %arg1: memref<32x32xf32, #tpu.memory_space<vmem>>, %arg2: memref<1x32xf32, #tpu.memory_space<vmem>>, %arg3: memref<32x32xf32, #tpu.memory_space<vmem>>) attributes {dimension_semantics = [#tpu.dimension_semantics<parallel>], iteration_bounds = array<i64: 1>, scalar_prefetch = 0 : i64, scratch_operands = 0 : i64, tpu.core_type = #tpu.core_type<tc>, window_params = [{transform_indices = @transform_0, window_bounds = array<i64: 32, 32>}, {pipeline_mode = #tpu.pipeline_mode<synchronous>, transform_indices = @transform_1, window_bounds = array<i64: 1, 32>}, {transform_indices = @transform_2, window_bounds = array<i64: 32, 32>}]} {
    %c0 = arith.constant 0 : index
    %c0_0 = arith.constant 0 : index
    %0 = vector.load %arg1[%c0, %c0_0] : memref<32x32xf32, #tpu.memory_space<vmem>>, vector<32x32xf32>
    %c0_1 = arith.constant 0 : index
    %c0_2 = arith.constant 0 : index
    %1 = vector.load %arg2[%c0_1, %c0_2] : memref<1x32xf32, #tpu.memory_space<vmem>>, vector<1x32xf32>
    %cst = arith.constant dense<0.000000e+00> : vector<32xf32>
    %2 = vector.multi_reduction <add>, %0, %cst [1] : vector<32x32xf32> to vector<32xf32>
    %3 = vector.shape_cast %2 : vector<32xf32> to vector<32x1xf32>
    %cst_3 = arith.constant 3.200000e+01 : f32
    %4 = vector.broadcast %cst_3 : f32 to vector<32x1xf32>
    %5 = arith.divf %3, %4 : vector<32x1xf32>
    %6 = vector.broadcast %5 : vector<32x1xf32> to vector<32x32xf32>
    %7 = arith.subf %0, %6 : vector<32x32xf32>
    %8 = arith.mulf %7, %7 : vector<32x32xf32>
    %cst_4 = arith.constant dense<0.000000e+00> : vector<32xf32>
    %9 = vector.multi_reduction <add>, %8, %cst_4 [1] : vector<32x32xf32> to vector<32xf32>
    %10 = vector.shape_cast %9 : vector<32xf32> to vector<32x1xf32>
    %cst_5 = arith.constant 3.200000e+01 : f32
    %11 = vector.broadcast %cst_5 : f32 to vector<32x1xf32>
    %12 = arith.divf %10, %11 : vector<32x1xf32>
    %13 = vector.broadcast %5 : vector<32x1xf32> to vector<32x32xf32>
    %14 = arith.subf %0, %13 : vector<32x32xf32>
    %cst_6 = arith.constant 9.99999974E-6 : f32
    %15 = vector.broadcast %cst_6 : f32 to vector<32x1xf32>
    %16 = arith.addf %12, %15 : vector<32x1xf32>
    %17 = math.rsqrt %16 : vector<32x1xf32>
    %18 = vector.broadcast %17 : vector<32x1xf32> to vector<32x32xf32>
    %19 = arith.mulf %14, %18 : vector<32x32xf32>
    %cst_7 = arith.constant 1.000000e+00 : f32
    %20 = vector.broadcast %cst_7 : f32 to vector<1x32xf32>
    %21 = arith.addf %1, %20 : vector<1x32xf32>
    %22 = vector.broadcast %21 : vector<1x32xf32> to vector<32x32xf32>
    %23 = arith.mulf %19, %22 : vector<32x32xf32>
    %c0_8 = arith.constant 0 : index
    %c0_9 = arith.constant 0 : index
    %24 = vector.load %arg3[%c0_8, %c0_9] : memref<32x32xf32, #tpu.memory_space<vmem>>, vector<32x32xf32>
    tpu.vector_store %arg3[%c0_8, %c0_9], %23 {strides = array<i32>} : memref<32x32xf32, #tpu.memory_space<vmem>>, vector<32x32xf32>,
    return
  }
  func.func @transform_0(%arg0: i32) -> (i32, i32) {
    %c0_i32 = arith.constant 0 : i32
    %c0_i32_0 = arith.constant 0 : i32
    return %arg0, %c0_i32 : i32, i32
  }
  func.func @transform_1(%arg0: i32) -> (i32, i32) {
    %c0_i32 = arith.constant 0 : i32
    %c0_i32_0 = arith.constant 0 : i32
    %c0_i32_1 = arith.constant 0 : i32
    return %c0_i32, %c0_i32_0 : i32, i32
  }
  func.func @transform_2(%arg0: i32) -> (i32, i32) {
    %c0_i32 = arith.constant 0 : i32
    %c0_i32_0 = arith.constant 0 : i32
    return %arg0, %c0_i32 : i32, i32
  }
}

module attributes {stable_mosaic.version = 11 : i64} {
  func.func @_fused_linear_kernel(%arg0: i32, %arg1: i32, %arg2: i32, %arg3: memref<32x32xf32, #tpu.memory_space<vmem>>, %arg4: memref<1x32xf32, #tpu.memory_space<vmem>>, %arg5: memref<32x32xbf16, #tpu.memory_space<vmem>>, %arg6: memref<32x32xbf16, #tpu.memory_space<vmem>>, %arg7: memref<32x32xf32, #tpu.memory_space<vmem>>) attributes {dimension_semantics = [#tpu.dimension_semantics<parallel>, #tpu.dimension_semantics<parallel>, #tpu.dimension_semantics<arbitrary>], iteration_bounds = array<i64: 1, 1, 1>, scalar_prefetch = 0 : i64, scratch_operands = 1 : i64, tpu.core_type = #tpu.core_type<tc>, window_params = [{transform_indices = @transform_0, window_bounds = array<i64: 32, 32>}, {pipeline_mode = #tpu.pipeline_mode<synchronous>, transform_indices = @transform_1, window_bounds = array<i64: 1, 32>}, {transform_indices = @transform_2, window_bounds = array<i64: 32, 32>}, {transform_indices = @transform_3, window_bounds = array<i64: 32, 32>}]} {
    %c0_i32 = arith.constant 0 : i32
    %0 = arith.cmpi eq, %arg2, %c0_i32 : i32
    %1 = arith.extui %0 : i1 to i32
    %c0_i32_0 = arith.constant 0 : i32
    %2 = arith.cmpi ne, %1, %c0_i32_0 : i32
    scf.if %2 {
      %cst_18 = arith.constant 0.000000e+00 : f32
      %36 = vector.broadcast %cst_18 : f32 to vector<32x32xf32>
      %c0_19 = arith.constant 0 : index
      %c0_20 = arith.constant 0 : index
      %37 = vector.load %arg7[%c0_19, %c0_20] : memref<32x32xf32, #tpu.memory_space<vmem>>, vector<32x32xf32>
      tpu.vector_store %arg7[%c0_19, %c0_20], %36 {strides = array<i32>} : memref<32x32xf32, #tpu.memory_space<vmem>>, vector<32x32xf32>,
    } else {
    }
    %c0 = arith.constant 0 : index
    %c0_1 = arith.constant 0 : index
    %3 = vector.load %arg3[%c0, %c0_1] : memref<32x32xf32, #tpu.memory_space<vmem>>, vector<32x32xf32>
    %c0_2 = arith.constant 0 : index
    %c0_3 = arith.constant 0 : index
    %4 = vector.load %arg4[%c0_2, %c0_3] : memref<1x32xf32, #tpu.memory_space<vmem>>, vector<1x32xf32>
    %cst = arith.constant dense<0.000000e+00> : vector<32xf32>
    %5 = vector.multi_reduction <add>, %3, %cst [1] : vector<32x32xf32> to vector<32xf32>
    %6 = vector.shape_cast %5 : vector<32xf32> to vector<32x1xf32>
    %cst_4 = arith.constant 3.200000e+01 : f32
    %7 = vector.broadcast %cst_4 : f32 to vector<32x1xf32>
    %8 = arith.divf %6, %7 : vector<32x1xf32>
    %9 = vector.broadcast %8 : vector<32x1xf32> to vector<32x32xf32>
    %10 = arith.subf %3, %9 : vector<32x32xf32>
    %11 = arith.mulf %10, %10 : vector<32x32xf32>
    %cst_5 = arith.constant dense<0.000000e+00> : vector<32xf32>
    %12 = vector.multi_reduction <add>, %11, %cst_5 [1] : vector<32x32xf32> to vector<32xf32>
    %13 = vector.shape_cast %12 : vector<32xf32> to vector<32x1xf32>
    %cst_6 = arith.constant 3.200000e+01 : f32
    %14 = vector.broadcast %cst_6 : f32 to vector<32x1xf32>
    %15 = arith.divf %13, %14 : vector<32x1xf32>
    %16 = vector.broadcast %8 : vector<32x1xf32> to vector<32x32xf32>
    %17 = arith.subf %3, %16 : vector<32x32xf32>
    %cst_7 = arith.constant 9.99999974E-6 : f32
    %18 = vector.broadcast %cst_7 : f32 to vector<32x1xf32>
    %19 = arith.addf %15, %18 : vector<32x1xf32>
    %20 = math.rsqrt %19 : vector<32x1xf32>
    %21 = vector.broadcast %20 : vector<32x1xf32> to vector<32x32xf32>
    %22 = arith.mulf %17, %21 : vector<32x32xf32>
    %cst_8 = arith.constant 1.000000e+00 : f32
    %23 = vector.broadcast %cst_8 : f32 to vector<1x32xf32>
    %24 = arith.addf %4, %23 : vector<1x32xf32>
    %25 = vector.broadcast %24 : vector<1x32xf32> to vector<32x32xf32>
    %26 = arith.mulf %22, %25 : vector<32x32xf32>
    %c0_9 = arith.constant 0 : index
    %c0_10 = arith.constant 0 : index
    %27 = vector.load %arg7[%c0_9, %c0_10] : memref<32x32xf32, #tpu.memory_space<vmem>>, vector<32x32xf32>
    %28 = arith.truncf %26 : vector<32x32xf32> to vector<32x32xbf16>
    %c0_11 = arith.constant 0 : index
    %c0_12 = arith.constant 0 : index
    %29 = vector.load %arg5[%c0_11, %c0_12] : memref<32x32xbf16, #tpu.memory_space<vmem>>, vector<32x32xbf16>
    %cst_13 = arith.constant dense<0.000000e+00> : vector<32x32xf32>
    %30 = tpu.matmul %28, %29, %cst_13 {dimension_numbers = #tpu.dot_dimension_numbers<[1], [0], [0], [1], [0, 0, 1, 1], [], []>} : vector<32x32xbf16>, vector<32x32xbf16>, vector<32x32xf32> -> vector<32x32xf32>
    %31 = arith.addf %27, %30 : vector<32x32xf32>
    %c0_14 = arith.constant 0 : index
    %c0_15 = arith.constant 0 : index
    %32 = vector.load %arg7[%c0_14, %c0_15] : memref<32x32xf32, #tpu.memory_space<vmem>>, vector<32x32xf32>
    tpu.vector_store %arg7[%c0_14, %c0_15], %31 {strides = array<i32>} : memref<32x32xf32, #tpu.memory_space<vmem>>, vector<32x32xf32>,
    %c0_i32_16 = arith.constant 0 : i32
    %33 = arith.cmpi eq, %arg2, %c0_i32_16 : i32
    %34 = arith.extui %33 : i1 to i32
    %c0_i32_17 = arith.constant 0 : i32
    %35 = arith.cmpi ne, %34, %c0_i32_17 : i32
    scf.if %35 {
      %c0_18 = arith.constant 0 : index
      %c0_19 = arith.constant 0 : index
      %36 = vector.load %arg7[%c0_18, %c0_19] : memref<32x32xf32, #tpu.memory_space<vmem>>, vector<32x32xf32>
      %37 = arith.truncf %36 : vector<32x32xf32> to vector<32x32xbf16>
      %c0_20 = arith.constant 0 : index
      %c0_21 = arith.constant 0 : index
      %38 = vector.load %arg6[%c0_20, %c0_21] : memref<32x32xbf16, #tpu.memory_space<vmem>>, vector<32x32xbf16>
      tpu.vector_store %arg6[%c0_20, %c0_21], %37 {strides = array<i32>} : memref<32x32xbf16, #tpu.memory_space<vmem>>, vector<32x32xbf16>,
    } else {
    }
    return
  }
  func.func @transform_0(%arg0: i32, %arg1: i32, %arg2: i32) -> (i32, i32) {
    %c0_i32 = arith.constant 0 : i32
    return %arg0, %arg2 : i32, i32
  }
  func.func @transform_1(%arg0: i32, %arg1: i32, %arg2: i32) -> (i32, i32) {
    %c0_i32 = arith.constant 0 : i32
    %c0_i32_0 = arith.constant 0 : i32
    %c0_i32_1 = arith.constant 0 : i32
    return %c0_i32, %c0_i32_0 : i32, i32
  }
  func.func @transform_2(%arg0: i32, %arg1: i32, %arg2: i32) -> (i32, i32) {
    %c0_i32 = arith.constant 0 : i32
    return %arg2, %arg1 : i32, i32
  }
  func.func @transform_3(%arg0: i32, %arg1: i32, %arg2: i32) -> (i32, i32) {
    %c0_i32 = arith.constant 0 : i32
    return %arg0, %arg1 : i32, i32
  }
}

module attributes {stable_mosaic.version = 11 : i64} {
  func.func @_fused_linear_kernel(%arg0: i32, %arg1: i32, %arg2: i32, %arg3: memref<32x32xf32, #tpu.memory_space<vmem>>, %arg4: memref<1x32xf32, #tpu.memory_space<vmem>>, %arg5: memref<32x64xbf16, #tpu.memory_space<vmem>>, %arg6: memref<32x64xbf16, #tpu.memory_space<vmem>>, %arg7: memref<32x64xf32, #tpu.memory_space<vmem>>) attributes {dimension_semantics = [#tpu.dimension_semantics<parallel>, #tpu.dimension_semantics<parallel>, #tpu.dimension_semantics<arbitrary>], iteration_bounds = array<i64: 1, 1, 1>, scalar_prefetch = 0 : i64, scratch_operands = 1 : i64, tpu.core_type = #tpu.core_type<tc>, window_params = [{transform_indices = @transform_0, window_bounds = array<i64: 32, 32>}, {pipeline_mode = #tpu.pipeline_mode<synchronous>, transform_indices = @transform_1, window_bounds = array<i64: 1, 32>}, {transform_indices = @transform_2, window_bounds = array<i64: 32, 64>}, {transform_indices = @transform_3, window_bounds = array<i64: 32, 64>}]} {
    %c0_i32 = arith.constant 0 : i32
    %0 = arith.cmpi eq, %arg2, %c0_i32 : i32
    %1 = arith.extui %0 : i1 to i32
    %c0_i32_0 = arith.constant 0 : i32
    %2 = arith.cmpi ne, %1, %c0_i32_0 : i32
    scf.if %2 {
      %cst_18 = arith.constant 0.000000e+00 : f32
      %36 = vector.broadcast %cst_18 : f32 to vector<32x64xf32>
      %c0_19 = arith.constant 0 : index
      %c0_20 = arith.constant 0 : index
      %37 = vector.load %arg7[%c0_19, %c0_20] : memref<32x64xf32, #tpu.memory_space<vmem>>, vector<32x64xf32>
      tpu.vector_store %arg7[%c0_19, %c0_20], %36 {strides = array<i32>} : memref<32x64xf32, #tpu.memory_space<vmem>>, vector<32x64xf32>,
    } else {
    }
    %c0 = arith.constant 0 : index
    %c0_1 = arith.constant 0 : index
    %3 = vector.load %arg3[%c0, %c0_1] : memref<32x32xf32, #tpu.memory_space<vmem>>, vector<32x32xf32>
    %c0_2 = arith.constant 0 : index
    %c0_3 = arith.constant 0 : index
    %4 = vector.load %arg4[%c0_2, %c0_3] : memref<1x32xf32, #tpu.memory_space<vmem>>, vector<1x32xf32>
    %cst = arith.constant dense<0.000000e+00> : vector<32xf32>
    %5 = vector.multi_reduction <add>, %3, %cst [1] : vector<32x32xf32> to vector<32xf32>
    %6 = vector.shape_cast %5 : vector<32xf32> to vector<32x1xf32>
    %cst_4 = arith.constant 3.200000e+01 : f32
    %7 = vector.broadcast %cst_4 : f32 to vector<32x1xf32>
    %8 = arith.divf %6, %7 : vector<32x1xf32>
    %9 = vector.broadcast %8 : vector<32x1xf32> to vector<32x32xf32>
    %10 = arith.subf %3, %9 : vector<32x32xf32>
    %11 = arith.mulf %10, %10 : vector<32x32xf32>
    %cst_5 = arith.constant dense<0.000000e+00> : vector<32xf32>
    %12 = vector.multi_reduction <add>, %11, %cst_5 [1] : vector<32x32xf32> to vector<32xf32>
    %13 = vector.shape_cast %12 : vector<32xf32> to vector<32x1xf32>
    %cst_6 = arith.constant 3.200000e+01 : f32
    %14 = vector.broadcast %cst_6 : f32 to vector<32x1xf32>
    %15 = arith.divf %13, %14 : vector<32x1xf32>
    %16 = vector.broadcast %8 : vector<32x1xf32> to vector<32x32xf32>
    %17 = arith.subf %3, %16 : vector<32x32xf32>
    %cst_7 = arith.constant 9.99999974E-6 : f32
    %18 = vector.broadcast %cst_7 : f32 to vector<32x1xf32>
    %19 = arith.addf %15, %18 : vector<32x1xf32>
    %20 = math.rsqrt %19 : vector<32x1xf32>
    %21 = vector.broadcast %20 : vector<32x1xf32> to vector<32x32xf32>
    %22 = arith.mulf %17, %21 : vector<32x32xf32>
    %cst_8 = arith.constant 1.000000e+00 : f32
    %23 = vector.broadcast %cst_8 : f32 to vector<1x32xf32>
    %24 = arith.addf %4, %23 : vector<1x32xf32>
    %25 = vector.broadcast %24 : vector<1x32xf32> to vector<32x32xf32>
    %26 = arith.mulf %22, %25 : vector<32x32xf32>
    %c0_9 = arith.constant 0 : index
    %c0_10 = arith.constant 0 : index
    %27 = vector.load %arg7[%c0_9, %c0_10] : memref<32x64xf32, #tpu.memory_space<vmem>>, vector<32x64xf32>
    %28 = arith.truncf %26 : vector<32x32xf32> to vector<32x32xbf16>
    %c0_11 = arith.constant 0 : index
    %c0_12 = arith.constant 0 : index
    %29 = vector.load %arg5[%c0_11, %c0_12] : memref<32x64xbf16, #tpu.memory_space<vmem>>, vector<32x64xbf16>
    %cst_13 = arith.constant dense<0.000000e+00> : vector<32x64xf32>
    %30 = tpu.matmul %28, %29, %cst_13 {dimension_numbers = #tpu.dot_dimension_numbers<[1], [0], [0], [1], [0, 0, 1, 1], [], []>} : vector<32x32xbf16>, vector<32x64xbf16>, vector<32x64xf32> -> vector<32x64xf32>
    %31 = arith.addf %27, %30 : vector<32x64xf32>
    %c0_14 = arith.constant 0 : index
    %c0_15 = arith.constant 0 : index
    %32 = vector.load %arg7[%c0_14, %c0_15] : memref<32x64xf32, #tpu.memory_space<vmem>>, vector<32x64xf32>
    tpu.vector_store %arg7[%c0_14, %c0_15], %31 {strides = array<i32>} : memref<32x64xf32, #tpu.memory_space<vmem>>, vector<32x64xf32>,
    %c0_i32_16 = arith.constant 0 : i32
    %33 = arith.cmpi eq, %arg2, %c0_i32_16 : i32
    %34 = arith.extui %33 : i1 to i32
    %c0_i32_17 = arith.constant 0 : i32
    %35 = arith.cmpi ne, %34, %c0_i32_17 : i32
    scf.if %35 {
      %c0_18 = arith.constant 0 : index
      %c0_19 = arith.constant 0 : index
      %36 = vector.load %arg7[%c0_18, %c0_19] : memref<32x64xf32, #tpu.memory_space<vmem>>, vector<32x64xf32>
      %37 = arith.truncf %36 : vector<32x64xf32> to vector<32x64xbf16>
      %c0_20 = arith.constant 0 : index
      %c0_21 = arith.constant 0 : index
      %38 = vector.load %arg6[%c0_20, %c0_21] : memref<32x64xbf16, #tpu.memory_space<vmem>>, vector<32x64xbf16>
      tpu.vector_store %arg6[%c0_20, %c0_21], %37 {strides = array<i32>} : memref<32x64xbf16, #tpu.memory_space<vmem>>, vector<32x64xbf16>,
    } else {
    }
    return
  }
  func.func @transform_0(%arg0: i32, %arg1: i32, %arg2: i32) -> (i32, i32) {
    %c0_i32 = arith.constant 0 : i32
    return %arg0, %arg2 : i32, i32
  }
  func.func @transform_1(%arg0: i32, %arg1: i32, %arg2: i32) -> (i32, i32) {
    %c0_i32 = arith.constant 0 : i32
    %c0_i32_0 = arith.constant 0 : i32
    %c0_i32_1 = arith.constant 0 : i32
    return %c0_i32, %c0_i32_0 : i32, i32
  }
  func.func @transform_2(%arg0: i32, %arg1: i32, %arg2: i32) -> (i32, i32) {
    %c0_i32 = arith.constant 0 : i32
    return %arg2, %arg1 : i32, i32
  }
  func.func @transform_3(%arg0: i32, %arg1: i32, %arg2: i32) -> (i32, i32) {
    %c0_i32 = arith.constant 0 : i32
    return %arg0, %arg1 : i32, i32
  }
}

module attributes {stable_mosaic.version = 11 : i64} {
  func.func @_attn_core_kernel(%arg0: i32, %arg1: memref<1x16x64xbf16, #tpu.memory_space<vmem>>, %arg2: memref<1x16x32xbf16, #tpu.memory_space<vmem>>, %arg3: memref<1x16x32xbf16, #tpu.memory_space<vmem>>, %arg4: memref<1x2x16x16xbf16, #tpu.memory_space<vmem>>) attributes {dimension_semantics = [#tpu.dimension_semantics<parallel>], iteration_bounds = array<i64: 2>, scalar_prefetch = 0 : i64, scratch_operands = 0 : i64, tpu.core_type = #tpu.core_type<tc>, window_params = [{transform_indices = @transform_0, window_bounds = array<i64: 1, 16, 64>}, {transform_indices = @transform_1, window_bounds = array<i64: 1, 16, 32>}, {transform_indices = @transform_2, window_bounds = array<i64: 1, 16, 32>}, {transform_indices = @transform_3, window_bounds = array<i64: 1, 2, 16, 16>}]} {
    %c0 = arith.constant 0 : index
    %c0_0 = arith.constant 0 : index
    %c0_1 = arith.constant 0 : index
    %0 = vector.load %arg1[%c0, %c0_0, %c0_1] : memref<1x16x64xbf16, #tpu.memory_space<vmem>>, vector<1x16x64xbf16>
    %1 = vector.shape_cast %0 : vector<1x16x64xbf16> to vector<16x64xbf16>
    %c0_2 = arith.constant 0 : index
    %c0_3 = arith.constant 0 : index
    %c0_4 = arith.constant 0 : index
    %2 = vector.load %arg2[%c0_2, %c0_3, %c0_4] : memref<1x16x32xbf16, #tpu.memory_space<vmem>>, vector<1x16x32xbf16>
    %3 = vector.shape_cast %2 : vector<1x16x32xbf16> to vector<16x32xbf16>
    %4 = vector.extract_strided_slice %1 {offsets = [0, 0], sizes = [16, 16], strides = [1, 1]} : vector<16x64xbf16> to vector<16x16xbf16>
    %5 = vector.extract_strided_slice %1 {offsets = [0, 32], sizes = [16, 16], strides = [1, 1]} : vector<16x64xbf16> to vector<16x16xbf16>
    %6 = vector.extract_strided_slice %3 {offsets = [0, 0], sizes = [16, 16], strides = [1, 1]} : vector<16x32xbf16> to vector<16x16xbf16>
    %cst = arith.constant dense<0.000000e+00> : vector<16x16xf32>
    %7 = tpu.matmul %4, %5, %cst {dimension_numbers = #tpu.dot_dimension_numbers<[1], [1], [0], [0], [0, 0, 1, 0], [], []>} : vector<16x16xbf16>, vector<16x16xbf16>, vector<16x16xf32> -> vector<16x16xf32>
    %cst_5 = arith.constant dense<0xFF800000> : vector<16xf32>
    %8 = vector.multi_reduction <maximumf>, %7, %cst_5 [1] : vector<16x16xf32> to vector<16xf32>
    %9 = vector.shape_cast %8 : vector<16xf32> to vector<16x1xf32>
    %10 = vector.broadcast %9 : vector<16x1xf32> to vector<16x16xf32>
    %11 = arith.subf %7, %10 : vector<16x16xf32>
    %12 = math.exp %11 : vector<16x16xf32>
    %cst_6 = arith.constant dense<0.000000e+00> : vector<16xf32>
    %13 = vector.multi_reduction <add>, %12, %cst_6 [1] : vector<16x16xf32> to vector<16xf32>
    %14 = vector.shape_cast %13 : vector<16xf32> to vector<16x1xf32>
    %15 = tpu.reciprocal %14 {approx = true} : vector<16x1xf32> -> vector<16x1xf32>
    %16 = vector.broadcast %15 : vector<16x1xf32> to vector<16x16xf32>
    %17 = arith.mulf %12, %16 : vector<16x16xf32>
    %18 = arith.truncf %17 : vector<16x16xf32> to vector<16x16xbf16>
    %cst_7 = arith.constant dense<0.000000e+00> : vector<16x16xf32>
    %19 = tpu.matmul %18, %6, %cst_7 {dimension_numbers = #tpu.dot_dimension_numbers<[1], [0], [0], [1], [0, 0, 1, 1], [], []>} : vector<16x16xbf16>, vector<16x16xbf16>, vector<16x16xf32> -> vector<16x16xf32>
    %20 = arith.truncf %19 : vector<16x16xf32> to vector<16x16xbf16>
    %c0_8 = arith.constant 0 : index
    %c0_9 = arith.constant 0 : index
    %c0_10 = arith.constant 0 : index
    %21 = vector.load %arg3[%c0_8, %c0_9, %c0_10] : memref<1x16x32xbf16, #tpu.memory_space<vmem>>, vector<1x16x16xbf16>
    %22 = vector.shape_cast %21 : vector<1x16x16xbf16> to vector<16x16xbf16>
    %23 = vector.shape_cast %20 : vector<16x16xbf16> to vector<1x16x16xbf16>
    tpu.vector_store %arg3[%c0_8, %c0_9, %c0_10], %23 {strides = array<i32>} : memref<1x16x32xbf16, #tpu.memory_space<vmem>>, vector<1x16x16xbf16>,
    %24 = arith.truncf %7 : vector<16x16xf32> to vector<16x16xbf16>
    %c0_11 = arith.constant 0 : index
    %c0_12 = arith.constant 0 : index
    %c0_13 = arith.constant 0 : index
    %c0_14 = arith.constant 0 : index
    %25 = vector.load %arg4[%c0_11, %c0_12, %c0_13, %c0_14] : memref<1x2x16x16xbf16, #tpu.memory_space<vmem>>, vector<1x1x16x16xbf16>
    %26 = vector.shape_cast %25 : vector<1x1x16x16xbf16> to vector<16x16xbf16>
    %27 = vector.shape_cast %24 : vector<16x16xbf16> to vector<1x1x16x16xbf16>
    tpu.vector_store %arg4[%c0_11, %c0_12, %c0_13, %c0_14], %27 {strides = array<i32>} : memref<1x2x16x16xbf16, #tpu.memory_space<vmem>>, vector<1x1x16x16xbf16>,
    %28 = vector.extract_strided_slice %1 {offsets = [0, 16], sizes = [16, 16], strides = [1, 1]} : vector<16x64xbf16> to vector<16x16xbf16>
    %29 = vector.extract_strided_slice %1 {offsets = [0, 48], sizes = [16, 16], strides = [1, 1]} : vector<16x64xbf16> to vector<16x16xbf16>
    %30 = vector.extract_strided_slice %3 {offsets = [0, 16], sizes = [16, 16], strides = [1, 1]} : vector<16x32xbf16> to vector<16x16xbf16>
    %cst_15 = arith.constant dense<0.000000e+00> : vector<16x16xf32>
    %31 = tpu.matmul %28, %29, %cst_15 {dimension_numbers = #tpu.dot_dimension_numbers<[1], [1], [0], [0], [0, 0, 1, 0], [], []>} : vector<16x16xbf16>, vector<16x16xbf16>, vector<16x16xf32> -> vector<16x16xf32>
    %cst_16 = arith.constant dense<0xFF800000> : vector<16xf32>
    %32 = vector.multi_reduction <maximumf>, %31, %cst_16 [1] : vector<16x16xf32> to vector<16xf32>
    %33 = vector.shape_cast %32 : vector<16xf32> to vector<16x1xf32>
    %34 = vector.broadcast %33 : vector<16x1xf32> to vector<16x16xf32>
    %35 = arith.subf %31, %34 : vector<16x16xf32>
    %36 = math.exp %35 : vector<16x16xf32>
    %cst_17 = arith.constant dense<0.000000e+00> : vector<16xf32>
    %37 = vector.multi_reduction <add>, %36, %cst_17 [1] : vector<16x16xf32> to vector<16xf32>
    %38 = vector.shape_cast %37 : vector<16xf32> to vector<16x1xf32>
    %39 = tpu.reciprocal %38 {approx = true} : vector<16x1xf32> -> vector<16x1xf32>
    %40 = vector.broadcast %39 : vector<16x1xf32> to vector<16x16xf32>
    %41 = arith.mulf %36, %40 : vector<16x16xf32>
    %42 = arith.truncf %41 : vector<16x16xf32> to vector<16x16xbf16>
    %cst_18 = arith.constant dense<0.000000e+00> : vector<16x16xf32>
    %43 = tpu.matmul %42, %30, %cst_18 {dimension_numbers = #tpu.dot_dimension_numbers<[1], [0], [0], [1], [0, 0, 1, 1], [], []>} : vector<16x16xbf16>, vector<16x16xbf16>, vector<16x16xf32> -> vector<16x16xf32>
    %44 = arith.truncf %43 : vector<16x16xf32> to vector<16x16xbf16>
    %c0_19 = arith.constant 0 : index
    %c0_20 = arith.constant 0 : index
    %c16 = arith.constant 16 : index
    %45 = vector.load %arg3[%c0_19, %c0_20, %c16] : memref<1x16x32xbf16, #tpu.memory_space<vmem>>, vector<1x16x16xbf16>
    %46 = vector.shape_cast %45 : vector<1x16x16xbf16> to vector<16x16xbf16>
    %47 = vector.shape_cast %44 : vector<16x16xbf16> to vector<1x16x16xbf16>
    tpu.vector_store %arg3[%c0_19, %c0_20, %c16], %47 {strides = array<i32>} : memref<1x16x32xbf16, #tpu.memory_space<vmem>>, vector<1x16x16xbf16>,
    %48 = arith.truncf %31 : vector<16x16xf32> to vector<16x16xbf16>
    %c0_21 = arith.constant 0 : index
    %c1 = arith.constant 1 : index
    %c0_22 = arith.constant 0 : index
    %c0_23 = arith.constant 0 : index
    %49 = vector.load %arg4[%c0_21, %c1, %c0_22, %c0_23] : memref<1x2x16x16xbf16, #tpu.memory_space<vmem>>, vector<1x1x16x16xbf16>
    %50 = vector.shape_cast %49 : vector<1x1x16x16xbf16> to vector<16x16xbf16>
    %51 = vector.shape_cast %48 : vector<16x16xbf16> to vector<1x1x16x16xbf16>
    tpu.vector_store %arg4[%c0_21, %c1, %c0_22, %c0_23], %51 {strides = array<i32>} : memref<1x2x16x16xbf16, #tpu.memory_space<vmem>>, vector<1x1x16x16xbf16>,
    return
  }
  func.func @transform_0(%arg0: i32) -> (i32, i32, i32) {
    %c0_i32 = arith.constant 0 : i32
    %c0_i32_0 = arith.constant 0 : i32
    %c0_i32_1 = arith.constant 0 : i32
    return %arg0, %c0_i32, %c0_i32_0 : i32, i32, i32
  }
  func.func @transform_1(%arg0: i32) -> (i32, i32, i32) {
    %c0_i32 = arith.constant 0 : i32
    %c0_i32_0 = arith.constant 0 : i32
    %c0_i32_1 = arith.constant 0 : i32
    return %arg0, %c0_i32, %c0_i32_0 : i32, i32, i32
  }
  func.func @transform_2(%arg0: i32) -> (i32, i32, i32) {
    %c0_i32 = arith.constant 0 : i32
    %c0_i32_0 = arith.constant 0 : i32
    %c0_i32_1 = arith.constant 0 : i32
    return %arg0, %c0_i32, %c0_i32_0 : i32, i32, i32
  }
  func.func @transform_3(%arg0: i32) -> (i32, i32, i32, i32) {
    %c0_i32 = arith.constant 0 : i32
    %c0_i32_0 = arith.constant 0 : i32
    %c0_i32_1 = arith.constant 0 : i32
    %c0_i32_2 = arith.constant 0 : i32
    return %arg0, %c0_i32, %c0_i32_0, %c0_i32_1 : i32, i32, i32, i32
  }
}

module attributes {stable_mosaic.version = 11 : i64} {
  func.func @_fused_linear_kernel(%arg0: i32, %arg1: i32, %arg2: i32, %arg3: memref<32x32xbf16, #tpu.memory_space<vmem>>, %arg4: memref<32x32xbf16, #tpu.memory_space<vmem>>, %arg5: memref<32x32xf32, #tpu.memory_space<vmem>>, %arg6: memref<32x32xf32, #tpu.memory_space<vmem>>, %arg7: memref<32x32xf32, #tpu.memory_space<vmem>>) attributes {dimension_semantics = [#tpu.dimension_semantics<parallel>, #tpu.dimension_semantics<parallel>, #tpu.dimension_semantics<arbitrary>], iteration_bounds = array<i64: 1, 1, 1>, scalar_prefetch = 0 : i64, scratch_operands = 1 : i64, tpu.core_type = #tpu.core_type<tc>, window_params = [{transform_indices = @transform_0, window_bounds = array<i64: 32, 32>}, {transform_indices = @transform_1, window_bounds = array<i64: 32, 32>}, {transform_indices = @transform_2, window_bounds = array<i64: 32, 32>}, {transform_indices = @transform_3, window_bounds = array<i64: 32, 32>}]} {
    %c0_i32 = arith.constant 0 : i32
    %0 = arith.cmpi eq, %arg2, %c0_i32 : i32
    %1 = arith.extui %0 : i1 to i32
    %c0_i32_0 = arith.constant 0 : i32
    %2 = arith.cmpi ne, %1, %c0_i32_0 : i32
    scf.if %2 {
      %cst_10 = arith.constant 0.000000e+00 : f32
      %14 = vector.broadcast %cst_10 : f32 to vector<32x32xf32>
      %c0_11 = arith.constant 0 : index
      %c0_12 = arith.constant 0 : index
      %15 = vector.load %arg7[%c0_11, %c0_12] : memref<32x32xf32, #tpu.memory_space<vmem>>, vector<32x32xf32>
      tpu.vector_store %arg7[%c0_11, %c0_12], %14 {strides = array<i32>} : memref<32x32xf32, #tpu.memory_space<vmem>>, vector<32x32xf32>,
    } else {
    }
    %c0 = arith.constant 0 : index
    %c0_1 = arith.constant 0 : index
    %3 = vector.load %arg3[%c0, %c0_1] : memref<32x32xbf16, #tpu.memory_space<vmem>>, vector<32x32xbf16>
    %4 = arith.extf %3 : vector<32x32xbf16> to vector<32x32xf32>
    %c0_2 = arith.constant 0 : index
    %c0_3 = arith.constant 0 : index
    %5 = vector.load %arg7[%c0_2, %c0_3] : memref<32x32xf32, #tpu.memory_space<vmem>>, vector<32x32xf32>
    %6 = arith.truncf %4 : vector<32x32xf32> to vector<32x32xbf16>
    %c0_4 = arith.constant 0 : index
    %c0_5 = arith.constant 0 : index
    %7 = vector.load %arg4[%c0_4, %c0_5] : memref<32x32xbf16, #tpu.memory_space<vmem>>, vector<32x32xbf16>
    %cst = arith.constant dense<0.000000e+00> : vector<32x32xf32>
    %8 = tpu.matmul %6, %7, %cst {dimension_numbers = #tpu.dot_dimension_numbers<[1], [0], [0], [1], [0, 0, 1, 1], [], []>} : vector<32x32xbf16>, vector<32x32xbf16>, vector<32x32xf32> -> vector<32x32xf32>
    %9 = arith.addf %5, %8 : vector<32x32xf32>
    %c0_6 = arith.constant 0 : index
    %c0_7 = arith.constant 0 : index
    %10 = vector.load %arg7[%c0_6, %c0_7] : memref<32x32xf32, #tpu.memory_space<vmem>>, vector<32x32xf32>
    tpu.vector_store %arg7[%c0_6, %c0_7], %9 {strides = array<i32>} : memref<32x32xf32, #tpu.memory_space<vmem>>, vector<32x32xf32>,
    %c0_i32_8 = arith.constant 0 : i32
    %11 = arith.cmpi eq, %arg2, %c0_i32_8 : i32
    %12 = arith.extui %11 : i1 to i32
    %c0_i32_9 = arith.constant 0 : i32
    %13 = arith.cmpi ne, %12, %c0_i32_9 : i32
    scf.if %13 {
      %c0_10 = arith.constant 0 : index
      %c0_11 = arith.constant 0 : index
      %14 = vector.load %arg7[%c0_10, %c0_11] : memref<32x32xf32, #tpu.memory_space<vmem>>, vector<32x32xf32>
      %c0_12 = arith.constant 0 : index
      %c0_13 = arith.constant 0 : index
      %15 = vector.load %arg5[%c0_12, %c0_13] : memref<32x32xf32, #tpu.memory_space<vmem>>, vector<32x32xf32>
      %16 = arith.addf %14, %15 : vector<32x32xf32>
      %c0_14 = arith.constant 0 : index
      %c0_15 = arith.constant 0 : index
      %17 = vector.load %arg6[%c0_14, %c0_15] : memref<32x32xf32, #tpu.memory_space<vmem>>, vector<32x32xf32>
      tpu.vector_store %arg6[%c0_14, %c0_15], %16 {strides = array<i32>} : memref<32x32xf32, #tpu.memory_space<vmem>>, vector<32x32xf32>,
    } else {
    }
    return
  }
  func.func @transform_0(%arg0: i32, %arg1: i32, %arg2: i32) -> (i32, i32) {
    %c0_i32 = arith.constant 0 : i32
    return %arg0, %arg2 : i32, i32
  }
  func.func @transform_1(%arg0: i32, %arg1: i32, %arg2: i32) -> (i32, i32) {
    %c0_i32 = arith.constant 0 : i32
    return %arg2, %arg1 : i32, i32
  }
  func.func @transform_2(%arg0: i32, %arg1: i32, %arg2: i32) -> (i32, i32) {
    %c0_i32 = arith.constant 0 : i32
    return %arg0, %arg1 : i32, i32
  }
  func.func @transform_3(%arg0: i32, %arg1: i32, %arg2: i32) -> (i32, i32) {
    %c0_i32 = arith.constant 0 : i32
    return %arg0, %arg1 : i32, i32
  }
}

module attributes {stable_mosaic.version = 11 : i64} {
  func.func @_fused_linear_kernel(%arg0: i32, %arg1: i32, %arg2: i32, %arg3: memref<32x32xf32, #tpu.memory_space<vmem>>, %arg4: memref<1x32xf32, #tpu.memory_space<vmem>>, %arg5: memref<32x96xbf16, #tpu.memory_space<vmem>>, %arg6: memref<32x96xbf16, #tpu.memory_space<vmem>>, %arg7: memref<32x96xf32, #tpu.memory_space<vmem>>) attributes {dimension_semantics = [#tpu.dimension_semantics<parallel>, #tpu.dimension_semantics<parallel>, #tpu.dimension_semantics<arbitrary>], iteration_bounds = array<i64: 1, 1, 1>, scalar_prefetch = 0 : i64, scratch_operands = 1 : i64, tpu.core_type = #tpu.core_type<tc>, window_params = [{transform_indices = @transform_0, window_bounds = array<i64: 32, 32>}, {pipeline_mode = #tpu.pipeline_mode<synchronous>, transform_indices = @transform_1, window_bounds = array<i64: 1, 32>}, {transform_indices = @transform_2, window_bounds = array<i64: 32, 96>}, {transform_indices = @transform_3, window_bounds = array<i64: 32, 96>}]} {
    %c0_i32 = arith.constant 0 : i32
    %0 = arith.cmpi eq, %arg2, %c0_i32 : i32
    %1 = arith.extui %0 : i1 to i32
    %c0_i32_0 = arith.constant 0 : i32
    %2 = arith.cmpi ne, %1, %c0_i32_0 : i32
    scf.if %2 {
      %cst_18 = arith.constant 0.000000e+00 : f32
      %36 = vector.broadcast %cst_18 : f32 to vector<32x96xf32>
      %c0_19 = arith.constant 0 : index
      %c0_20 = arith.constant 0 : index
      %37 = vector.load %arg7[%c0_19, %c0_20] : memref<32x96xf32, #tpu.memory_space<vmem>>, vector<32x96xf32>
      tpu.vector_store %arg7[%c0_19, %c0_20], %36 {strides = array<i32>} : memref<32x96xf32, #tpu.memory_space<vmem>>, vector<32x96xf32>,
    } else {
    }
    %c0 = arith.constant 0 : index
    %c0_1 = arith.constant 0 : index
    %3 = vector.load %arg3[%c0, %c0_1] : memref<32x32xf32, #tpu.memory_space<vmem>>, vector<32x32xf32>
    %c0_2 = arith.constant 0 : index
    %c0_3 = arith.constant 0 : index
    %4 = vector.load %arg4[%c0_2, %c0_3] : memref<1x32xf32, #tpu.memory_space<vmem>>, vector<1x32xf32>
    %cst = arith.constant dense<0.000000e+00> : vector<32xf32>
    %5 = vector.multi_reduction <add>, %3, %cst [1] : vector<32x32xf32> to vector<32xf32>
    %6 = vector.shape_cast %5 : vector<32xf32> to vector<32x1xf32>
    %cst_4 = arith.constant 3.200000e+01 : f32
    %7 = vector.broadcast %cst_4 : f32 to vector<32x1xf32>
    %8 = arith.divf %6, %7 : vector<32x1xf32>
    %9 = vector.broadcast %8 : vector<32x1xf32> to vector<32x32xf32>
    %10 = arith.subf %3, %9 : vector<32x32xf32>
    %11 = arith.mulf %10, %10 : vector<32x32xf32>
    %cst_5 = arith.constant dense<0.000000e+00> : vector<32xf32>
    %12 = vector.multi_reduction <add>, %11, %cst_5 [1] : vector<32x32xf32> to vector<32xf32>
    %13 = vector.shape_cast %12 : vector<32xf32> to vector<32x1xf32>
    %cst_6 = arith.constant 3.200000e+01 : f32
    %14 = vector.broadcast %cst_6 : f32 to vector<32x1xf32>
    %15 = arith.divf %13, %14 : vector<32x1xf32>
    %16 = vector.broadcast %8 : vector<32x1xf32> to vector<32x32xf32>
    %17 = arith.subf %3, %16 : vector<32x32xf32>
    %cst_7 = arith.constant 9.99999974E-6 : f32
    %18 = vector.broadcast %cst_7 : f32 to vector<32x1xf32>
    %19 = arith.addf %15, %18 : vector<32x1xf32>
    %20 = math.rsqrt %19 : vector<32x1xf32>
    %21 = vector.broadcast %20 : vector<32x1xf32> to vector<32x32xf32>
    %22 = arith.mulf %17, %21 : vector<32x32xf32>
    %cst_8 = arith.constant 1.000000e+00 : f32
    %23 = vector.broadcast %cst_8 : f32 to vector<1x32xf32>
    %24 = arith.addf %4, %23 : vector<1x32xf32>
    %25 = vector.broadcast %24 : vector<1x32xf32> to vector<32x32xf32>
    %26 = arith.mulf %22, %25 : vector<32x32xf32>
    %c0_9 = arith.constant 0 : index
    %c0_10 = arith.constant 0 : index
    %27 = vector.load %arg7[%c0_9, %c0_10] : memref<32x96xf32, #tpu.memory_space<vmem>>, vector<32x96xf32>
    %28 = arith.truncf %26 : vector<32x32xf32> to vector<32x32xbf16>
    %c0_11 = arith.constant 0 : index
    %c0_12 = arith.constant 0 : index
    %29 = vector.load %arg5[%c0_11, %c0_12] : memref<32x96xbf16, #tpu.memory_space<vmem>>, vector<32x96xbf16>
    %cst_13 = arith.constant dense<0.000000e+00> : vector<32x96xf32>
    %30 = tpu.matmul %28, %29, %cst_13 {dimension_numbers = #tpu.dot_dimension_numbers<[1], [0], [0], [1], [0, 0, 1, 1], [], []>} : vector<32x32xbf16>, vector<32x96xbf16>, vector<32x96xf32> -> vector<32x96xf32>
    %31 = arith.addf %27, %30 : vector<32x96xf32>
    %c0_14 = arith.constant 0 : index
    %c0_15 = arith.constant 0 : index
    %32 = vector.load %arg7[%c0_14, %c0_15] : memref<32x96xf32, #tpu.memory_space<vmem>>, vector<32x96xf32>
    tpu.vector_store %arg7[%c0_14, %c0_15], %31 {strides = array<i32>} : memref<32x96xf32, #tpu.memory_space<vmem>>, vector<32x96xf32>,
    %c0_i32_16 = arith.constant 0 : i32
    %33 = arith.cmpi eq, %arg2, %c0_i32_16 : i32
    %34 = arith.extui %33 : i1 to i32
    %c0_i32_17 = arith.constant 0 : i32
    %35 = arith.cmpi ne, %34, %c0_i32_17 : i32
    scf.if %35 {
      %c0_18 = arith.constant 0 : index
      %c0_19 = arith.constant 0 : index
      %36 = vector.load %arg7[%c0_18, %c0_19] : memref<32x96xf32, #tpu.memory_space<vmem>>, vector<32x96xf32>
      %37 = arith.truncf %36 : vector<32x96xf32> to vector<32x96xbf16>
      %c0_20 = arith.constant 0 : index
      %c0_21 = arith.constant 0 : index
      %38 = vector.load %arg6[%c0_20, %c0_21] : memref<32x96xbf16, #tpu.memory_space<vmem>>, vector<32x96xbf16>
      tpu.vector_store %arg6[%c0_20, %c0_21], %37 {strides = array<i32>} : memref<32x96xbf16, #tpu.memory_space<vmem>>, vector<32x96xbf16>,
    } else {
    }
    return
  }
  func.func @transform_0(%arg0: i32, %arg1: i32, %arg2: i32) -> (i32, i32) {
    %c0_i32 = arith.constant 0 : i32
    return %arg0, %arg2 : i32, i32
  }
  func.func @transform_1(%arg0: i32, %arg1: i32, %arg2: i32) -> (i32, i32) {
    %c0_i32 = arith.constant 0 : i32
    %c0_i32_0 = arith.constant 0 : i32
    %c0_i32_1 = arith.constant 0 : i32
    return %c0_i32, %c0_i32_0 : i32, i32
  }
  func.func @transform_2(%arg0: i32, %arg1: i32, %arg2: i32) -> (i32, i32) {
    %c0_i32 = arith.constant 0 : i32
    return %arg2, %arg1 : i32, i32
  }
  func.func @transform_3(%arg0: i32, %arg1: i32, %arg2: i32) -> (i32, i32) {
    %c0_i32 = arith.constant 0 : i32
    return %arg0, %arg1 : i32, i32
  }
}

module attributes {stable_mosaic.version = 11 : i64} {
  func.func @_fused_linear_kernel(%arg0: i32, %arg1: i32, %arg2: i32, %arg3: memref<32x128xbf16, #tpu.memory_space<vmem>>, %arg4: memref<128x32xbf16, #tpu.memory_space<vmem>>, %arg5: memref<1x32xf32, #tpu.memory_space<vmem>>, %arg6: memref<32x32xf32, #tpu.memory_space<vmem>>, %arg7: memref<32x32xf32, #tpu.memory_space<vmem>>, %arg8: memref<32x32xf32, #tpu.memory_space<vmem>>) attributes {dimension_semantics = [#tpu.dimension_semantics<parallel>, #tpu.dimension_semantics<parallel>, #tpu.dimension_semantics<arbitrary>], iteration_bounds = array<i64: 1, 1, 1>, scalar_prefetch = 0 : i64, scratch_operands = 1 : i64, tpu.core_type = #tpu.core_type<tc>, window_params = [{transform_indices = @transform_0, window_bounds = array<i64: 32, 128>}, {transform_indices = @transform_1, window_bounds = array<i64: 128, 32>}, {transform_indices = @transform_2, window_bounds = array<i64: 1, 32>}, {transform_indices = @transform_3, window_bounds = array<i64: 32, 32>}, {transform_indices = @transform_4, window_bounds = array<i64: 32, 32>}]} {
    %c0_i32 = arith.constant 0 : i32
    %0 = arith.cmpi eq, %arg2, %c0_i32 : i32
    %1 = arith.extui %0 : i1 to i32
    %c0_i32_0 = arith.constant 0 : i32
    %2 = arith.cmpi ne, %1, %c0_i32_0 : i32
    scf.if %2 {
      %cst_10 = arith.constant 0.000000e+00 : f32
      %14 = vector.broadcast %cst_10 : f32 to vector<32x32xf32>
      %c0_11 = arith.constant 0 : index
      %c0_12 = arith.constant 0 : index
      %15 = vector.load %arg8[%c0_11, %c0_12] : memref<32x32xf32, #tpu.memory_space<vmem>>, vector<32x32xf32>
      tpu.vector_store %arg8[%c0_11, %c0_12], %14 {strides = array<i32>} : memref<32x32xf32, #tpu.memory_space<vmem>>, vector<32x32xf32>,
    } else {
    }
    %c0 = arith.constant 0 : index
    %c0_1 = arith.constant 0 : index
    %3 = vector.load %arg3[%c0, %c0_1] : memref<32x128xbf16, #tpu.memory_space<vmem>>, vector<32x128xbf16>
    %4 = arith.extf %3 : vector<32x128xbf16> to vector<32x128xf32>
    %c0_2 = arith.constant 0 : index
    %c0_3 = arith.constant 0 : index
    %5 = vector.load %arg8[%c0_2, %c0_3] : memref<32x32xf32, #tpu.memory_space<vmem>>, vector<32x32xf32>
    %6 = arith.truncf %4 : vector<32x128xf32> to vector<32x128xbf16>
    %c0_4 = arith.constant 0 : index
    %c0_5 = arith.constant 0 : index
    %7 = vector.load %arg4[%c0_4, %c0_5] : memref<128x32xbf16, #tpu.memory_space<vmem>>, vector<128x32xbf16>
    %cst = arith.constant dense<0.000000e+00> : vector<32x32xf32>
    %8 = tpu.matmul %6, %7, %cst {dimension_numbers = #tpu.dot_dimension_numbers<[1], [0], [0], [1], [0, 0, 1, 1], [], []>} : vector<32x128xbf16>, vector<128x32xbf16>, vector<32x32xf32> -> vector<32x32xf32>
    %9 = arith.addf %5, %8 : vector<32x32xf32>
    %c0_6 = arith.constant 0 : index
    %c0_7 = arith.constant 0 : index
    %10 = vector.load %arg8[%c0_6, %c0_7] : memref<32x32xf32, #tpu.memory_space<vmem>>, vector<32x32xf32>
    tpu.vector_store %arg8[%c0_6, %c0_7], %9 {strides = array<i32>} : memref<32x32xf32, #tpu.memory_space<vmem>>, vector<32x32xf32>,
    %c0_i32_8 = arith.constant 0 : i32
    %11 = arith.cmpi eq, %arg2, %c0_i32_8 : i32
    %12 = arith.extui %11 : i1 to i32
    %c0_i32_9 = arith.constant 0 : i32
    %13 = arith.cmpi ne, %12, %c0_i32_9 : i32
    scf.if %13 {
      %c0_10 = arith.constant 0 : index
      %c0_11 = arith.constant 0 : index
      %14 = vector.load %arg8[%c0_10, %c0_11] : memref<32x32xf32, #tpu.memory_space<vmem>>, vector<32x32xf32>
      %c0_12 = arith.constant 0 : index
      %c0_13 = arith.constant 0 : index
      %15 = vector.load %arg5[%c0_12, %c0_13] : memref<1x32xf32, #tpu.memory_space<vmem>>, vector<1x32xf32>
      %16 = vector.broadcast %15 : vector<1x32xf32> to vector<32x32xf32>
      %17 = arith.addf %14, %16 : vector<32x32xf32>
      %c0_14 = arith.constant 0 : index
      %c0_15 = arith.constant 0 : index
      %18 = vector.load %arg6[%c0_14, %c0_15] : memref<32x32xf32, #tpu.memory_space<vmem>>, vector<32x32xf32>
      %19 = arith.addf %17, %18 : vector<32x32xf32>
      %c0_16 = arith.constant 0 : index
      %c0_17 = arith.constant 0 : index
      %20 = vector.load %arg7[%c0_16, %c0_17] : memref<32x32xf32, #tpu.memory_space<vmem>>, vector<32x32xf32>
      tpu.vector_store %arg7[%c0_16, %c0_17], %19 {strides = array<i32>} : memref<32x32xf32, #tpu.memory_space<vmem>>, vector<32x32xf32>,
    } else {
    }
    return
  }
  func.func @transform_0(%arg0: i32, %arg1: i32, %arg2: i32) -> (i32, i32) {
    %c0_i32 = arith.constant 0 : i32
    return %arg0, %arg2 : i32, i32
  }
  func.func @transform_1(%arg0: i32, %arg1: i32, %arg2: i32) -> (i32, i32) {
    %c0_i32 = arith.constant 0 : i32
    return %arg2, %arg1 : i32, i32
  }
  func.func @transform_2(%arg0: i32, %arg1: i32, %arg2: i32) -> (i32, i32) {
    %c0_i32 = arith.constant 0 : i32
    %c0_i32_0 = arith.constant 0 : i32
    return %c0_i32, %arg1 : i32, i32
  }
  func.func @transform_3(%arg0: i32, %arg1: i32, %arg2: i32) -> (i32, i32) {
    %c0_i32 = arith.constant 0 : i32
    return %arg0, %arg1 : i32, i32
  }
  func.func @transform_4(%arg0: i32, %arg1: i32, %arg2: i32) -> (i32, i32) {
    %c0_i32 = arith.constant 0 : i32
    return %arg0, %arg1 : i32, i32
  }
}

module attributes {stable_mosaic.version = 11 : i64} {
  func.func @_attn_core_kernel(%arg0: i32, %arg1: memref<1x16x96xbf16, #tpu.memory_space<vmem>>, %arg2: memref<1x16x32xbf16, #tpu.memory_space<vmem>>) attributes {dimension_semantics = [#tpu.dimension_semantics<parallel>], iteration_bounds = array<i64: 2>, scalar_prefetch = 0 : i64, scratch_operands = 0 : i64, tpu.core_type = #tpu.core_type<tc>, window_params = [{transform_indices = @transform_0, window_bounds = array<i64: 1, 16, 96>}, {transform_indices = @transform_1, window_bounds = array<i64: 1, 16, 32>}]} {
    %c0 = arith.constant 0 : index
    %c0_0 = arith.constant 0 : index
    %c0_1 = arith.constant 0 : index
    %0 = vector.load %arg1[%c0, %c0_0, %c0_1] : memref<1x16x96xbf16, #tpu.memory_space<vmem>>, vector<1x16x96xbf16>
    %1 = vector.shape_cast %0 : vector<1x16x96xbf16> to vector<16x96xbf16>
    %2 = vector.extract_strided_slice %1 {offsets = [0, 0], sizes = [16, 16], strides = [1, 1]} : vector<16x96xbf16> to vector<16x16xbf16>
    %3 = vector.extract_strided_slice %1 {offsets = [0, 32], sizes = [16, 16], strides = [1, 1]} : vector<16x96xbf16> to vector<16x16xbf16>
    %4 = vector.extract_strided_slice %1 {offsets = [0, 64], sizes = [16, 16], strides = [1, 1]} : vector<16x96xbf16> to vector<16x16xbf16>
    %cst = arith.constant dense<0.000000e+00> : vector<16x16xf32>
    %5 = tpu.matmul %2, %3, %cst {dimension_numbers = #tpu.dot_dimension_numbers<[1], [1], [0], [0], [0, 0, 1, 0], [], []>} : vector<16x16xbf16>, vector<16x16xbf16>, vector<16x16xf32> -> vector<16x16xf32>
    %cst_2 = arith.constant dense<0xFF800000> : vector<16xf32>
    %6 = vector.multi_reduction <maximumf>, %5, %cst_2 [1] : vector<16x16xf32> to vector<16xf32>
    %7 = vector.shape_cast %6 : vector<16xf32> to vector<16x1xf32>
    %8 = vector.broadcast %7 : vector<16x1xf32> to vector<16x16xf32>
    %9 = arith.subf %5, %8 : vector<16x16xf32>
    %10 = math.exp %9 : vector<16x16xf32>
    %cst_3 = arith.constant dense<0.000000e+00> : vector<16xf32>
    %11 = vector.multi_reduction <add>, %10, %cst_3 [1] : vector<16x16xf32> to vector<16xf32>
    %12 = vector.shape_cast %11 : vector<16xf32> to vector<16x1xf32>
    %13 = tpu.reciprocal %12 {approx = true} : vector<16x1xf32> -> vector<16x1xf32>
    %14 = vector.broadcast %13 : vector<16x1xf32> to vector<16x16xf32>
    %15 = arith.mulf %10, %14 : vector<16x16xf32>
    %16 = arith.truncf %15 : vector<16x16xf32> to vector<16x16xbf16>
    %cst_4 = arith.constant dense<0.000000e+00> : vector<16x16xf32>
    %17 = tpu.matmul %16, %4, %cst_4 {dimension_numbers = #tpu.dot_dimension_numbers<[1], [0], [0], [1], [0, 0, 1, 1], [], []>} : vector<16x16xbf16>, vector<16x16xbf16>, vector<16x16xf32> -> vector<16x16xf32>
    %18 = arith.truncf %17 : vector<16x16xf32> to vector<16x16xbf16>
    %c0_5 = arith.constant 0 : index
    %c0_6 = arith.constant 0 : index
    %c0_7 = arith.constant 0 : index
    %19 = vector.load %arg2[%c0_5, %c0_6, %c0_7] : memref<1x16x32xbf16, #tpu.memory_space<vmem>>, vector<1x16x16xbf16>
    %20 = vector.shape_cast %19 : vector<1x16x16xbf16> to vector<16x16xbf16>
    %21 = vector.shape_cast %18 : vector<16x16xbf16> to vector<1x16x16xbf16>
    tpu.vector_store %arg2[%c0_5, %c0_6, %c0_7], %21 {strides = array<i32>} : memref<1x16x32xbf16, #tpu.memory_space<vmem>>, vector<1x16x16xbf16>,
    %22 = vector.extract_strided_slice %1 {offsets = [0, 16], sizes = [16, 16], strides = [1, 1]} : vector<16x96xbf16> to vector<16x16xbf16>
    %23 = vector.extract_strided_slice %1 {offsets = [0, 48], sizes = [16, 16], strides = [1, 1]} : vector<16x96xbf16> to vector<16x16xbf16>
    %24 = vector.extract_strided_slice %1 {offsets = [0, 80], sizes = [16, 16], strides = [1, 1]} : vector<16x96xbf16> to vector<16x16xbf16>
    %cst_8 = arith.constant dense<0.000000e+00> : vector<16x16xf32>
    %25 = tpu.matmul %22, %23, %cst_8 {dimension_numbers = #tpu.dot_dimension_numbers<[1], [1], [0], [0], [0, 0, 1, 0], [], []>} : vector<16x16xbf16>, vector<16x16xbf16>, vector<16x16xf32> -> vector<16x16xf32>
    %cst_9 = arith.constant dense<0xFF800000> : vector<16xf32>
    %26 = vector.multi_reduction <maximumf>, %25, %cst_9 [1] : vector<16x16xf32> to vector<16xf32>
    %27 = vector.shape_cast %26 : vector<16xf32> to vector<16x1xf32>
    %28 = vector.broadcast %27 : vector<16x1xf32> to vector<16x16xf32>
    %29 = arith.subf %25, %28 : vector<16x16xf32>
    %30 = math.exp %29 : vector<16x16xf32>
    %cst_10 = arith.constant dense<0.000000e+00> : vector<16xf32>
    %31 = vector.multi_reduction <add>, %30, %cst_10 [1] : vector<16x16xf32> to vector<16xf32>
    %32 = vector.shape_cast %31 : vector<16xf32> to vector<16x1xf32>
    %33 = tpu.reciprocal %32 {approx = true} : vector<16x1xf32> -> vector<16x1xf32>
    %34 = vector.broadcast %33 : vector<16x1xf32> to vector<16x16xf32>
    %35 = arith.mulf %30, %34 : vector<16x16xf32>
    %36 = arith.truncf %35 : vector<16x16xf32> to vector<16x16xbf16>
    %cst_11 = arith.constant dense<0.000000e+00> : vector<16x16xf32>
    %37 = tpu.matmul %36, %24, %cst_11 {dimension_numbers = #tpu.dot_dimension_numbers<[1], [0], [0], [1], [0, 0, 1, 1], [], []>} : vector<16x16xbf16>, vector<16x16xbf16>, vector<16x16xf32> -> vector<16x16xf32>
    %38 = arith.truncf %37 : vector<16x16xf32> to vector<16x16xbf16>
    %c0_12 = arith.constant 0 : index
    %c0_13 = arith.constant 0 : index
    %c16 = arith.constant 16 : index
    %39 = vector.load %arg2[%c0_12, %c0_13, %c16] : memref<1x16x32xbf16, #tpu.memory_space<vmem>>, vector<1x16x16xbf16>
    %40 = vector.shape_cast %39 : vector<1x16x16xbf16> to vector<16x16xbf16>
    %41 = vector.shape_cast %38 : vector<16x16xbf16> to vector<1x16x16xbf16>
    tpu.vector_store %arg2[%c0_12, %c0_13, %c16], %41 {strides = array<i32>} : memref<1x16x32xbf16, #tpu.memory_space<vmem>>, vector<1x16x16xbf16>,
    return
  }
  func.func @transform_0(%arg0: i32) -> (i32, i32, i32) {
    %c0_i32 = arith.constant 0 : i32
    %c0_i32_0 = arith.constant 0 : i32
    %c0_i32_1 = arith.constant 0 : i32
    return %arg0, %c0_i32, %c0_i32_0 : i32, i32, i32
  }
  func.func @transform_1(%arg0: i32) -> (i32, i32, i32) {
    %c0_i32 = arith.constant 0 : i32
    %c0_i32_0 = arith.constant 0 : i32
    %c0_i32_1 = arith.constant 0 : i32
    return %arg0, %c0_i32, %c0_i32_0 : i32, i32, i32
  }
}

module attributes {stable_mosaic.version = 11 : i64} {
  func.func @_fused_linear_kernel(%arg0: i32, %arg1: i32, %arg2: i32, %arg3: memref<32x32xf32, #tpu.memory_space<vmem>>, %arg4: memref<1x32xf32, #tpu.memory_space<vmem>>, %arg5: memref<32x128xbf16, #tpu.memory_space<vmem>>, %arg6: memref<1x128xf32, #tpu.memory_space<vmem>>, %arg7: memref<32x128xbf16, #tpu.memory_space<vmem>>, %arg8: memref<32x128xf32, #tpu.memory_space<vmem>>) attributes {dimension_semantics = [#tpu.dimension_semantics<parallel>, #tpu.dimension_semantics<parallel>, #tpu.dimension_semantics<arbitrary>], iteration_bounds = array<i64: 1, 1, 1>, scalar_prefetch = 0 : i64, scratch_operands = 1 : i64, tpu.core_type = #tpu.core_type<tc>, window_params = [{transform_indices = @transform_0, window_bounds = array<i64: 32, 32>}, {pipeline_mode = #tpu.pipeline_mode<synchronous>, transform_indices = @transform_1, window_bounds = array<i64: 1, 32>}, {transform_indices = @transform_2, window_bounds = array<i64: 32, 128>}, {transform_indices = @transform_3, window_bounds = array<i64: 1, 128>}, {transform_indices = @transform_4, window_bounds = array<i64: 32, 128>}]} {
    %c0_i32 = arith.constant 0 : i32
    %0 = arith.cmpi eq, %arg2, %c0_i32 : i32
    %1 = arith.extui %0 : i1 to i32
    %c0_i32_0 = arith.constant 0 : i32
    %2 = arith.cmpi ne, %1, %c0_i32_0 : i32
    scf.if %2 {
      %cst_18 = arith.constant 0.000000e+00 : f32
      %36 = vector.broadcast %cst_18 : f32 to vector<32x128xf32>
      %c0_19 = arith.constant 0 : index
      %c0_20 = arith.constant 0 : index
      %37 = vector.load %arg8[%c0_19, %c0_20] : memref<32x128xf32, #tpu.memory_space<vmem>>, vector<32x128xf32>
      tpu.vector_store %arg8[%c0_19, %c0_20], %36 {strides = array<i32>} : memref<32x128xf32, #tpu.memory_space<vmem>>, vector<32x128xf32>,
    } else {
    }
    %c0 = arith.constant 0 : index
    %c0_1 = arith.constant 0 : index
    %3 = vector.load %arg3[%c0, %c0_1] : memref<32x32xf32, #tpu.memory_space<vmem>>, vector<32x32xf32>
    %c0_2 = arith.constant 0 : index
    %c0_3 = arith.constant 0 : index
    %4 = vector.load %arg4[%c0_2, %c0_3] : memref<1x32xf32, #tpu.memory_space<vmem>>, vector<1x32xf32>
    %cst = arith.constant dense<0.000000e+00> : vector<32xf32>
    %5 = vector.multi_reduction <add>, %3, %cst [1] : vector<32x32xf32> to vector<32xf32>
    %6 = vector.shape_cast %5 : vector<32xf32> to vector<32x1xf32>
    %cst_4 = arith.constant 3.200000e+01 : f32
    %7 = vector.broadcast %cst_4 : f32 to vector<32x1xf32>
    %8 = arith.divf %6, %7 : vector<32x1xf32>
    %9 = vector.broadcast %8 : vector<32x1xf32> to vector<32x32xf32>
    %10 = arith.subf %3, %9 : vector<32x32xf32>
    %11 = arith.mulf %10, %10 : vector<32x32xf32>
    %cst_5 = arith.constant dense<0.000000e+00> : vector<32xf32>
    %12 = vector.multi_reduction <add>, %11, %cst_5 [1] : vector<32x32xf32> to vector<32xf32>
    %13 = vector.shape_cast %12 : vector<32xf32> to vector<32x1xf32>
    %cst_6 = arith.constant 3.200000e+01 : f32
    %14 = vector.broadcast %cst_6 : f32 to vector<32x1xf32>
    %15 = arith.divf %13, %14 : vector<32x1xf32>
    %16 = vector.broadcast %8 : vector<32x1xf32> to vector<32x32xf32>
    %17 = arith.subf %3, %16 : vector<32x32xf32>
    %cst_7 = arith.constant 9.99999974E-6 : f32
    %18 = vector.broadcast %cst_7 : f32 to vector<32x1xf32>
    %19 = arith.addf %15, %18 : vector<32x1xf32>
    %20 = math.rsqrt %19 : vector<32x1xf32>
    %21 = vector.broadcast %20 : vector<32x1xf32> to vector<32x32xf32>
    %22 = arith.mulf %17, %21 : vector<32x32xf32>
    %cst_8 = arith.constant 1.000000e+00 : f32
    %23 = vector.broadcast %cst_8 : f32 to vector<1x32xf32>
    %24 = arith.addf %4, %23 : vector<1x32xf32>
    %25 = vector.broadcast %24 : vector<1x32xf32> to vector<32x32xf32>
    %26 = arith.mulf %22, %25 : vector<32x32xf32>
    %c0_9 = arith.constant 0 : index
    %c0_10 = arith.constant 0 : index
    %27 = vector.load %arg8[%c0_9, %c0_10] : memref<32x128xf32, #tpu.memory_space<vmem>>, vector<32x128xf32>
    %28 = arith.truncf %26 : vector<32x32xf32> to vector<32x32xbf16>
    %c0_11 = arith.constant 0 : index
    %c0_12 = arith.constant 0 : index
    %29 = vector.load %arg5[%c0_11, %c0_12] : memref<32x128xbf16, #tpu.memory_space<vmem>>, vector<32x128xbf16>
    %cst_13 = arith.constant dense<0.000000e+00> : vector<32x128xf32>
    %30 = tpu.matmul %28, %29, %cst_13 {dimension_numbers = #tpu.dot_dimension_numbers<[1], [0], [0], [1], [0, 0, 1, 1], [], []>} : vector<32x32xbf16>, vector<32x128xbf16>, vector<32x128xf32> -> vector<32x128xf32>
    %31 = arith.addf %27, %30 : vector<32x128xf32>
    %c0_14 = arith.constant 0 : index
    %c0_15 = arith.constant 0 : index
    %32 = vector.load %arg8[%c0_14, %c0_15] : memref<32x128xf32, #tpu.memory_space<vmem>>, vector<32x128xf32>
    tpu.vector_store %arg8[%c0_14, %c0_15], %31 {strides = array<i32>} : memref<32x128xf32, #tpu.memory_space<vmem>>, vector<32x128xf32>,
    %c0_i32_16 = arith.constant 0 : i32
    %33 = arith.cmpi eq, %arg2, %c0_i32_16 : i32
    %34 = arith.extui %33 : i1 to i32
    %c0_i32_17 = arith.constant 0 : i32
    %35 = arith.cmpi ne, %34, %c0_i32_17 : i32
    scf.if %35 {
      %c0_18 = arith.constant 0 : index
      %c0_19 = arith.constant 0 : index
      %36 = vector.load %arg8[%c0_18, %c0_19] : memref<32x128xf32, #tpu.memory_space<vmem>>, vector<32x128xf32>
      %c0_20 = arith.constant 0 : index
      %c0_21 = arith.constant 0 : index
      %37 = vector.load %arg6[%c0_20, %c0_21] : memref<1x128xf32, #tpu.memory_space<vmem>>, vector<1x128xf32>
      %38 = vector.broadcast %37 : vector<1x128xf32> to vector<32x128xf32>
      %39 = arith.addf %36, %38 : vector<32x128xf32>
      %cst_22 = arith.constant 5.000000e-01 : f32
      %40 = vector.broadcast %cst_22 : f32 to vector<32x128xf32>
      %41 = arith.mulf %40, %39 : vector<32x128xf32>
      %cst_23 = arith.constant 0.707106769 : f32
      %42 = vector.broadcast %cst_23 : f32 to vector<32x128xf32>
      %43 = arith.mulf %39, %42 : vector<32x128xf32>
      %44 = math.erf %43 : vector<32x128xf32>
      %cst_24 = arith.constant 1.000000e+00 : f32
      %45 = vector.broadcast %cst_24 : f32 to vector<32x128xf32>
      %46 = arith.addf %45, %44 : vector<32x128xf32>
      %47 = arith.mulf %41, %46 : vector<32x128xf32>
      %48 = arith.truncf %47 : vector<32x128xf32> to vector<32x128xbf16>
      %c0_25 = arith.constant 0 : index
      %c0_26 = arith.constant 0 : index
      %49 = vector.load %arg7[%c0_25, %c0_26] : memref<32x128xbf16, #tpu.memory_space<vmem>>, vector<32x128xbf16>
      tpu.vector_store %arg7[%c0_25, %c0_26], %48 {strides = array<i32>} : memref<32x128xbf16, #tpu.memory_space<vmem>>, vector<32x128xbf16>,
    } else {
    }
    return
  }
  func.func @transform_0(%arg0: i32, %arg1: i32, %arg2: i32) -> (i32, i32) {
    %c0_i32 = arith.constant 0 : i32
    return %arg0, %arg2 : i32, i32
  }
  func.func @transform_1(%arg0: i32, %arg1: i32, %arg2: i32) -> (i32, i32) {
    %c0_i32 = arith.constant 0 : i32
    %c0_i32_0 = arith.constant 0 : i32
    %c0_i32_1 = arith.constant 0 : i32
    return %c0_i32, %c0_i32_0 : i32, i32
  }
  func.func @transform_2(%arg0: i32, %arg1: i32, %arg2: i32) -> (i32, i32) {
    %c0_i32 = arith.constant 0 : i32
    return %arg2, %arg1 : i32, i32
  }
  func.func @transform_3(%arg0: i32, %arg1: i32, %arg2: i32) -> (i32, i32) {
    %c0_i32 = arith.constant 0 : i32
    %c0_i32_0 = arith.constant 0 : i32
    return %c0_i32, %arg1 : i32, i32
  }
  func.func @transform_4(%arg0: i32, %arg1: i32, %arg2: i32) -> (i32, i32) {
    %c0_i32 = arith.constant 0 : i32
    return %arg0, %arg1 : i32, i32
  }
}

module attributes {stable_mosaic.version = 11 : i64} {
  func.func @_reuse_attn_kernel(%arg0: i32, %arg1: memref<1x2x16x16xbf16, #tpu.memory_space<vmem>>, %arg2: memref<1x16x32xbf16, #tpu.memory_space<vmem>>, %arg3: memref<1x16x32xbf16, #tpu.memory_space<vmem>>) attributes {dimension_semantics = [#tpu.dimension_semantics<parallel>], iteration_bounds = array<i64: 2>, scalar_prefetch = 0 : i64, scratch_operands = 0 : i64, tpu.core_type = #tpu.core_type<tc>, window_params = [{transform_indices = @transform_0, window_bounds = array<i64: 1, 2, 16, 16>}, {transform_indices = @transform_1, window_bounds = array<i64: 1, 16, 32>}, {transform_indices = @transform_2, window_bounds = array<i64: 1, 16, 32>}]} {
    %c0 = arith.constant 0 : index
    %c0_0 = arith.constant 0 : index
    %c0_1 = arith.constant 0 : index
    %0 = vector.load %arg2[%c0, %c0_0, %c0_1] : memref<1x16x32xbf16, #tpu.memory_space<vmem>>, vector<1x16x32xbf16>
    %1 = vector.shape_cast %0 : vector<1x16x32xbf16> to vector<16x32xbf16>
    %c0_2 = arith.constant 0 : index
    %c0_3 = arith.constant 0 : index
    %c0_4 = arith.constant 0 : index
    %c0_5 = arith.constant 0 : index
    %2 = vector.load %arg1[%c0_2, %c0_3, %c0_4, %c0_5] : memref<1x2x16x16xbf16, #tpu.memory_space<vmem>>, vector<1x1x16x16xbf16>
    %3 = vector.shape_cast %2 : vector<1x1x16x16xbf16> to vector<16x16xbf16>
    %4 = arith.extf %3 : vector<16x16xbf16> to vector<16x16xf32>
    %cst = arith.constant dense<0xFF800000> : vector<16xf32>
    %5 = vector.multi_reduction <maximumf>, %4, %cst [0] : vector<16x16xf32> to vector<16xf32>
    %6 = vector.shape_cast %5 : vector<16xf32> to vector<1x16xf32>
    %7 = vector.broadcast %6 : vector<1x16xf32> to vector<16x16xf32>
    %8 = arith.subf %4, %7 : vector<16x16xf32>
    %9 = math.exp %8 : vector<16x16xf32>
    %cst_6 = arith.constant dense<0.000000e+00> : vector<16xf32>
    %10 = vector.multi_reduction <add>, %9, %cst_6 [0] : vector<16x16xf32> to vector<16xf32>
    %11 = vector.shape_cast %10 : vector<16xf32> to vector<1x16xf32>
    %12 = tpu.reciprocal %11 {approx = true} : vector<1x16xf32> -> vector<1x16xf32>
    %13 = vector.broadcast %12 : vector<1x16xf32> to vector<16x16xf32>
    %14 = arith.mulf %9, %13 : vector<16x16xf32>
    %15 = vector.extract_strided_slice %1 {offsets = [0, 0], sizes = [16, 16], strides = [1, 1]} : vector<16x32xbf16> to vector<16x16xbf16>
    %16 = arith.truncf %14 : vector<16x16xf32> to vector<16x16xbf16>
    %cst_7 = arith.constant dense<0.000000e+00> : vector<16x16xf32>
    %17 = tpu.matmul %16, %15, %cst_7 {dimension_numbers = #tpu.dot_dimension_numbers<[0], [0], [1], [1], [0, 1, 1, 1], [], []>} : vector<16x16xbf16>, vector<16x16xbf16>, vector<16x16xf32> -> vector<16x16xf32>
    %18 = arith.truncf %17 : vector<16x16xf32> to vector<16x16xbf16>
    %c0_8 = arith.constant 0 : index
    %c0_9 = arith.constant 0 : index
    %c0_10 = arith.constant 0 : index
    %19 = vector.load %arg3[%c0_8, %c0_9, %c0_10] : memref<1x16x32xbf16, #tpu.memory_space<vmem>>, vector<1x16x16xbf16>
    %20 = vector.shape_cast %19 : vector<1x16x16xbf16> to vector<16x16xbf16>
    %21 = vector.shape_cast %18 : vector<16x16xbf16> to vector<1x16x16xbf16>
    tpu.vector_store %arg3[%c0_8, %c0_9, %c0_10], %21 {strides = array<i32>} : memref<1x16x32xbf16, #tpu.memory_space<vmem>>, vector<1x16x16xbf16>,
    %c0_11 = arith.constant 0 : index
    %c1 = arith.constant 1 : index
    %c0_12 = arith.constant 0 : index
    %c0_13 = arith.constant 0 : index
    %22 = vector.load %arg1[%c0_11, %c1, %c0_12, %c0_13] : memref<1x2x16x16xbf16, #tpu.memory_space<vmem>>, vector<1x1x16x16xbf16>
    %23 = vector.shape_cast %22 : vector<1x1x16x16xbf16> to vector<16x16xbf16>
    %24 = arith.extf %23 : vector<16x16xbf16> to vector<16x16xf32>
    %cst_14 = arith.constant dense<0xFF800000> : vector<16xf32>
    %25 = vector.multi_reduction <maximumf>, %24, %cst_14 [0] : vector<16x16xf32> to vector<16xf32>
    %26 = vector.shape_cast %25 : vector<16xf32> to vector<1x16xf32>
    %27 = vector.broadcast %26 : vector<1x16xf32> to vector<16x16xf32>
    %28 = arith.subf %24, %27 : vector<16x16xf32>
    %29 = math.exp %28 : vector<16x16xf32>
    %cst_15 = arith.constant dense<0.000000e+00> : vector<16xf32>
    %30 = vector.multi_reduction <add>, %29, %cst_15 [0] : vector<16x16xf32> to vector<16xf32>
    %31 = vector.shape_cast %30 : vector<16xf32> to vector<1x16xf32>
    %32 = tpu.reciprocal %31 {approx = true} : vector<1x16xf32> -> vector<1x16xf32>
    %33 = vector.broadcast %32 : vector<1x16xf32> to vector<16x16xf32>
    %34 = arith.mulf %29, %33 : vector<16x16xf32>
    %35 = vector.extract_strided_slice %1 {offsets = [0, 16], sizes = [16, 16], strides = [1, 1]} : vector<16x32xbf16> to vector<16x16xbf16>
    %36 = arith.truncf %34 : vector<16x16xf32> to vector<16x16xbf16>
    %cst_16 = arith.constant dense<0.000000e+00> : vector<16x16xf32>
    %37 = tpu.matmul %36, %35, %cst_16 {dimension_numbers = #tpu.dot_dimension_numbers<[0], [0], [1], [1], [0, 1, 1, 1], [], []>} : vector<16x16xbf16>, vector<16x16xbf16>, vector<16x16xf32> -> vector<16x16xf32>
    %38 = arith.truncf %37 : vector<16x16xf32> to vector<16x16xbf16>
    %c0_17 = arith.constant 0 : index
    %c0_18 = arith.constant 0 : index
    %c16 = arith.constant 16 : index
    %39 = vector.load %arg3[%c0_17, %c0_18, %c16] : memref<1x16x32xbf16, #tpu.memory_space<vmem>>, vector<1x16x16xbf16>
    %40 = vector.shape_cast %39 : vector<1x16x16xbf16> to vector<16x16xbf16>
    %41 = vector.shape_cast %38 : vector<16x16xbf16> to vector<1x16x16xbf16>
    tpu.vector_store %arg3[%c0_17, %c0_18, %c16], %41 {strides = array<i32>} : memref<1x16x32xbf16, #tpu.memory_space<vmem>>, vector<1x16x16xbf16>,
    return
  }
  func.func @transform_0(%arg0: i32) -> (i32, i32, i32, i32) {
    %c0_i32 = arith.constant 0 : i32
    %c0_i32_0 = arith.constant 0 : i32
    %c0_i32_1 = arith.constant 0 : i32
    %c0_i32_2 = arith.constant 0 : i32
    return %arg0, %c0_i32, %c0_i32_0, %c0_i32_1 : i32, i32, i32, i32
  }
  func.func @transform_1(%arg0: i32) -> (i32, i32, i32) {
    %c0_i32 = arith.constant 0 : i32
    %c0_i32_0 = arith.constant 0 : i32
    %c0_i32_1 = arith.constant 0 : i32
    return %arg0, %c0_i32, %c0_i32_0 : i32, i32, i32
  }
  func.func @transform_2(%arg0: i32) -> (i32, i32, i32) {
    %c0_i32 = arith.constant 0 : i32
    %c0_i32_0 = arith.constant 0 : i32
    %c0_i32_1 = arith.constant 0 : i32
    return %arg0, %c0_i32, %c0_i32_0 : i32, i32, i32
  }
}

module attributes {stable_mosaic.version = 11 : i64} {
  func.func @_fused_linear_kernel(%arg0: i32, %arg1: i32, %arg2: i32, %arg3: memref<32x32xbf16, #tpu.memory_space<vmem>>, %arg4: memref<32x32xbf16, #tpu.memory_space<vmem>>, %arg5: memref<32x32xf32, #tpu.memory_space<vmem>>, %arg6: memref<1x32xf32, #tpu.memory_space<vmem>>, %arg7: memref<32x32xf32, #tpu.memory_space<vmem>>, %arg8: memref<32x32xf32, #tpu.memory_space<vmem>>) attributes {dimension_semantics = [#tpu.dimension_semantics<parallel>, #tpu.dimension_semantics<parallel>, #tpu.dimension_semantics<arbitrary>], iteration_bounds = array<i64: 1, 1, 1>, scalar_prefetch = 0 : i64, scratch_operands = 1 : i64, tpu.core_type = #tpu.core_type<tc>, window_params = [{transform_indices = @transform_0, window_bounds = array<i64: 32, 32>}, {transform_indices = @transform_1, window_bounds = array<i64: 32, 32>}, {transform_indices = @transform_2, window_bounds = array<i64: 32, 32>}, {pipeline_mode = #tpu.pipeline_mode<synchronous>, transform_indices = @transform_3, window_bounds = array<i64: 1, 32>}, {transform_indices = @transform_4, window_bounds = array<i64: 32, 32>}]} {
    %c0_i32 = arith.constant 0 : i32
    %0 = arith.cmpi eq, %arg2, %c0_i32 : i32
    %1 = arith.extui %0 : i1 to i32
    %c0_i32_0 = arith.constant 0 : i32
    %2 = arith.cmpi ne, %1, %c0_i32_0 : i32
    scf.if %2 {
      %cst_10 = arith.constant 0.000000e+00 : f32
      %14 = vector.broadcast %cst_10 : f32 to vector<32x32xf32>
      %c0_11 = arith.constant 0 : index
      %c0_12 = arith.constant 0 : index
      %15 = vector.load %arg8[%c0_11, %c0_12] : memref<32x32xf32, #tpu.memory_space<vmem>>, vector<32x32xf32>
      tpu.vector_store %arg8[%c0_11, %c0_12], %14 {strides = array<i32>} : memref<32x32xf32, #tpu.memory_space<vmem>>, vector<32x32xf32>,
    } else {
    }
    %c0 = arith.constant 0 : index
    %c0_1 = arith.constant 0 : index
    %3 = vector.load %arg3[%c0, %c0_1] : memref<32x32xbf16, #tpu.memory_space<vmem>>, vector<32x32xbf16>
    %4 = arith.extf %3 : vector<32x32xbf16> to vector<32x32xf32>
    %c0_2 = arith.constant 0 : index
    %c0_3 = arith.constant 0 : index
    %5 = vector.load %arg8[%c0_2, %c0_3] : memref<32x32xf32, #tpu.memory_space<vmem>>, vector<32x32xf32>
    %6 = arith.truncf %4 : vector<32x32xf32> to vector<32x32xbf16>
    %c0_4 = arith.constant 0 : index
    %c0_5 = arith.constant 0 : index
    %7 = vector.load %arg4[%c0_4, %c0_5] : memref<32x32xbf16, #tpu.memory_space<vmem>>, vector<32x32xbf16>
    %cst = arith.constant dense<0.000000e+00> : vector<32x32xf32>
    %8 = tpu.matmul %6, %7, %cst {dimension_numbers = #tpu.dot_dimension_numbers<[1], [0], [0], [1], [0, 0, 1, 1], [], []>} : vector<32x32xbf16>, vector<32x32xbf16>, vector<32x32xf32> -> vector<32x32xf32>
    %9 = arith.addf %5, %8 : vector<32x32xf32>
    %c0_6 = arith.constant 0 : index
    %c0_7 = arith.constant 0 : index
    %10 = vector.load %arg8[%c0_6, %c0_7] : memref<32x32xf32, #tpu.memory_space<vmem>>, vector<32x32xf32>
    tpu.vector_store %arg8[%c0_6, %c0_7], %9 {strides = array<i32>} : memref<32x32xf32, #tpu.memory_space<vmem>>, vector<32x32xf32>,
    %c0_i32_8 = arith.constant 0 : i32
    %11 = arith.cmpi eq, %arg2, %c0_i32_8 : i32
    %12 = arith.extui %11 : i1 to i32
    %c0_i32_9 = arith.constant 0 : i32
    %13 = arith.cmpi ne, %12, %c0_i32_9 : i32
    scf.if %13 {
      %c0_10 = arith.constant 0 : index
      %c0_11 = arith.constant 0 : index
      %14 = vector.load %arg8[%c0_10, %c0_11] : memref<32x32xf32, #tpu.memory_space<vmem>>, vector<32x32xf32>
      %c0_12 = arith.constant 0 : index
      %c0_13 = arith.constant 0 : index
      %15 = vector.load %arg5[%c0_12, %c0_13] : memref<32x32xf32, #tpu.memory_space<vmem>>, vector<32x32xf32>
      %16 = arith.addf %14, %15 : vector<32x32xf32>
      %c0_14 = arith.constant 0 : index
      %c0_15 = arith.constant 0 : index
      %17 = vector.load %arg6[%c0_14, %c0_15] : memref<1x32xf32, #tpu.memory_space<vmem>>, vector<1x32xf32>
      %cst_16 = arith.constant dense<0.000000e+00> : vector<32xf32>
      %18 = vector.multi_reduction <add>, %16, %cst_16 [1] : vector<32x32xf32> to vector<32xf32>
      %19 = vector.shape_cast %18 : vector<32xf32> to vector<32x1xf32>
      %cst_17 = arith.constant 3.200000e+01 : f32
      %20 = vector.broadcast %cst_17 : f32 to vector<32x1xf32>
      %21 = arith.divf %19, %20 : vector<32x1xf32>
      %22 = vector.broadcast %21 : vector<32x1xf32> to vector<32x32xf32>
      %23 = arith.subf %16, %22 : vector<32x32xf32>
      %24 = arith.mulf %23, %23 : vector<32x32xf32>
      %cst_18 = arith.constant dense<0.000000e+00> : vector<32xf32>
      %25 = vector.multi_reduction <add>, %24, %cst_18 [1] : vector<32x32xf32> to vector<32xf32>
      %26 = vector.shape_cast %25 : vector<32xf32> to vector<32x1xf32>
      %cst_19 = arith.constant 3.200000e+01 : f32
      %27 = vector.broadcast %cst_19 : f32 to vector<32x1xf32>
      %28 = arith.divf %26, %27 : vector<32x1xf32>
      %29 = vector.broadcast %21 : vector<32x1xf32> to vector<32x32xf32>
      %30 = arith.subf %16, %29 : vector<32x32xf32>
      %cst_20 = arith.constant 9.99999974E-6 : f32
      %31 = vector.broadcast %cst_20 : f32 to vector<32x1xf32>
      %32 = arith.addf %28, %31 : vector<32x1xf32>
      %33 = math.rsqrt %32 : vector<32x1xf32>
      %34 = vector.broadcast %33 : vector<32x1xf32> to vector<32x32xf32>
      %35 = arith.mulf %30, %34 : vector<32x32xf32>
      %cst_21 = arith.constant 1.000000e+00 : f32
      %36 = vector.broadcast %cst_21 : f32 to vector<1x32xf32>
      %37 = arith.addf %17, %36 : vector<1x32xf32>
      %38 = vector.broadcast %37 : vector<1x32xf32> to vector<32x32xf32>
      %39 = arith.mulf %35, %38 : vector<32x32xf32>
      %c0_22 = arith.constant 0 : index
      %c0_23 = arith.constant 0 : index
      %40 = vector.load %arg7[%c0_22, %c0_23] : memref<32x32xf32, #tpu.memory_space<vmem>>, vector<32x32xf32>
      tpu.vector_store %arg7[%c0_22, %c0_23], %39 {strides = array<i32>} : memref<32x32xf32, #tpu.memory_space<vmem>>, vector<32x32xf32>,
    } else {
    }
    return
  }
  func.func @transform_0(%arg0: i32, %arg1: i32, %arg2: i32) -> (i32, i32) {
    %c0_i32 = arith.constant 0 : i32
    return %arg0, %arg2 : i32, i32
  }
  func.func @transform_1(%arg0: i32, %arg1: i32, %arg2: i32) -> (i32, i32) {
    %c0_i32 = arith.constant 0 : i32
    return %arg2, %arg1 : i32, i32
  }
  func.func @transform_2(%arg0: i32, %arg1: i32, %arg2: i32) -> (i32, i32) {
    %c0_i32 = arith.constant 0 : i32
    return %arg0, %arg1 : i32, i32
  }
  func.func @transform_3(%arg0: i32, %arg1: i32, %arg2: i32) -> (i32, i32) {
    %c0_i32 = arith.constant 0 : i32
    %c0_i32_0 = arith.constant 0 : i32
    %c0_i32_1 = arith.constant 0 : i32
    return %c0_i32, %c0_i32_0 : i32, i32
  }
  func.func @transform_4(%arg0: i32, %arg1: i32, %arg2: i32) -> (i32, i32) {
    %c0_i32 = arith.constant 0 : i32
    return %arg0, %arg1 : i32, i32
  }
}

module attributes {stable_mosaic.version = 11 : i64} {
  func.func @_fused_linear_kernel(%arg0: i32, %arg1: i32, %arg2: i32, %arg3: memref<2x32xf32, #tpu.memory_space<vmem>>, %arg4: memref<32x10xbf16, #tpu.memory_space<vmem>>, %arg5: memref<2x10xf32, #tpu.memory_space<vmem>>, %arg6: memref<2x10xf32, #tpu.memory_space<vmem>>) attributes {dimension_semantics = [#tpu.dimension_semantics<parallel>, #tpu.dimension_semantics<parallel>, #tpu.dimension_semantics<arbitrary>], iteration_bounds = array<i64: 1, 1, 1>, scalar_prefetch = 0 : i64, scratch_operands = 1 : i64, tpu.core_type = #tpu.core_type<tc>, window_params = [{transform_indices = @transform_0, window_bounds = array<i64: 2, 32>}, {transform_indices = @transform_1, window_bounds = array<i64: 32, 10>}, {transform_indices = @transform_2, window_bounds = array<i64: 2, 10>}]} {
    %c0_i32 = arith.constant 0 : i32
    %0 = arith.cmpi eq, %arg2, %c0_i32 : i32
    %1 = arith.extui %0 : i1 to i32
    %c0_i32_0 = arith.constant 0 : i32
    %2 = arith.cmpi ne, %1, %c0_i32_0 : i32
    scf.if %2 {
      %cst_10 = arith.constant 0.000000e+00 : f32
      %13 = vector.broadcast %cst_10 : f32 to vector<2x10xf32>
      %c0_11 = arith.constant 0 : index
      %c0_12 = arith.constant 0 : index
      %14 = vector.load %arg6[%c0_11, %c0_12] : memref<2x10xf32, #tpu.memory_space<vmem>>, vector<2x10xf32>
      tpu.vector_store %arg6[%c0_11, %c0_12], %13 {strides = array<i32>} : memref<2x10xf32, #tpu.memory_space<vmem>>, vector<2x10xf32>,
    } else {
    }
    %c0 = arith.constant 0 : index
    %c0_1 = arith.constant 0 : index
    %3 = vector.load %arg3[%c0, %c0_1] : memref<2x32xf32, #tpu.memory_space<vmem>>, vector<2x32xf32>
    %c0_2 = arith.constant 0 : index
    %c0_3 = arith.constant 0 : index
    %4 = vector.load %arg6[%c0_2, %c0_3] : memref<2x10xf32, #tpu.memory_space<vmem>>, vector<2x10xf32>
    %5 = arith.truncf %3 : vector<2x32xf32> to vector<2x32xbf16>
    %c0_4 = arith.constant 0 : index
    %c0_5 = arith.constant 0 : index
    %6 = vector.load %arg4[%c0_4, %c0_5] : memref<32x10xbf16, #tpu.memory_space<vmem>>, vector<32x10xbf16>
    %cst = arith.constant dense<0.000000e+00> : vector<2x10xf32>
    %7 = tpu.matmul %5, %6, %cst {dimension_numbers = #tpu.dot_dimension_numbers<[1], [0], [0], [1], [0, 0, 1, 1], [], []>} : vector<2x32xbf16>, vector<32x10xbf16>, vector<2x10xf32> -> vector<2x10xf32>
    %8 = arith.addf %4, %7 : vector<2x10xf32>
    %c0_6 = arith.constant 0 : index
    %c0_7 = arith.constant 0 : index
    %9 = vector.load %arg6[%c0_6, %c0_7] : memref<2x10xf32, #tpu.memory_space<vmem>>, vector<2x10xf32>
    tpu.vector_store %arg6[%c0_6, %c0_7], %8 {strides = array<i32>} : memref<2x10xf32, #tpu.memory_space<vmem>>, vector<2x10xf32>,
    %c0_i32_8 = arith.constant 0 : i32
    %10 = arith.cmpi eq, %arg2, %c0_i32_8 : i32
    %11 = arith.extui %10 : i1 to i32
    %c0_i32_9 = arith.constant 0 : i32
    %12 = arith.cmpi ne, %11, %c0_i32_9 : i32
    scf.if %12 {
      %c0_10 = arith.constant 0 : index
      %c0_11 = arith.constant 0 : index
      %13 = vector.load %arg6[%c0_10, %c0_11] : memref<2x10xf32, #tpu.memory_space<vmem>>, vector<2x10xf32>
      %c0_12 = arith.constant 0 : index
      %c0_13 = arith.constant 0 : index
      %14 = vector.load %arg5[%c0_12, %c0_13] : memref<2x10xf32, #tpu.memory_space<vmem>>, vector<2x10xf32>
      tpu.vector_store %arg5[%c0_12, %c0_13], %13 {strides = array<i32>} : memref<2x10xf32, #tpu.memory_space<vmem>>, vector<2x10xf32>,
    } else {
    }
    return
  }
  func.func @transform_0(%arg0: i32, %arg1: i32, %arg2: i32) -> (i32, i32) {
    %c0_i32 = arith.constant 0 : i32
    return %arg0, %arg2 : i32, i32
  }
  func.func @transform_1(%arg0: i32, %arg1: i32, %arg2: i32) -> (i32, i32) {
    %c0_i32 = arith.constant 0 : i32
    return %arg2, %arg1 : i32, i32
  }
  func.func @transform_2(%arg0: i32, %arg1: i32, %arg2: i32) -> (i32, i32) {
    %c0_i32 = arith.constant 0 : i32
    return %arg0, %arg1 : i32, i32
  }
}

</mosaic_0001>

<bundles_post_ra>
// kernel: reverse
= control target key start
LH: loop header
LB: loop body
LE: loop exit
PB: predicated region body
PF: predicated region fallthrough
CT: control target
= control target key end

     0   :  { %s5663_s0 = inlined_call_operand.vmem [shape: f32[32,192,7,7], index: 0, kind: input, shape index: {}]   ;;  %s5664_s1 = inlined_call_operand.vmem [shape: bf16[32,192,7,7], index: 1, kind: output, shape index: {}]  }
   0x1   :  { %v2548_v0 = vld [vmem:[%s5663_s0 + $0xc00] sm:$0xff]  ;;  %v2743_v14 = vld [vmem:[%s5663_s0 + $0xc08] sm:$0xff] }
   0x2   :  { %v2549_v1 = vld [vmem:[%s5663_s0 + $0xa40] sm:$0xff]  ;;  %v2746_v15 = vld [vmem:[%s5663_s0 + $0xa48] sm:$0xff]  ;;  %v594_v19 = vpack.c.bf16 %v2743_v14, %v2548_v0 }
   0x3   :  { %v2550_v2 = vld [vmem:[%s5663_s0 + $0x880] sm:$0xff]  ;;  %v602_v20 = vpack.c.bf16 %v2746_v15, %v2549_v1  ;;  %v2749_v21 = vld [vmem:[%s5663_s0 + $0x888] sm:$0xff] }
   0x4   :  { %v2551_v3 = vld [vmem:[%s5663_s0 + $0x6c0] sm:$0xff]  ;;  %v2752_v22 = vld [vmem:[%s5663_s0 + $0x6c8] sm:$0xff]  ;;  %v610_v27 = vpack.c.bf16 %v2749_v21, %v2550_v2  ;;  %2745 = vst [vmem:[%s5664_s1] sm:$0xff] %v594_v19 }
   0x5   :  { %v2552_v4 = vld [vmem:[%s5663_s0 + $0x500] sm:$0xff]  ;;  %v2755_v23 = vld [vmem:[%s5663_s0 + $0x508] sm:$0xff]  ;;  %v618_v28 = vpack.c.bf16 %v2752_v22, %v2551_v3  ;;  %2748 = vst [vmem:[%s5664_s1 + $0xe0] sm:$0xff] %v602_v20 }
   0x6   :  { %v2553_v5 = vld [vmem:[%s5663_s0 + $0x340] sm:$0xff]  ;;  %v626_v29 = vpack.c.bf16 %v2755_v23, %v2552_v4  ;;  %v2758_v30 = vld [vmem:[%s5663_s0 + $0x348] sm:$0xff]  ;;  %2751 = vst [vmem:[%s5664_s1 + $0x1c0] sm:$0xff] %v610_v27 }
   0x7   :  { %v2554_v6 = vld [vmem:[%s5663_s0 + $0x180] sm:$0xff]  ;;  %v2761_v31 = vld [vmem:[%s5663_s0 + $0x188] sm:$0xff]  ;;  %v634_v36 = vpack.c.bf16 %v2758_v30, %v2553_v5  ;;  %2754 = vst [vmem:[%s5664_s1 + $0x2a0] sm:$0xff] %v618_v28 }
   0x8   :  { %v2555_v7 = vld [vmem:[%s5663_s0 + $0xbc0] sm:$0xff]  ;;  %v2764_v32 = vld [vmem:[%s5663_s0 + $0xbc8] sm:$0xff]  ;;  %v642_v37 = vpack.c.bf16 %v2761_v31, %v2554_v6  ;;  %2757 = vst [vmem:[%s5664_s1 + $0x380] sm:$0xff] %v626_v29 }
   0x9   :  { %v3368_v8 = vld [vmem:[%s5663_s0 + $0xa00] sm:$0xff]  ;;  %v650_v38 = vpack.c.bf16 %v2764_v32, %v2555_v7  ;;  %v2767_v39 = vld [vmem:[%s5663_s0 + $0xa08] sm:$0xff]  ;;  %2760 = vst [vmem:[%s5664_s1 + $0x460] sm:$0xff] %v634_v36 }
   0xa   :  { %v3373_v9 = vld [vmem:[%s5663_s0 + $0x840] sm:$0xff]  ;;  %v2770_v40 = vld [vmem:[%s5663_s0 + $0x848] sm:$0xff]  ;;  %v658_v45 = vpack.c.bf16 %v2767_v39, %v3368_v8  ;;  %2763 = vst [vmem:[%s5664_s1 + $0x540] sm:$0xff] %v642_v37 }
   0xb   :  { %v3378_v10 = vld [vmem:[%s5663_s0 + $0x680] sm:$0xff]  ;;  %v2773_v41 = vld [vmem:[%s5663_s0 + $0x688] sm:$0xff]  ;;  %v666_v46 = vpack.c.bf16 %v2770_v40, %v3373_v9  ;;  %2766 = vst [vmem:[%s5664_s1 + $0x20] sm:$0xff] %v650_v38 }
   0xc   :  { %v3383_v11 = vld [vmem:[%s5663_s0 + $0x4c0] sm:$0xff]  ;;  %v674_v47 = vpack.c.bf16 %v2773_v41, %v3378_v10  ;;  %v2776_v48 = vld [vmem:[%s5663_s0 + $0x4c8] sm:$0xff]  ;;  %2769 = vst [vmem:[%s5664_s1 + $0x100] sm:$0xff] %v658_v45 }
   0xd   :  { %v3388_v12 = vld [vmem:[%s5663_s0 + $0x300] sm:$0xff]  ;;  %v2779_v49 = vld [vmem:[%s5663_s0 + $0x308] sm:$0xff]  ;;  %v682_v54 = vpack.c.bf16 %v2776_v48, %v3383_v11  ;;  %2772 = vst [vmem:[%s5664_s1 + $0x1e0] sm:$0xff] %v666_v46 }
   0xe   :  { %v3393_v13 = vld [vmem:[%s5663_s0 + $0x140] sm:$0xff]  ;;  %v2782_v50 = vld [vmem:[%s5663_s0 + $0x148] sm:$0xff]  ;;  %v690_v55 = vpack.c.bf16 %v2779_v49, %v3388_v12  ;;  %2775 = vst [vmem:[%s5664_s1 + $0x2c0] sm:$0xff] %v674_v47 }
   0xf   :  { %v3404_v16 = vld [vmem:[%s5663_s0 + $0xb80] sm:$0xff]  ;;  %v698_v56 = vpack.c.bf16 %v2782_v50, %v3393_v13  ;;  %v2785_v57 = vld [vmem:[%s5663_s0 + $0xb88] sm:$0xff]  ;;  %2778 = vst [vmem:[%s5664_s1 + $0x3a0] sm:$0xff] %v682_v54 }
  0x10   :  { %v3409_v17 = vld [vmem:[%s5663_s0 + $0x9c0] sm:$0xff]  ;;  %v2788_v58 = vld [vmem:[%s5663_s0 + $0x9c8] sm:$0xff]  ;;  %v706_v63 = vpack.c.bf16 %v2785_v57, %v3404_v16  ;;  %2781 = vst [vmem:[%s5664_s1 + $0x480] sm:$0xff] %v690_v55 }
  0x11   :  { %v3414_v18 = vld [vmem:[%s5663_s0 + $0x800] sm:$0xff]  ;;  %v2791_v59 = vld [vmem:[%s5663_s0 + $0x808] sm:$0xff]  ;;  %v714_v0 = vpack.c.bf16 %v2788_v58, %v3409_v17  ;;  %2784 = vst [vmem:[%s5664_s1 + $0x560] sm:$0xff] %v698_v56 }
  0x12   :  { %v3428_v24 = vld [vmem:[%s5663_s0 + $0x640] sm:$0xff]  ;;  %v722_v1 = vpack.c.bf16 %v2791_v59, %v3414_v18  ;;  %v2794_v2 = vld [vmem:[%s5663_s0 + $0x648] sm:$0xff]  ;;  %2787 = vst [vmem:[%s5664_s1 + $0x40] sm:$0xff] %v706_v63  ;;  %v3806_v59 = vld [vmem:[%s5663_s0 + $0xa50] sm:$0xff] }
  0x13   :  { %v3433_v25 = vld [vmem:[%s5663_s0 + $0x480] sm:$0xff]  ;;  %v2797_v3 = vld [vmem:[%s5663_s0 + $0x488] sm:$0xff]  ;;  %v730_v8 = vpack.c.bf16 %v2794_v2, %v3428_v24  ;;  %2790 = vst [vmem:[%s5664_s1 + $0x120] sm:$0xff] %v714_v0 }
  0x14   :  { %v3438_v26 = vld [vmem:[%s5663_s0 + $0x2c0] sm:$0xff]  ;;  %v2800_v4 = vld [vmem:[%s5663_s0 + $0x2c8] sm:$0xff]  ;;  %v738_v9 = vpack.c.bf16 %v2797_v3, %v3433_v25  ;;  %2793 = vst [vmem:[%s5664_s1 + $0x200] sm:$0xff] %v722_v1 }
  0x15   :  { %v3452_v33 = vld [vmem:[%s5663_s0 + $0x100] sm:$0xff]  ;;  %v746_v10 = vpack.c.bf16 %v2800_v4, %v3438_v26  ;;  %v2803_v11 = vld [vmem:[%s5663_s0 + $0x108] sm:$0xff]  ;;  %2796 = vst [vmem:[%s5664_s1 + $0x2e0] sm:$0xff] %v730_v8  ;;  %v3842_v4 = vld [vmem:[%s5663_s0 + $0x510] sm:$0xff] }
  0x16   :  { %v3457_v34 = vld [vmem:[%s5663_s0 + $0xb40] sm:$0xff]  ;;  %v2806_v12 = vld [vmem:[%s5663_s0 + $0xb48] sm:$0xff]  ;;  %v754_v17 = vpack.c.bf16 %v2803_v11, %v3452_v33  ;;  %2799 = vst [vmem:[%s5664_s1 + $0x3c0] sm:$0xff] %v738_v9 }
  0x17   :  { %v3462_v35 = vld [vmem:[%s5663_s0 + $0x980] sm:$0xff]  ;;  %v2809_v13 = vld [vmem:[%s5663_s0 + $0x988] sm:$0xff]  ;;  %v762_v18 = vpack.c.bf16 %v2806_v12, %v3457_v34  ;;  %2802 = vst [vmem:[%s5664_s1 + $0x4a0] sm:$0xff] %v746_v10 }
  0x18   :  { %v3482_v42 = vld [vmem:[%s5663_s0 + $0x7c0] sm:$0xff]  ;;  %v770_v19 = vpack.c.bf16 %v2809_v13, %v3462_v35  ;;  %v2812_v20 = vld [vmem:[%s5663_s0 + $0x7c8] sm:$0xff]  ;;  %2805 = vst [vmem:[%s5664_s1 + $0x580] sm:$0xff] %v754_v17  ;;  %v3878_v13 = vld [vmem:[%s5663_s0 + $0xbd0] sm:$0xff] }
  0x19   :  { %v3487_v43 = vld [vmem:[%s5663_s0 + $0x600] sm:$0xff]  ;;  %v2815_v21 = vld [vmem:[%s5663_s0 + $0x608] sm:$0xff]  ;;  %v778_v26 = vpack.c.bf16 %v2812_v20, %v3482_v42  ;;  %2808 = vst [vmem:[%s5664_s1 + $0x60] sm:$0xff] %v762_v18 }
  0x1a   :  { %v3492_v44 = vld [vmem:[%s5663_s0 + $0x440] sm:$0xff]  ;;  %v2818_v22 = vld [vmem:[%s5663_s0 + $0x448] sm:$0xff]  ;;  %v786_v27 = vpack.c.bf16 %v2815_v21, %v3487_v43  ;;  %2811 = vst [vmem:[%s5664_s1 + $0x140] sm:$0xff] %v770_v19 }
  0x1b   :  { %v3518_v51 = vld [vmem:[%s5663_s0 + $0x280] sm:$0xff]  ;;  %v794_v28 = vpack.c.bf16 %v2818_v22, %v3492_v44  ;;  %v2821_v29 = vld [vmem:[%s5663_s0 + $0x288] sm:$0xff]  ;;  %2814 = vst [vmem:[%s5664_s1 + $0x220] sm:$0xff] %v778_v26  ;;  %v3914_v22 = vld [vmem:[%s5663_s0 + $0x690] sm:$0xff] }
  0x1c   :  { %v3523_v52 = vld [vmem:[%s5663_s0 + $0xc0] sm:$0xff]  ;;  %v2824_v30 = vld [vmem:[%s5663_s0 + $0xc8] sm:$0xff]  ;;  %v802_v35 = vpack.c.bf16 %v2821_v29, %v3518_v51  ;;  %2817 = vst [vmem:[%s5664_s1 + $0x300] sm:$0xff] %v786_v27 }
  0x1d   :  { %v3528_v53 = vld [vmem:[%s5663_s0 + $0xb00] sm:$0xff]  ;;  %v2827_v31 = vld [vmem:[%s5663_s0 + $0xb08] sm:$0xff]  ;;  %v810_v36 = vpack.c.bf16 %v2824_v30, %v3523_v52  ;;  %2820 = vst [vmem:[%s5664_s1 + $0x3e0] sm:$0xff] %v794_v28  ;;  %v3780_v52 = vld [vmem:[%s5663_s0 + $0xc10] sm:$0xff] }
  0x1e   :  { %v3554_v60 = vld [vmem:[%s5663_s0 + $0x940] sm:$0xff]  ;;  %v818_v37 = vpack.c.bf16 %v2827_v31, %v3528_v53  ;;  %v2830_v38 = vld [vmem:[%s5663_s0 + $0x948] sm:$0xff]  ;;  %2823 = vst [vmem:[%s5664_s1 + $0x4c0] sm:$0xff] %v802_v35  ;;  %v2890_v30 = vld [vmem:[%s5663_s0 + $0xc18] sm:$0xff] }
  0x1f   :  { %v3559_v61 = vld [vmem:[%s5663_s0 + $0x780] sm:$0xff]  ;;  %v2833_v39 = vld [vmem:[%s5663_s0 + $0x788] sm:$0xff]  ;;  %v826_v44 = vpack.c.bf16 %v2830_v38, %v3554_v60  ;;  %2826 = vst [vmem:[%s5664_s1 + $0x5a0] sm:$0xff] %v810_v36  ;;  %v3811_v60 = vld [vmem:[%s5663_s0 + $0x890] sm:$0xff]  ;;  %v986_v36 = vpack.c.bf16 %v2890_v30, %v3780_v52 }
  0x20   :  { %v3564_v62 = vld [vmem:[%s5663_s0 + $0x5c0] sm:$0xff]  ;;  %v2836_v40 = vld [vmem:[%s5663_s0 + $0x5c8] sm:$0xff]  ;;  %v834_v45 = vpack.c.bf16 %v2833_v39, %v3559_v61  ;;  %2829 = vst [vmem:[%s5664_s1 + $0x80] sm:$0xff] %v818_v37  ;;  %v3816_v61 = vld [vmem:[%s5663_s0 + $0x6d0] sm:$0xff] }
  0x21   :  { %v3590_v5 = vld [vmem:[%s5663_s0 + $0x400] sm:$0xff]  ;;  %v842_v46 = vpack.c.bf16 %v2836_v40, %v3564_v62  ;;  %v2839_v47 = vld [vmem:[%s5663_s0 + $0x408] sm:$0xff]  ;;  %2832 = vst [vmem:[%s5664_s1 + $0x160] sm:$0xff] %v826_v44  ;;  %v3950_v31 = vld [vmem:[%s5663_s0 + $0x150] sm:$0xff] }
  0x22   :  { %v3595_v6 = vld [vmem:[%s5663_s0 + $0x240] sm:$0xff]  ;;  %v2842_v48 = vld [vmem:[%s5663_s0 + $0x248] sm:$0xff]  ;;  %v850_v53 = vpack.c.bf16 %v2839_v47, %v3590_v5  ;;  %2835 = vst [vmem:[%s5664_s1 + $0x240] sm:$0xff] %v834_v45  ;;  %v3847_v5 = vld [vmem:[%s5663_s0 + $0x350] sm:$0xff] }
  0x23   :  { %v3600_v7 = vld [vmem:[%s5663_s0 + $0x80] sm:$0xff]  ;;  %v2845_v49 = vld [vmem:[%s5663_s0 + $0x88] sm:$0xff]  ;;  %v858_v54 = vpack.c.bf16 %v2842_v48, %v3595_v6  ;;  %2838 = vst [vmem:[%s5664_s1 + $0x320] sm:$0xff] %v842_v46  ;;  %v3852_v6 = vld [vmem:[%s5663_s0 + $0x190] sm:$0xff] }
  0x24   :  { %v3626_v14 = vld [vmem:[%s5663_s0 + $0xac0] sm:$0xff]  ;;  %v866_v55 = vpack.c.bf16 %v2845_v49, %v3600_v7  ;;  %v2848_v56 = vld [vmem:[%s5663_s0 + $0xac8] sm:$0xff]  ;;  %2841 = vst [vmem:[%s5664_s1 + $0x400] sm:$0xff] %v850_v53  ;;  %v2893_v37 = vld [vmem:[%s5663_s0 + $0xa58] sm:$0xff] }
  0x25   :  { %v3631_v15 = vld [vmem:[%s5663_s0 + $0x900] sm:$0xff]  ;;  %v2851_v57 = vld [vmem:[%s5663_s0 + $0x908] sm:$0xff]  ;;  %v874_v62 = vpack.c.bf16 %v2848_v56, %v3626_v14  ;;  %2844 = vst [vmem:[%s5664_s1 + $0x4e0] sm:$0xff] %v858_v54  ;;  %v3883_v14 = vld [vmem:[%s5663_s0 + $0xa10] sm:$0xff] }
  0x26   :  { %v3636_v16 = vld [vmem:[%s5663_s0 + $0x740] sm:$0xff]  ;;  %v2854_v58 = vld [vmem:[%s5663_s0 + $0x748] sm:$0xff]  ;;  %v882_v63 = vpack.c.bf16 %v2851_v57, %v3631_v15  ;;  %2847 = vst [vmem:[%s5664_s1 + $0x5c0] sm:$0xff] %v866_v55  ;;  %v3888_v15 = vld [vmem:[%s5663_s0 + $0x850] sm:$0xff] }
  0x27   :  { %v3662_v23 = vld [vmem:[%s5663_s0 + $0x580] sm:$0xff]  ;;  %v890_v0 = vpack.c.bf16 %v2854_v58, %v3636_v16  ;;  %v2857_v1 = vld [vmem:[%s5663_s0 + $0x588] sm:$0xff]  ;;  %2850 = vst [vmem:[%s5664_s1 + $0xa0] sm:$0xff] %v874_v62  ;;  %v2896_v38 = vld [vmem:[%s5663_s0 + $0x898] sm:$0xff] }
  0x28   :  { %v3667_v24 = vld [vmem:[%s5663_s0 + $0x3c0] sm:$0xff]  ;;  %v2860_v2 = vld [vmem:[%s5663_s0 + $0x3c8] sm:$0xff]  ;;  %v898_v7 = vpack.c.bf16 %v2857_v1, %v3662_v23  ;;  %2853 = vst [vmem:[%s5664_s1 + $0x180] sm:$0xff] %v882_v63  ;;  %v3919_v23 = vld [vmem:[%s5663_s0 + $0x4d0] sm:$0xff]  ;;  %v1002_v44 = vpack.c.bf16 %v2896_v38, %v3811_v60 }
  0x29   :  { %v3672_v25 = vld [vmem:[%s5663_s0 + $0x200] sm:$0xff]  ;;  %v2863_v3 = vld [vmem:[%s5663_s0 + $0x208] sm:$0xff]  ;;  %v906_v8 = vpack.c.bf16 %v2860_v2, %v3667_v24  ;;  %2856 = vst [vmem:[%s5664_s1 + $0x260] sm:$0xff] %v890_v0  ;;  %v3924_v24 = vld [vmem:[%s5663_s0 + $0x310] sm:$0xff] }
  0x2a   :  { %v3698_v32 = vld [vmem:[%s5663_s0 + $0x40] sm:$0xff]  ;;  %v914_v9 = vpack.c.bf16 %v2863_v3, %v3672_v25  ;;  %v2866_v10 = vld [vmem:[%s5663_s0 + $0x48] sm:$0xff]  ;;  %2859 = vst [vmem:[%s5664_s1 + $0x340] sm:$0xff] %v898_v7  ;;  %v2899_v39 = vld [vmem:[%s5663_s0 + $0x6d8] sm:$0xff] }
  0x2b   :  { %v3703_v33 = vld [vmem:[%s5663_s0 + $0xa80] sm:$0xff]  ;;  %v2869_v11 = vld [vmem:[%s5663_s0 + $0xa88] sm:$0xff]  ;;  %v922_v16 = vpack.c.bf16 %v2866_v10, %v3698_v32  ;;  %2862 = vst [vmem:[%s5664_s1 + $0x420] sm:$0xff] %v906_v8  ;;  %v3955_v32 = vld [vmem:[%s5663_s0 + $0xb90] sm:$0xff]  ;;  %v1010_v45 = vpack.c.bf16 %v2899_v39, %v3816_v61 }
  0x2c   :  { %v3708_v34 = vld [vmem:[%s5663_s0 + $0x8c0] sm:$0xff]  ;;  %v2872_v12 = vld [vmem:[%s5663_s0 + $0x8c8] sm:$0xff]  ;;  %v930_v17 = vpack.c.bf16 %v2869_v11, %v3703_v33  ;;  %2865 = vst [vmem:[%s5664_s1 + $0x500] sm:$0xff] %v914_v9  ;;  %v3960_v33 = vld [vmem:[%s5663_s0 + $0x9d0] sm:$0xff] }
  0x2d   :  { %v3734_v41 = vld [vmem:[%s5663_s0 + $0x700] sm:$0xff]  ;;  %v938_v18 = vpack.c.bf16 %v2872_v12, %v3708_v34  ;;  %v2875_v19 = vld [vmem:[%s5663_s0 + $0x708] sm:$0xff]  ;;  %2868 = vst [vmem:[%s5664_s1 + $0x5e0] sm:$0xff] %v922_v16  ;;  %v3986_v40 = vld [vmem:[%s5663_s0 + $0x810] sm:$0xff] }
  0x2e   :  { %v3739_v42 = vld [vmem:[%s5663_s0 + $0x540] sm:$0xff]  ;;  %v2878_v20 = vld [vmem:[%s5663_s0 + $0x548] sm:$0xff]  ;;  %v946_v25 = vpack.c.bf16 %v2875_v19, %v3734_v41  ;;  %2871 = vst [vmem:[%s5664_s1 + $0xc0] sm:$0xff] %v930_v17  ;;  %v3991_v41 = vld [vmem:[%s5663_s0 + $0x650] sm:$0xff] }
  0x2f   :  { %v3744_v43 = vld [vmem:[%s5663_s0 + $0x380] sm:$0xff]  ;;  %v2881_v21 = vld [vmem:[%s5663_s0 + $0x388] sm:$0xff]  ;;  %v954_v26 = vpack.c.bf16 %v2878_v20, %v3739_v42  ;;  %2874 = vst [vmem:[%s5664_s1 + $0x1a0] sm:$0xff] %v938_v18  ;;  %v3996_v42 = vld [vmem:[%s5663_s0 + $0x490] sm:$0xff] }
  0x30   :  { %v3770_v50 = vld [vmem:[%s5663_s0 + $0x1c0] sm:$0xff]  ;;  %v962_v27 = vpack.c.bf16 %v2881_v21, %v3744_v43  ;;  %v2884_v28 = vld [vmem:[%s5663_s0 + $0x1c8] sm:$0xff]  ;;  %2877 = vst [vmem:[%s5664_s1 + $0x280] sm:$0xff] %v946_v25  ;;  %v994_v43 = vpack.c.bf16 %v2893_v37, %v3806_v59  ;;  %v2902_v46 = vld [vmem:[%s5663_s0 + $0x518] sm:$0xff] }
  0x31   :  { %v3775_v51 = vld [vmem:[%s5663_s0] sm:$0xff]  ;;  %v2887_v29 = vld [vmem:[%s5663_s0 + $0x8] sm:$0xff]  ;;  %v970_v34 = vpack.c.bf16 %v2884_v28, %v3770_v50  ;;  %2880 = vst [vmem:[%s5664_s1 + $0x360] sm:$0xff] %v954_v26  ;;  %v2905_v47 = vld [vmem:[%s5663_s0 + $0x358] sm:$0xff]  ;;  %v1018_v52 = vpack.c.bf16 %v2902_v46, %v3842_v4 }
  0x32   :  { %v978_v35 = vpack.c.bf16 %v2887_v29, %v3775_v51  ;;  %2883 = vst [vmem:[%s5664_s1 + $0x440] sm:$0xff] %v962_v27  ;;  %v2908_v48 = vld [vmem:[%s5663_s0 + $0x198] sm:$0xff]  ;;  %v4022_v49 = vld [vmem:[%s5663_s0 + $0x2d0] sm:$0xff]  ;;  %2892 = vst [vmem:[%s5664_s1 + $0x8] sm:$0xff] %v986_v36  ;;  %v1026_v53 = vpack.c.bf16 %v2905_v47, %v3847_v5 }
  0x33   :  { %v4027_v50 = vld [vmem:[%s5663_s0 + $0x110] sm:$0xff]  ;;  %2886 = vst [vmem:[%s5664_s1 + $0x520] sm:$0xff] %v970_v34  ;;  %v1034_v54 = vpack.c.bf16 %v2908_v48, %v3852_v6  ;;  %v2911_v55 = vld [vmem:[%s5663_s0 + $0xbd8] sm:$0xff]  ;;  %2895 = vst [vmem:[%s5664_s1 + $0xe8] sm:$0xff] %v994_v43 }
  0x34   :  { %v4032_v51 = vld [vmem:[%s5663_s0 + $0xb50] sm:$0xff]  ;;  %2889 = vst [vmem:[%s5664_s1 + $0x600] sm:$0xff] %v978_v35  ;;  %v2914_v56 = vld [vmem:[%s5663_s0 + $0xa18] sm:$0xff]  ;;  %2898 = vst [vmem:[%s5664_s1 + $0x1c8] sm:$0xff] %v1002_v44  ;;  %v1042_v61 = vpack.c.bf16 %v2911_v55, %v3878_v13 }
  0x35   :  { %v2917_v57 = vld [vmem:[%s5663_s0 + $0x858] sm:$0xff]  ;;  %v4058_v58 = vld [vmem:[%s5663_s0 + $0x990] sm:$0xff]  ;;  %2901 = vst [vmem:[%s5664_s1 + $0x2a8] sm:$0xff] %v1010_v45  ;;  %v1050_v62 = vpack.c.bf16 %v2914_v56, %v3883_v14  ;;  %2904 = vst [vmem:[%s5664_s1 + $0x388] sm:$0xff] %v1018_v52 }
  0x36   :  { %v4063_v59 = vld [vmem:[%s5663_s0 + $0x7d0] sm:$0xff]  ;;  %v1058_v63 = vpack.c.bf16 %v2917_v57, %v3888_v15  ;;  %v2920_v0 = vld [vmem:[%s5663_s0 + $0x698] sm:$0xff]  ;;  %2907 = vst [vmem:[%s5664_s1 + $0x468] sm:$0xff] %v1026_v53  ;;  %2910 = vst [vmem:[%s5664_s1 + $0x548] sm:$0xff] %v1034_v54 }
  0x37   :  { %v4068_v60 = vld [vmem:[%s5663_s0 + $0x610] sm:$0xff]  ;;  %v2923_v1 = vld [vmem:[%s5663_s0 + $0x4d8] sm:$0xff]  ;;  %v1066_v6 = vpack.c.bf16 %v2920_v0, %v3914_v22  ;;  %2913 = vst [vmem:[%s5664_s1 + $0x28] sm:$0xff] %v1042_v61  ;;  %2916 = vst [vmem:[%s5664_s1 + $0x108] sm:$0xff] %v1050_v62 }
  0x38   :  { %v2926_v2 = vld [vmem:[%s5663_s0 + $0x318] sm:$0xff]  ;;  %v4094_v3 = vld [vmem:[%s5663_s0 + $0x450] sm:$0xff]  ;;  %v1074_v7 = vpack.c.bf16 %v2923_v1, %v3919_v23  ;;  %2919 = vst [vmem:[%s5664_s1 + $0x1e8] sm:$0xff] %v1058_v63 }
  0x39   :  { %v4099_v4 = vld [vmem:[%s5663_s0 + $0x290] sm:$0xff]  ;;  %v1082_v8 = vpack.c.bf16 %v2926_v2, %v3924_v24  ;;  %v2929_v9 = vld [vmem:[%s5663_s0 + $0x158] sm:$0xff]  ;;  %2922 = vst [vmem:[%s5664_s1 + $0x2c8] sm:$0xff] %v1066_v6 }
  0x3a   :  { %v4104_v5 = vld [vmem:[%s5663_s0 + $0xd0] sm:$0xff]  ;;  %v2932_v10 = vld [vmem:[%s5663_s0 + $0xb98] sm:$0xff]  ;;  %v1090_v15 = vpack.c.bf16 %v2929_v9, %v3950_v31  ;;  %2925 = vst [vmem:[%s5664_s1 + $0x3a8] sm:$0xff] %v1074_v7 }
  0x3b   :  { %v2935_v11 = vld [vmem:[%s5663_s0 + $0x9d8] sm:$0xff]  ;;  %v4130_v12 = vld [vmem:[%s5663_s0 + $0xb10] sm:$0xff]  ;;  %v1098_v16 = vpack.c.bf16 %v2932_v10, %v3955_v32  ;;  %2928 = vst [vmem:[%s5664_s1 + $0x488] sm:$0xff] %v1082_v8 }
  0x3c   :  { %v4135_v13 = vld [vmem:[%s5663_s0 + $0x950] sm:$0xff]  ;;  %v1106_v17 = vpack.c.bf16 %v2935_v11, %v3960_v33  ;;  %v2938_v18 = vld [vmem:[%s5663_s0 + $0x818] sm:$0xff]  ;;  %2931 = vst [vmem:[%s5664_s1 + $0x568] sm:$0xff] %v1090_v15  ;;  %v4382_v11 = vld [vmem:[%s5663_s0 + $0xc20] sm:$0xff] }
  0x3d   :  { %v4140_v14 = vld [vmem:[%s5663_s0 + $0x790] sm:$0xff]  ;;  %v2941_v19 = vld [vmem:[%s5663_s0 + $0x658] sm:$0xff]  ;;  %v1114_v24 = vpack.c.bf16 %v2938_v18, %v3986_v40  ;;  %2934 = vst [vmem:[%s5664_s1 + $0x48] sm:$0xff] %v1098_v16 }
  0x3e   :  { %v2944_v20 = vld [vmem:[%s5663_s0 + $0x498] sm:$0xff]  ;;  %v4166_v21 = vld [vmem:[%s5663_s0 + $0x5d0] sm:$0xff]  ;;  %v1122_v25 = vpack.c.bf16 %v2941_v19, %v3991_v41  ;;  %2937 = vst [vmem:[%s5664_s1 + $0x128] sm:$0xff] %v1106_v17 }
  0x3f   :  { %v4171_v22 = vld [vmem:[%s5663_s0 + $0x410] sm:$0xff]  ;;  %v1130_v26 = vpack.c.bf16 %v2944_v20, %v3996_v42  ;;  %v2947_v27 = vld [vmem:[%s5663_s0 + $0x2d8] sm:$0xff]  ;;  %2940 = vst [vmem:[%s5664_s1 + $0x208] sm:$0xff] %v1114_v24  ;;  %v4418_v20 = vld [vmem:[%s5663_s0 + $0x6e0] sm:$0xff] }
  0x40   :  { %v4176_v23 = vld [vmem:[%s5663_s0 + $0x250] sm:$0xff]  ;;  %v2950_v28 = vld [vmem:[%s5663_s0 + $0x118] sm:$0xff]  ;;  %v1138_v33 = vpack.c.bf16 %v2947_v27, %v4022_v49  ;;  %2943 = vst [vmem:[%s5664_s1 + $0x2e8] sm:$0xff] %v1122_v25 }
  0x41   :  { %v2953_v29 = vld [vmem:[%s5663_s0 + $0xb58] sm:$0xff]  ;;  %v4202_v30 = vld [vmem:[%s5663_s0 + $0x90] sm:$0xff]  ;;  %v1146_v34 = vpack.c.bf16 %v2950_v28, %v4027_v50  ;;  %2946 = vst [vmem:[%s5664_s1 + $0x3c8] sm:$0xff] %v1130_v26 }
  0x42   :  { %v4207_v31 = vld [vmem:[%s5663_s0 + $0xad0] sm:$0xff]  ;;  %v1154_v35 = vpack.c.bf16 %v2953_v29, %v4032_v51  ;;  %v2956_v36 = vld [vmem:[%s5663_s0 + $0x998] sm:$0xff]  ;;  %2949 = vst [vmem:[%s5664_s1 + $0x4a8] sm:$0xff] %v1138_v33  ;;  %v4454_v29 = vld [vmem:[%s5663_s0 + $0x1a0] sm:$0xff] }
  0x43   :  { %v4212_v32 = vld [vmem:[%s5663_s0 + $0x910] sm:$0xff]  ;;  %v2959_v37 = vld [vmem:[%s5663_s0 + $0x7d8] sm:$0xff]  ;;  %v1162_v42 = vpack.c.bf16 %v2956_v36, %v4058_v58  ;;  %2952 = vst [vmem:[%s5664_s1 + $0x588] sm:$0xff] %v1146_v34 }
  0x44   :  { %v2962_v38 = vld [vmem:[%s5663_s0 + $0x618] sm:$0xff]  ;;  %v4238_v39 = vld [vmem:[%s5663_s0 + $0x750] sm:$0xff]  ;;  %v1170_v43 = vpack.c.bf16 %v2959_v37, %v4063_v59  ;;  %2955 = vst [vmem:[%s5664_s1 + $0x68] sm:$0xff] %v1154_v35 }
  0x45   :  { %v4243_v40 = vld [vmem:[%s5663_s0 + $0x590] sm:$0xff]  ;;  %v1178_v44 = vpack.c.bf16 %v2962_v38, %v4068_v60  ;;  %v2965_v45 = vld [vmem:[%s5663_s0 + $0x458] sm:$0xff]  ;;  %2958 = vst [vmem:[%s5664_s1 + $0x148] sm:$0xff] %v1162_v42  ;;  %v4490_v38 = vld [vmem:[%s5663_s0 + $0x860] sm:$0xff] }
  0x46   :  { %v4248_v41 = vld [vmem:[%s5663_s0 + $0x3d0] sm:$0xff]  ;;  %v2968_v46 = vld [vmem:[%s5663_s0 + $0x298] sm:$0xff]  ;;  %v1186_v51 = vpack.c.bf16 %v2965_v45, %v4094_v3  ;;  %2961 = vst [vmem:[%s5664_s1 + $0x228] sm:$0xff] %v1170_v43 }
  0x47   :  { %v2971_v47 = vld [vmem:[%s5663_s0 + $0xd8] sm:$0xff]  ;;  %v4274_v48 = vld [vmem:[%s5663_s0 + $0x210] sm:$0xff]  ;;  %v1194_v52 = vpack.c.bf16 %v2968_v46, %v4099_v4  ;;  %2964 = vst [vmem:[%s5664_s1 + $0x308] sm:$0xff] %v1178_v44 }
  0x48   :  { %v4279_v49 = vld [vmem:[%s5663_s0 + $0x50] sm:$0xff]  ;;  %v1202_v53 = vpack.c.bf16 %v2971_v47, %v4104_v5  ;;  %v2974_v54 = vld [vmem:[%s5663_s0 + $0xb18] sm:$0xff]  ;;  %2967 = vst [vmem:[%s5664_s1 + $0x3e8] sm:$0xff] %v1186_v51  ;;  %v4526_v47 = vld [vmem:[%s5663_s0 + $0x320] sm:$0xff] }
  0x49   :  { %v4284_v50 = vld [vmem:[%s5663_s0 + $0xa90] sm:$0xff]  ;;  %v2977_v55 = vld [vmem:[%s5663_s0 + $0x958] sm:$0xff]  ;;  %v1210_v60 = vpack.c.bf16 %v2974_v54, %v4130_v12  ;;  %2970 = vst [vmem:[%s5664_s1 + $0x4c8] sm:$0xff] %v1194_v52  ;;  %v4387_v12 = vld [vmem:[%s5663_s0 + $0xa60] sm:$0xff] }
  0x4a   :  { %v2980_v56 = vld [vmem:[%s5663_s0 + $0x798] sm:$0xff]  ;;  %v4310_v57 = vld [vmem:[%s5663_s0 + $0x8d0] sm:$0xff]  ;;  %v1218_v61 = vpack.c.bf16 %v2977_v55, %v4135_v13  ;;  %2973 = vst [vmem:[%s5664_s1 + $0x5a8] sm:$0xff] %v1202_v53  ;;  %v4392_v13 = vld [vmem:[%s5663_s0 + $0x8a0] sm:$0xff] }
  0x4b   :  { %v4315_v58 = vld [vmem:[%s5663_s0 + $0x710] sm:$0xff]  ;;  %v1226_v62 = vpack.c.bf16 %v2980_v56, %v4140_v14  ;;  %v2983_v63 = vld [vmem:[%s5663_s0 + $0x5d8] sm:$0xff]  ;;  %2976 = vst [vmem:[%s5664_s1 + $0x88] sm:$0xff] %v1210_v60  ;;  %v3037_v53 = vld [vmem:[%s5663_s0 + $0xc28] sm:$0xff] }
  0x4c   :  { %v4320_v59 = vld [vmem:[%s5663_s0 + $0x550] sm:$0xff]  ;;  %v2986_v0 = vld [vmem:[%s5663_s0 + $0x418] sm:$0xff]  ;;  %v1234_v5 = vpack.c.bf16 %v2983_v63, %v4166_v21  ;;  %2979 = vst [vmem:[%s5664_s1 + $0x168] sm:$0xff] %v1218_v61  ;;  %v4423_v21 = vld [vmem:[%s5663_s0 + $0x520] sm:$0xff] }
  0x4d   :  { %v2989_v1 = vld [vmem:[%s5663_s0 + $0x258] sm:$0xff]  ;;  %v4346_v2 = vld [vmem:[%s5663_s0 + $0x390] sm:$0xff]  ;;  %v1242_v6 = vpack.c.bf16 %v2986_v0, %v4171_v22  ;;  %2982 = vst [vmem:[%s5664_s1 + $0x248] sm:$0xff] %v1226_v62  ;;  %v4428_v22 = vld [vmem:[%s5663_s0 + $0x360] sm:$0xff] }
  0x4e   :  { %v4351_v3 = vld [vmem:[%s5663_s0 + $0x1d0] sm:$0xff]  ;;  %v1250_v7 = vpack.c.bf16 %v2989_v1, %v4176_v23  ;;  %v2992_v8 = vld [vmem:[%s5663_s0 + $0x98] sm:$0xff]  ;;  %2985 = vst [vmem:[%s5664_s1 + $0x328] sm:$0xff] %v1234_v5  ;;  %v3040_v54 = vld [vmem:[%s5663_s0 + $0xa68] sm:$0xff] }
  0x4f   :  { %v4356_v4 = vld [vmem:[%s5663_s0 + $0x10] sm:$0xff]  ;;  %v2995_v9 = vld [vmem:[%s5663_s0 + $0xad8] sm:$0xff]  ;;  %v1258_v14 = vpack.c.bf16 %v2992_v8, %v4202_v30  ;;  %2988 = vst [vmem:[%s5664_s1 + $0x408] sm:$0xff] %v1242_v6  ;;  %v4459_v30 = vld [vmem:[%s5663_s0 + $0xbe0] sm:$0xff]  ;;  %v1386_v60 = vpack.c.bf16 %v3040_v54, %v4387_v12 }
  0x50   :  { %v2998_v10 = vld [vmem:[%s5663_s0 + $0x918] sm:$0xff]  ;;  %v1266_v15 = vpack.c.bf16 %v2995_v9, %v4207_v31  ;;  %2991 = vst [vmem:[%s5664_s1 + $0x4e8] sm:$0xff] %v1250_v7  ;;  %v4464_v31 = vld [vmem:[%s5663_s0 + $0xa20] sm:$0xff]  ;;  %v3043_v55 = vld [vmem:[%s5663_s0 + $0x8a8] sm:$0xff] }
  0x51   :  { %v1274_v16 = vpack.c.bf16 %v2998_v10, %v4212_v32  ;;  %v3001_v17 = vld [vmem:[%s5663_s0 + $0x758] sm:$0xff]  ;;  %2994 = vst [vmem:[%s5664_s1 + $0x5c8] sm:$0xff] %v1258_v14  ;;  %v4562_v56 = vld [vmem:[%s5663_s0 + $0x9e0] sm:$0xff]  ;;  %v1394_v61 = vpack.c.bf16 %v3043_v55, %v4392_v13  ;;  %v3046_v62 = vld [vmem:[%s5663_s0 + $0x6e8] sm:$0xff] }
  0x52   :  { %v3004_v18 = vld [vmem:[%s5663_s0 + $0x598] sm:$0xff]  ;;  %v1282_v23 = vpack.c.bf16 %v3001_v17, %v4238_v39  ;;  %2997 = vst [vmem:[%s5664_s1 + $0xa8] sm:$0xff] %v1266_v15  ;;  %v4495_v39 = vld [vmem:[%s5663_s0 + $0x6a0] sm:$0xff]  ;;  %v3049_v63 = vld [vmem:[%s5663_s0 + $0x528] sm:$0xff] }
  0x53   :  { %v3007_v19 = vld [vmem:[%s5663_s0 + $0x3d8] sm:$0xff]  ;;  %v1290_v24 = vpack.c.bf16 %v3004_v18, %v4243_v40  ;;  %3000 = vst [vmem:[%s5664_s1 + $0x188] sm:$0xff] %v1274_v16  ;;  %v4500_v40 = vld [vmem:[%s5663_s0 + $0x4e0] sm:$0xff]  ;;  %v3052_v0 = vld [vmem:[%s5663_s0 + $0x368] sm:$0xff]  ;;  %v1410_v5 = vpack.c.bf16 %v3049_v63, %v4423_v21 }
  0x54   :  { %v1298_v25 = vpack.c.bf16 %v3007_v19, %v4248_v41  ;;  %v3010_v26 = vld [vmem:[%s5663_s0 + $0x218] sm:$0xff]  ;;  %3003 = vst [vmem:[%s5664_s1 + $0x268] sm:$0xff] %v1282_v23  ;;  %v4598_v1 = vld [vmem:[%s5663_s0 + $0x4a0] sm:$0xff]  ;;  %v1418_v6 = vpack.c.bf16 %v3052_v0, %v4428_v22  ;;  %v3055_v7 = vld [vmem:[%s5663_s0 + $0x1a8] sm:$0xff] }
  0x55   :  { %v3013_v27 = vld [vmem:[%s5663_s0 + $0x58] sm:$0xff]  ;;  %v1306_v32 = vpack.c.bf16 %v3010_v26, %v4274_v48  ;;  %3006 = vst [vmem:[%s5664_s1 + $0x348] sm:$0xff] %v1290_v24  ;;  %v4531_v48 = vld [vmem:[%s5663_s0 + $0x160] sm:$0xff]  ;;  %v3058_v8 = vld [vmem:[%s5663_s0 + $0xbe8] sm:$0xff]  ;;  %v1426_v13 = vpack.c.bf16 %v3055_v7, %v4454_v29 }
  0x56   :  { %v3016_v28 = vld [vmem:[%s5663_s0 + $0xa98] sm:$0xff]  ;;  %v1314_v33 = vpack.c.bf16 %v3013_v27, %v4279_v49  ;;  %3009 = vst [vmem:[%s5664_s1 + $0x428] sm:$0xff] %v1298_v25  ;;  %v4536_v49 = vld [vmem:[%s5663_s0 + $0xba0] sm:$0xff]  ;;  %v3061_v9 = vld [vmem:[%s5663_s0 + $0xa28] sm:$0xff]  ;;  %v1434_v14 = vpack.c.bf16 %v3058_v8, %v4459_v30 }
  0x57   :  { %v1322_v34 = vpack.c.bf16 %v3016_v28, %v4284_v50  ;;  %v3019_v35 = vld [vmem:[%s5663_s0 + $0x8d8] sm:$0xff]  ;;  %3012 = vst [vmem:[%s5664_s1 + $0x508] sm:$0xff] %v1306_v32  ;;  %v4634_v10 = vld [vmem:[%s5663_s0 + $0xb60] sm:$0xff]  ;;  %3042 = vst [vmem:[%s5664_s1 + $0xf0] sm:$0xff] %v1386_v60  ;;  %v1442_v15 = vpack.c.bf16 %v3061_v9, %v4464_v31 }
  0x58   :  { %v3022_v36 = vld [vmem:[%s5663_s0 + $0x718] sm:$0xff]  ;;  %v1330_v41 = vpack.c.bf16 %v3019_v35, %v4310_v57  ;;  %3015 = vst [vmem:[%s5664_s1 + $0x5e8] sm:$0xff] %v1314_v33  ;;  %v4567_v57 = vld [vmem:[%s5663_s0 + $0x820] sm:$0xff]  ;;  %3045 = vst [vmem:[%s5664_s1 + $0x1d0] sm:$0xff] %v1394_v61 }
  0x59   :  { %v3025_v37 = vld [vmem:[%s5663_s0 + $0x558] sm:$0xff]  ;;  %v1338_v42 = vpack.c.bf16 %v3022_v36, %v4315_v58  ;;  %3018 = vst [vmem:[%s5664_s1 + $0xc8] sm:$0xff] %v1322_v34  ;;  %v4572_v58 = vld [vmem:[%s5663_s0 + $0x660] sm:$0xff]  ;;  %v3064_v16 = vld [vmem:[%s5663_s0 + $0x868] sm:$0xff] }
  0x5a   :  { %v1346_v43 = vpack.c.bf16 %v3025_v37, %v4320_v59  ;;  %v3028_v44 = vld [vmem:[%s5663_s0 + $0x398] sm:$0xff]  ;;  %3021 = vst [vmem:[%s5664_s1 + $0x1a8] sm:$0xff] %v1330_v41  ;;  %v1378_v59 = vpack.c.bf16 %v3037_v53, %v4382_v11  ;;  %v4639_v11 = vld [vmem:[%s5663_s0 + $0x9a0] sm:$0xff]  ;;  %v3067_v17 = vld [vmem:[%s5663_s0 + $0x6a8] sm:$0xff]  ;;  %v1450_v22 = vpack.c.bf16 %v3064_v16, %v4490_v38 }
  0x5b   :  { %v3031_v45 = vld [vmem:[%s5663_s0 + $0x1d8] sm:$0xff]  ;;  %v1354_v50 = vpack.c.bf16 %v3028_v44, %v4346_v2  ;;  %3024 = vst [vmem:[%s5664_s1 + $0x288] sm:$0xff] %v1338_v42  ;;  %v4603_v2 = vld [vmem:[%s5663_s0 + $0x2e0] sm:$0xff]  ;;  %v3070_v18 = vld [vmem:[%s5663_s0 + $0x4e8] sm:$0xff]  ;;  %v1458_v23 = vpack.c.bf16 %v3067_v17, %v4495_v39 }
  0x5c   :  { %v3034_v46 = vld [vmem:[%s5663_s0 + $0x18] sm:$0xff]  ;;  %v1362_v51 = vpack.c.bf16 %v3031_v45, %v4351_v3  ;;  %3027 = vst [vmem:[%s5664_s1 + $0x368] sm:$0xff] %v1346_v43  ;;  %v4608_v3 = vld [vmem:[%s5663_s0 + $0x120] sm:$0xff]  ;;  %3039 = vst [vmem:[%s5664_s1 + $0x10] sm:$0xff] %v1378_v59  ;;  %v1466_v24 = vpack.c.bf16 %v3070_v18, %v4500_v40 }
  0x5d   :  { %v1370_v52 = vpack.c.bf16 %v3034_v46, %v4356_v4  ;;  %3030 = vst [vmem:[%s5664_s1 + $0x448] sm:$0xff] %v1354_v50  ;;  %v1402_v4 = vpack.c.bf16 %v3046_v62, %v4418_v20  ;;  %v4644_v12 = vld [vmem:[%s5663_s0 + $0x7e0] sm:$0xff]  ;;  %3051 = vst [vmem:[%s5664_s1 + $0x390] sm:$0xff] %v1410_v5  ;;  %v3073_v25 = vld [vmem:[%s5663_s0 + $0x328] sm:$0xff] }
  0x5e   :  { %3033 = vst [vmem:[%s5664_s1 + $0x528] sm:$0xff] %v1362_v51  ;;  %v4670_v19 = vld [vmem:[%s5663_s0 + $0x620] sm:$0xff]  ;;  %3054 = vst [vmem:[%s5664_s1 + $0x470] sm:$0xff] %v1418_v6  ;;  %v3076_v26 = vld [vmem:[%s5663_s0 + $0x168] sm:$0xff]  ;;  %v1474_v31 = vpack.c.bf16 %v3073_v25, %v4526_v47 }
  0x5f   :  { %3036 = vst [vmem:[%s5664_s1 + $0x608] sm:$0xff] %v1370_v52  ;;  %v4675_v20 = vld [vmem:[%s5663_s0 + $0x460] sm:$0xff]  ;;  %3048 = vst [vmem:[%s5664_s1 + $0x2b0] sm:$0xff] %v1402_v4  ;;  %v3079_v27 = vld [vmem:[%s5663_s0 + $0xba8] sm:$0xff]  ;;  %v1482_v32 = vpack.c.bf16 %v3076_v26, %v4531_v48 }
  0x60   :  { %v4680_v21 = vld [vmem:[%s5663_s0 + $0x2a0] sm:$0xff]  ;;  %3057 = vst [vmem:[%s5664_s1 + $0x550] sm:$0xff] %v1426_v13  ;;  %3060 = vst [vmem:[%s5664_s1 + $0x30] sm:$0xff] %v1434_v14  ;;  %v1490_v33 = vpack.c.bf16 %v3079_v27, %v4536_v49  ;;  %v3082_v34 = vld [vmem:[%s5663_s0 + $0x9e8] sm:$0xff] }
  0x61   :  { %v4706_v28 = vld [vmem:[%s5663_s0 + $0xe0] sm:$0xff]  ;;  %3063 = vst [vmem:[%s5664_s1 + $0x110] sm:$0xff] %v1442_v15  ;;  %v3085_v35 = vld [vmem:[%s5663_s0 + $0x828] sm:$0xff]  ;;  %3066 = vst [vmem:[%s5664_s1 + $0x1f0] sm:$0xff] %v1450_v22  ;;  %v1498_v40 = vpack.c.bf16 %v3082_v34, %v4562_v56 }
  0x62   :  { %v4711_v29 = vld [vmem:[%s5663_s0 + $0xb20] sm:$0xff]  ;;  %v3088_v36 = vld [vmem:[%s5663_s0 + $0x668] sm:$0xff]  ;;  %3069 = vst [vmem:[%s5664_s1 + $0x2d0] sm:$0xff] %v1458_v23  ;;  %3072 = vst [vmem:[%s5664_s1 + $0x3b0] sm:$0xff] %v1466_v24  ;;  %v1506_v41 = vpack.c.bf16 %v3085_v35, %v4567_v57 }
  0x63   :  { %v4716_v30 = vld [vmem:[%s5663_s0 + $0x960] sm:$0xff]  ;;  %v1514_v42 = vpack.c.bf16 %v3088_v36, %v4572_v58  ;;  %v3091_v43 = vld [vmem:[%s5663_s0 + $0x4a8] sm:$0xff]  ;;  %3075 = vst [vmem:[%s5664_s1 + $0x490] sm:$0xff] %v1474_v31  ;;  %3078 = vst [vmem:[%s5664_s1 + $0x570] sm:$0xff] %v1482_v32 }
  0x64   :  { %v4742_v37 = vld [vmem:[%s5663_s0 + $0x7a0] sm:$0xff]  ;;  %v3094_v44 = vld [vmem:[%s5663_s0 + $0x2e8] sm:$0xff]  ;;  %3081 = vst [vmem:[%s5664_s1 + $0x50] sm:$0xff] %v1490_v33  ;;  %v1522_v49 = vpack.c.bf16 %v3091_v43, %v4598_v1  ;;  %3084 = vst [vmem:[%s5664_s1 + $0x130] sm:$0xff] %v1498_v40 }
  0x65   :  { %v4747_v38 = vld [vmem:[%s5663_s0 + $0x5e0] sm:$0xff]  ;;  %v3097_v45 = vld [vmem:[%s5663_s0 + $0x128] sm:$0xff]  ;;  %v1530_v50 = vpack.c.bf16 %v3094_v44, %v4603_v2  ;;  %3087 = vst [vmem:[%s5664_s1 + $0x210] sm:$0xff] %v1506_v41  ;;  %3090 = vst [vmem:[%s5664_s1 + $0x2f0] sm:$0xff] %v1514_v42 }
  0x66   :  { %v4752_v39 = vld [vmem:[%s5663_s0 + $0x420] sm:$0xff]  ;;  %v1538_v51 = vpack.c.bf16 %v3097_v45, %v4608_v3  ;;  %v3100_v52 = vld [vmem:[%s5663_s0 + $0xb68] sm:$0xff]  ;;  %3093 = vst [vmem:[%s5664_s1 + $0x3d0] sm:$0xff] %v1522_v49  ;;  %v4994_v36 = vld [vmem:[%s5663_s0 + $0x8b0] sm:$0xff] }
  0x67   :  { %v4778_v46 = vld [vmem:[%s5663_s0 + $0x260] sm:$0xff]  ;;  %v3103_v53 = vld [vmem:[%s5663_s0 + $0x9a8] sm:$0xff]  ;;  %v1546_v58 = vpack.c.bf16 %v3100_v52, %v4634_v10  ;;  %3096 = vst [vmem:[%s5664_s1 + $0x4b0] sm:$0xff] %v1530_v50  ;;  %v5030_v45 = vld [vmem:[%s5663_s0 + $0x370] sm:$0xff] }
  0x68   :  { %v4783_v47 = vld [vmem:[%s5663_s0 + $0xa0] sm:$0xff]  ;;  %v3106_v54 = vld [vmem:[%s5663_s0 + $0x7e8] sm:$0xff]  ;;  %v1554_v59 = vpack.c.bf16 %v3103_v53, %v4639_v11  ;;  %3099 = vst [vmem:[%s5664_s1 + $0x590] sm:$0xff] %v1538_v51 }
  0x69   :  { %v4788_v48 = vld [vmem:[%s5663_s0 + $0xae0] sm:$0xff]  ;;  %v1562_v60 = vpack.c.bf16 %v3106_v54, %v4644_v12  ;;  %v3109_v61 = vld [vmem:[%s5663_s0 + $0x628] sm:$0xff]  ;;  %3102 = vst [vmem:[%s5664_s1 + $0x70] sm:$0xff] %v1546_v58  ;;  %v5066_v54 = vld [vmem:[%s5663_s0 + $0xa30] sm:$0xff] }
  0x6a   :  { %v4814_v55 = vld [vmem:[%s5663_s0 + $0x920] sm:$0xff]  ;;  %v3112_v62 = vld [vmem:[%s5663_s0 + $0x468] sm:$0xff]  ;;  %v1570_v3 = vpack.c.bf16 %v3109_v61, %v4670_v19  ;;  %3105 = vst [vmem:[%s5664_s1 + $0x150] sm:$0xff] %v1554_v59 }
  0x6b   :  { %v4819_v56 = vld [vmem:[%s5663_s0 + $0x760] sm:$0xff]  ;;  %v3115_v63 = vld [vmem:[%s5663_s0 + $0x2a8] sm:$0xff]  ;;  %v1578_v4 = vpack.c.bf16 %v3112_v62, %v4675_v20  ;;  %3108 = vst [vmem:[%s5664_s1 + $0x230] sm:$0xff] %v1562_v60 }
  0x6c   :  { %v4824_v57 = vld [vmem:[%s5663_s0 + $0x5a0] sm:$0xff]  ;;  %v1586_v5 = vpack.c.bf16 %v3115_v63, %v4680_v21  ;;  %v3118_v6 = vld [vmem:[%s5663_s0 + $0xe8] sm:$0xff]  ;;  %3111 = vst [vmem:[%s5664_s1 + $0x310] sm:$0xff] %v1570_v3  ;;  %v5102_v63 = vld [vmem:[%s5663_s0 + $0x4f0] sm:$0xff] }
  0x6d   :  { %v4850_v0 = vld [vmem:[%s5663_s0 + $0x3e0] sm:$0xff]  ;;  %v3121_v7 = vld [vmem:[%s5663_s0 + $0xb28] sm:$0xff]  ;;  %v1594_v12 = vpack.c.bf16 %v3118_v6, %v4706_v28  ;;  %3114 = vst [vmem:[%s5664_s1 + $0x3f0] sm:$0xff] %v1578_v4  ;;  %v4963_v28 = vld [vmem:[%s5663_s0 + $0xc30] sm:$0xff] }
  0x6e   :  { %v4855_v1 = vld [vmem:[%s5663_s0 + $0x220] sm:$0xff]  ;;  %v3124_v8 = vld [vmem:[%s5663_s0 + $0x968] sm:$0xff]  ;;  %v1602_v13 = vpack.c.bf16 %v3121_v7, %v4711_v29  ;;  %3117 = vst [vmem:[%s5664_s1 + $0x4d0] sm:$0xff] %v1586_v5  ;;  %v4968_v29 = vld [vmem:[%s5663_s0 + $0xa70] sm:$0xff] }
  0x6f   :  { %v4860_v2 = vld [vmem:[%s5663_s0 + $0x60] sm:$0xff]  ;;  %v1610_v14 = vpack.c.bf16 %v3124_v8, %v4716_v30  ;;  %v3127_v15 = vld [vmem:[%s5663_s0 + $0x7a8] sm:$0xff]  ;;  %3120 = vst [vmem:[%s5664_s1 + $0x5b0] sm:$0xff] %v1594_v12  ;;  %v3184_v6 = vld [vmem:[%s5663_s0 + $0xc38] sm:$0xff] }
  0x70   :  { %v4886_v9 = vld [vmem:[%s5663_s0 + $0xaa0] sm:$0xff]  ;;  %v3130_v16 = vld [vmem:[%s5663_s0 + $0x5e8] sm:$0xff]  ;;  %v1618_v21 = vpack.c.bf16 %v3127_v15, %v4742_v37  ;;  %3123 = vst [vmem:[%s5664_s1 + $0x90] sm:$0xff] %v1602_v13  ;;  %v4999_v37 = vld [vmem:[%s5663_s0 + $0x6f0] sm:$0xff]  ;;  %v1770_v12 = vpack.c.bf16 %v3184_v6, %v4963_v28 }
  0x71   :  { %v4891_v10 = vld [vmem:[%s5663_s0 + $0x8e0] sm:$0xff]  ;;  %v3133_v17 = vld [vmem:[%s5663_s0 + $0x428] sm:$0xff]  ;;  %v1626_v22 = vpack.c.bf16 %v3130_v16, %v4747_v38  ;;  %3126 = vst [vmem:[%s5664_s1 + $0x170] sm:$0xff] %v1610_v14  ;;  %v5004_v38 = vld [vmem:[%s5663_s0 + $0x530] sm:$0xff] }
  0x72   :  { %v4896_v11 = vld [vmem:[%s5663_s0 + $0x720] sm:$0xff]  ;;  %v1634_v23 = vpack.c.bf16 %v3133_v17, %v4752_v39  ;;  %v3136_v24 = vld [vmem:[%s5663_s0 + $0x268] sm:$0xff]  ;;  %3129 = vst [vmem:[%s5664_s1 + $0x250] sm:$0xff] %v1618_v21  ;;  %v3187_v7 = vld [vmem:[%s5663_s0 + $0xa78] sm:$0xff] }
  0x73   :  { %v4922_v18 = vld [vmem:[%s5663_s0 + $0x560] sm:$0xff]  ;;  %v3139_v25 = vld [vmem:[%s5663_s0 + $0xa8] sm:$0xff]  ;;  %v1642_v30 = vpack.c.bf16 %v3136_v24, %v4778_v46  ;;  %3132 = vst [vmem:[%s5664_s1 + $0x330] sm:$0xff] %v1626_v22  ;;  %v5035_v46 = vld [vmem:[%s5663_s0 + $0x1b0] sm:$0xff]  ;;  %v1778_v13 = vpack.c.bf16 %v3187_v7, %v4968_v29 }
  0x74   :  { %v4927_v19 = vld [vmem:[%s5663_s0 + $0x3a0] sm:$0xff]  ;;  %v3142_v26 = vld [vmem:[%s5663_s0 + $0xae8] sm:$0xff]  ;;  %v1650_v31 = vpack.c.bf16 %v3139_v25, %v4783_v47  ;;  %3135 = vst [vmem:[%s5664_s1 + $0x410] sm:$0xff] %v1634_v23  ;;  %v5040_v47 = vld [vmem:[%s5663_s0 + $0xbf0] sm:$0xff] }
  0x75   :  { %v4932_v20 = vld [vmem:[%s5663_s0 + $0x1e0] sm:$0xff]  ;;  %v1658_v32 = vpack.c.bf16 %v3142_v26, %v4788_v48  ;;  %v3145_v33 = vld [vmem:[%s5663_s0 + $0x928] sm:$0xff]  ;;  %3138 = vst [vmem:[%s5664_s1 + $0x4f0] sm:$0xff] %v1642_v30  ;;  %v5138_v8 = vld [vmem:[%s5663_s0 + $0xbb0] sm:$0xff] }
  0x76   :  { %v4958_v27 = vld [vmem:[%s5663_s0 + $0x20] sm:$0xff]  ;;  %v3148_v34 = vld [vmem:[%s5663_s0 + $0x768] sm:$0xff]  ;;  %v1666_v39 = vpack.c.bf16 %v3145_v33, %v4814_v55  ;;  %3141 = vst [vmem:[%s5664_s1 + $0x5d0] sm:$0xff] %v1650_v31  ;;  %v5071_v55 = vld [vmem:[%s5663_s0 + $0x870] sm:$0xff] }
  0x77   :  { %v3151_v35 = vld [vmem:[%s5663_s0 + $0x5a8] sm:$0xff]  ;;  %v1674_v40 = vpack.c.bf16 %v3148_v34, %v4819_v56  ;;  %3144 = vst [vmem:[%s5664_s1 + $0xb0] sm:$0xff] %v1658_v32  ;;  %v5076_v56 = vld [vmem:[%s5663_s0 + $0x6b0] sm:$0xff]  ;;  %v3190_v14 = vld [vmem:[%s5663_s0 + $0x8b8] sm:$0xff] }
  0x78   :  { %v1682_v41 = vpack.c.bf16 %v3151_v35, %v4824_v57  ;;  %v3154_v42 = vld [vmem:[%s5663_s0 + $0x3e8] sm:$0xff]  ;;  %3147 = vst [vmem:[%s5664_s1 + $0x190] sm:$0xff] %v1666_v39  ;;  %v3193_v15 = vld [vmem:[%s5663_s0 + $0x6f8] sm:$0xff]  ;;  %v5174_v17 = vld [vmem:[%s5663_s0 + $0x670] sm:$0xff] }
  0x79   :  { %v3157_v43 = vld [vmem:[%s5663_s0 + $0x228] sm:$0xff]  ;;  %v1690_v48 = vpack.c.bf16 %v3154_v42, %v4850_v0  ;;  %3150 = vst [vmem:[%s5664_s1 + $0x270] sm:$0xff] %v1674_v40  ;;  %v5107_v0 = vld [vmem:[%s5663_s0 + $0x330] sm:$0xff]  ;;  %v3196_v16 = vld [vmem:[%s5663_s0 + $0x538] sm:$0xff]  ;;  %v1794_v21 = vpack.c.bf16 %v3193_v15, %v4999_v37 }
  0x7a   :  { %v3160_v44 = vld [vmem:[%s5663_s0 + $0x68] sm:$0xff]  ;;  %v1698_v49 = vpack.c.bf16 %v3157_v43, %v4855_v1  ;;  %3153 = vst [vmem:[%s5664_s1 + $0x350] sm:$0xff] %v1682_v41  ;;  %v5112_v1 = vld [vmem:[%s5663_s0 + $0x170] sm:$0xff]  ;;  %v1802_v22 = vpack.c.bf16 %v3196_v16, %v5004_v38  ;;  %v3199_v23 = vld [vmem:[%s5663_s0 + $0x378] sm:$0xff] }
  0x7b   :  { %v1706_v50 = vpack.c.bf16 %v3160_v44, %v4860_v2  ;;  %v3163_v51 = vld [vmem:[%s5663_s0 + $0xaa8] sm:$0xff]  ;;  %3156 = vst [vmem:[%s5664_s1 + $0x430] sm:$0xff] %v1690_v48  ;;  %v3202_v24 = vld [vmem:[%s5663_s0 + $0x1b8] sm:$0xff]  ;;  %v5210_v26 = vld [vmem:[%s5663_s0 + $0x130] sm:$0xff]  ;;  %v1810_v29 = vpack.c.bf16 %v3199_v23, %v5030_v45 }
  0x7c   :  { %v3166_v52 = vld [vmem:[%s5663_s0 + $0x8e8] sm:$0xff]  ;;  %v1714_v57 = vpack.c.bf16 %v3163_v51, %v4886_v9  ;;  %3159 = vst [vmem:[%s5664_s1 + $0x510] sm:$0xff] %v1698_v49  ;;  %v5143_v9 = vld [vmem:[%s5663_s0 + $0x9f0] sm:$0xff]  ;;  %v3205_v25 = vld [vmem:[%s5663_s0 + $0xbf8] sm:$0xff]  ;;  %v1818_v30 = vpack.c.bf16 %v3202_v24, %v5035_v46 }
  0x7d   :  { %v3169_v53 = vld [vmem:[%s5663_s0 + $0x728] sm:$0xff]  ;;  %v1722_v58 = vpack.c.bf16 %v3166_v52, %v4891_v10  ;;  %3162 = vst [vmem:[%s5664_s1 + $0x5f0] sm:$0xff] %v1706_v50  ;;  %v5148_v10 = vld [vmem:[%s5663_s0 + $0x830] sm:$0xff]  ;;  %3186 = vst [vmem:[%s5664_s1 + $0x18] sm:$0xff] %v1770_v12  ;;  %v1826_v31 = vpack.c.bf16 %v3205_v25, %v5040_v47 }
  0x7e   :  { %v1730_v59 = vpack.c.bf16 %v3169_v53, %v4896_v11  ;;  %v3172_v60 = vld [vmem:[%s5663_s0 + $0x568] sm:$0xff]  ;;  %3165 = vst [vmem:[%s5664_s1 + $0xd0] sm:$0xff] %v1714_v57  ;;  %v5220_v28 = vld [vmem:[%s5663_s0 + $0x9b0] sm:$0xff]  ;;  %3189 = vst [vmem:[%s5664_s1 + $0xf8] sm:$0xff] %v1778_v13 }
  0x7f   :  { %v3175_v61 = vld [vmem:[%s5663_s0 + $0x3a8] sm:$0xff]  ;;  %v1738_v2 = vpack.c.bf16 %v3172_v60, %v4922_v18  ;;  %3168 = vst [vmem:[%s5664_s1 + $0x1b0] sm:$0xff] %v1722_v58  ;;  %v5179_v18 = vld [vmem:[%s5663_s0 + $0x4b0] sm:$0xff]  ;;  %v3208_v32 = vld [vmem:[%s5663_s0 + $0xa38] sm:$0xff] }
  0x80   :  { %v3178_v62 = vld [vmem:[%s5663_s0 + $0x1e8] sm:$0xff]  ;;  %v1746_v3 = vpack.c.bf16 %v3175_v61, %v4927_v19  ;;  %3171 = vst [vmem:[%s5664_s1 + $0x290] sm:$0xff] %v1730_v59  ;;  %v5184_v19 = vld [vmem:[%s5663_s0 + $0x2f0] sm:$0xff]  ;;  %v3211_v33 = vld [vmem:[%s5663_s0 + $0x878] sm:$0xff]  ;;  %v1834_v38 = vpack.c.bf16 %v3208_v32, %v5066_v54 }
  0x81   :  { %v1754_v4 = vpack.c.bf16 %v3178_v62, %v4932_v20  ;;  %v3181_v5 = vld [vmem:[%s5663_s0 + $0x28] sm:$0xff]  ;;  %3174 = vst [vmem:[%s5664_s1 + $0x370] sm:$0xff] %v1738_v2  ;;  %v1786_v20 = vpack.c.bf16 %v3190_v14, %v4994_v36  ;;  %v3214_v34 = vld [vmem:[%s5663_s0 + $0x6b8] sm:$0xff]  ;;  %v5246_v35 = vld [vmem:[%s5663_s0 + $0x7f0] sm:$0xff]  ;;  %v1842_v39 = vpack.c.bf16 %v3211_v33, %v5071_v55 }
  0x82   :  { %v1762_v11 = vpack.c.bf16 %v3181_v5, %v4958_v27  ;;  %3177 = vst [vmem:[%s5664_s1 + $0x450] sm:$0xff] %v1746_v3  ;;  %v5215_v27 = vld [vmem:[%s5663_s0 + $0xb70] sm:$0xff]  ;;  %3195 = vst [vmem:[%s5664_s1 + $0x2b8] sm:$0xff] %v1794_v21  ;;  %v1850_v40 = vpack.c.bf16 %v3214_v34, %v5076_v56  ;;  %v3217_v41 = vld [vmem:[%s5663_s0 + $0x4f8] sm:$0xff] }
  0x83   :  { %3180 = vst [vmem:[%s5664_s1 + $0x530] sm:$0xff] %v1754_v4  ;;  %v5251_v36 = vld [vmem:[%s5663_s0 + $0x630] sm:$0xff]  ;;  %3192 = vst [vmem:[%s5664_s1 + $0x1d8] sm:$0xff] %v1786_v20  ;;  %v3220_v42 = vld [vmem:[%s5663_s0 + $0x338] sm:$0xff]  ;;  %v1858_v47 = vpack.c.bf16 %v3217_v41, %v5102_v63 }
  0x84   :  { %3183 = vst [vmem:[%s5664_s1 + $0x610] sm:$0xff] %v1762_v11  ;;  %v5256_v37 = vld [vmem:[%s5663_s0 + $0x470] sm:$0xff]  ;;  %3198 = vst [vmem:[%s5664_s1 + $0x398] sm:$0xff] %v1802_v22  ;;  %v3223_v43 = vld [vmem:[%s5663_s0 + $0x178] sm:$0xff]  ;;  %v1866_v48 = vpack.c.bf16 %v3220_v42, %v5107_v0 }
  0x85   :  { %v5282_v44 = vld [vmem:[%s5663_s0 + $0x2b0] sm:$0xff]  ;;  %3201 = vst [vmem:[%s5664_s1 + $0x478] sm:$0xff] %v1810_v29  ;;  %3204 = vst [vmem:[%s5664_s1 + $0x558] sm:$0xff] %v1818_v30  ;;  %v1874_v49 = vpack.c.bf16 %v3223_v43, %v5112_v1  ;;  %v3226_v50 = vld [vmem:[%s5663_s0 + $0xbb8] sm:$0xff] }
  0x86   :  { %v5287_v45 = vld [vmem:[%s5663_s0 + $0xf0] sm:$0xff]  ;;  %3207 = vst [vmem:[%s5664_s1 + $0x38] sm:$0xff] %v1826_v31  ;;  %v3229_v51 = vld [vmem:[%s5663_s0 + $0x9f8] sm:$0xff]  ;;  %3210 = vst [vmem:[%s5664_s1 + $0x118] sm:$0xff] %v1834_v38  ;;  %v1882_v56 = vpack.c.bf16 %v3226_v50, %v5138_v8 }
  0x87   :  { %v5292_v46 = vld [vmem:[%s5663_s0 + $0xb30] sm:$0xff]  ;;  %v3232_v52 = vld [vmem:[%s5663_s0 + $0x838] sm:$0xff]  ;;  %3213 = vst [vmem:[%s5664_s1 + $0x1f8] sm:$0xff] %v1842_v39  ;;  %3216 = vst [vmem:[%s5664_s1 + $0x2d8] sm:$0xff] %v1850_v40  ;;  %v1890_v57 = vpack.c.bf16 %v3229_v51, %v5143_v9 }
  0x88   :  { %v5318_v53 = vld [vmem:[%s5663_s0 + $0x970] sm:$0xff]  ;;  %v1898_v58 = vpack.c.bf16 %v3232_v52, %v5148_v10  ;;  %v3235_v59 = vld [vmem:[%s5663_s0 + $0x678] sm:$0xff]  ;;  %3219 = vst [vmem:[%s5664_s1 + $0x3b8] sm:$0xff] %v1858_v47  ;;  %3222 = vst [vmem:[%s5664_s1 + $0x498] sm:$0xff] %v1866_v48 }
  0x89   :  { %v5323_v54 = vld [vmem:[%s5663_s0 + $0x7b0] sm:$0xff]  ;;  %v3238_v60 = vld [vmem:[%s5663_s0 + $0x4b8] sm:$0xff]  ;;  %3225 = vst [vmem:[%s5664_s1 + $0x578] sm:$0xff] %v1874_v49  ;;  %v1906_v1 = vpack.c.bf16 %v3235_v59, %v5174_v17  ;;  %3228 = vst [vmem:[%s5664_s1 + $0x58] sm:$0xff] %v1882_v56 }
  0x8a   :  { %v5328_v55 = vld [vmem:[%s5663_s0 + $0x5f0] sm:$0xff]  ;;  %v3241_v61 = vld [vmem:[%s5663_s0 + $0x2f8] sm:$0xff]  ;;  %v1914_v2 = vpack.c.bf16 %v3238_v60, %v5179_v18  ;;  %3231 = vst [vmem:[%s5664_s1 + $0x138] sm:$0xff] %v1890_v57  ;;  %3234 = vst [vmem:[%s5664_s1 + $0x218] sm:$0xff] %v1898_v58 }
  0x8b   :  { %v5354_v62 = vld [vmem:[%s5663_s0 + $0x430] sm:$0xff]  ;;  %v1922_v3 = vpack.c.bf16 %v3241_v61, %v5184_v19  ;;  %v3244_v4 = vld [vmem:[%s5663_s0 + $0x138] sm:$0xff]  ;;  %3237 = vst [vmem:[%s5664_s1 + $0x2f8] sm:$0xff] %v1906_v1 }
  0x8c   :  { %v5359_v63 = vld [vmem:[%s5663_s0 + $0x270] sm:$0xff]  ;;  %v3247_v5 = vld [vmem:[%s5663_s0 + $0xb78] sm:$0xff]  ;;  %v1930_v10 = vpack.c.bf16 %v3244_v4, %v5210_v26  ;;  %3240 = vst [vmem:[%s5664_s1 + $0x3d8] sm:$0xff] %v1914_v2 }
  0x8d   :  { %v5364_v0 = vld [vmem:[%s5663_s0 + $0xb0] sm:$0xff]  ;;  %v3250_v6 = vld [vmem:[%s5663_s0 + $0x9b8] sm:$0xff]  ;;  %v1938_v11 = vpack.c.bf16 %v3247_v5, %v5215_v27  ;;  %3243 = vst [vmem:[%s5664_s1 + $0x4b8] sm:$0xff] %v1922_v3 }
  0x8e   :  { %v5390_v7 = vld [vmem:[%s5663_s0 + $0xaf0] sm:$0xff]  ;;  %v1946_v12 = vpack.c.bf16 %v3250_v6, %v5220_v28  ;;  %v3253_v13 = vld [vmem:[%s5663_s0 + $0x7f8] sm:$0xff]  ;;  %3246 = vst [vmem:[%s5664_s1 + $0x598] sm:$0xff] %v1930_v10 }
  0x8f   :  { %v5395_v8 = vld [vmem:[%s5663_s0 + $0x930] sm:$0xff]  ;;  %v3256_v14 = vld [vmem:[%s5663_s0 + $0x638] sm:$0xff]  ;;  %v1954_v19 = vpack.c.bf16 %v3253_v13, %v5246_v35  ;;  %3249 = vst [vmem:[%s5664_s1 + $0x78] sm:$0xff] %v1938_v11 }
  0x90   :  { %v5400_v9 = vld [vmem:[%s5663_s0 + $0x770] sm:$0xff]  ;;  %v3259_v15 = vld [vmem:[%s5663_s0 + $0x478] sm:$0xff]  ;;  %v1962_v20 = vpack.c.bf16 %v3256_v14, %v5251_v36  ;;  %3252 = vst [vmem:[%s5664_s1 + $0x158] sm:$0xff] %v1946_v12 }
  0x91   :  { %v5426_v16 = vld [vmem:[%s5663_s0 + $0x5b0] sm:$0xff]  ;;  %v1970_v21 = vpack.c.bf16 %v3259_v15, %v5256_v37  ;;  %v3262_v22 = vld [vmem:[%s5663_s0 + $0x2b8] sm:$0xff]  ;;  %3255 = vst [vmem:[%s5664_s1 + $0x238] sm:$0xff] %v1954_v19 }
  0x92   :  { %v5431_v17 = vld [vmem:[%s5663_s0 + $0x3f0] sm:$0xff]  ;;  %v3265_v23 = vld [vmem:[%s5663_s0 + $0xf8] sm:$0xff]  ;;  %v1978_v28 = vpack.c.bf16 %v3262_v22, %v5282_v44  ;;  %3258 = vst [vmem:[%s5664_s1 + $0x318] sm:$0xff] %v1962_v20 }
  0x93   :  { %v5436_v18 = vld [vmem:[%s5663_s0 + $0x230] sm:$0xff]  ;;  %v3268_v24 = vld [vmem:[%s5663_s0 + $0xb38] sm:$0xff]  ;;  %v1986_v29 = vpack.c.bf16 %v3265_v23, %v5287_v45  ;;  %3261 = vst [vmem:[%s5664_s1 + $0x3f8] sm:$0xff] %v1970_v21 }
  0x94   :  { %v5462_v25 = vld [vmem:[%s5663_s0 + $0x70] sm:$0xff]  ;;  %v1994_v30 = vpack.c.bf16 %v3268_v24, %v5292_v46  ;;  %v3271_v31 = vld [vmem:[%s5663_s0 + $0x978] sm:$0xff]  ;;  %3264 = vst [vmem:[%s5664_s1 + $0x4d8] sm:$0xff] %v1978_v28 }
  0x95   :  { %v5467_v26 = vld [vmem:[%s5663_s0 + $0xab0] sm:$0xff]  ;;  %v3274_v32 = vld [vmem:[%s5663_s0 + $0x7b8] sm:$0xff]  ;;  %v2002_v37 = vpack.c.bf16 %v3271_v31, %v5318_v53  ;;  %3267 = vst [vmem:[%s5664_s1 + $0x5b8] sm:$0xff] %v1986_v29 }
  0x96   :  { %v5472_v27 = vld [vmem:[%s5663_s0 + $0x8f0] sm:$0xff]  ;;  %v3277_v33 = vld [vmem:[%s5663_s0 + $0x5f8] sm:$0xff]  ;;  %v2010_v38 = vpack.c.bf16 %v3274_v32, %v5323_v54  ;;  %3270 = vst [vmem:[%s5664_s1 + $0x98] sm:$0xff] %v1994_v30 }
  0x97   :  { %v5498_v34 = vld [vmem:[%s5663_s0 + $0x730] sm:$0xff]  ;;  %v2018_v39 = vpack.c.bf16 %v3277_v33, %v5328_v55  ;;  %v3280_v40 = vld [vmem:[%s5663_s0 + $0x438] sm:$0xff]  ;;  %3273 = vst [vmem:[%s5664_s1 + $0x178] sm:$0xff] %v2002_v37 }
  0x98   :  { %v5503_v35 = vld [vmem:[%s5663_s0 + $0x570] sm:$0xff]  ;;  %v3283_v41 = vld [vmem:[%s5663_s0 + $0x278] sm:$0xff]  ;;  %v2026_v45 = vpack.c.bf16 %v3280_v40, %v5354_v62  ;;  %3276 = vst [vmem:[%s5664_s1 + $0x258] sm:$0xff] %v2010_v38 }
  0x99   :  { %v5508_v36 = vld [vmem:[%s5663_s0 + $0x3b0] sm:$0xff]  ;;  %v3286_v42 = vld [vmem:[%s5663_s0 + $0xb8] sm:$0xff]  ;;  %v2034_v46 = vpack.c.bf16 %v3283_v41, %v5359_v63  ;;  %3279 = vst [vmem:[%s5664_s1 + $0x338] sm:$0xff] %v2018_v39 }
  0x9a   :  { %v2741_v43 = vld [vmem:[%s5663_s0 + $0x1f0] sm:$0xff]  ;;  %v2042_v47 = vpack.c.bf16 %v3286_v42, %v5364_v0  ;;  %v3289_v48 = vld [vmem:[%s5663_s0 + $0xaf8] sm:$0xff]  ;;  %3282 = vst [vmem:[%s5664_s1 + $0x418] sm:$0xff] %v2026_v45 }
  0x9b   :  { %v2742_v44 = vld [vmem:[%s5663_s0 + $0x30] sm:$0xff]  ;;  %v3292_v49 = vld [vmem:[%s5663_s0 + $0x938] sm:$0xff]  ;;  %v2050_v51 = vpack.c.bf16 %v3289_v48, %v5390_v7  ;;  %3285 = vst [vmem:[%s5664_s1 + $0x4f8] sm:$0xff] %v2034_v46 }
  0x9c   :  { %v3295_v50 = vld [vmem:[%s5663_s0 + $0x778] sm:$0xff]  ;;  %v2058_v52 = vpack.c.bf16 %v3292_v49, %v5395_v8  ;;  %3288 = vst [vmem:[%s5664_s1 + $0x5d8] sm:$0xff] %v2042_v47 }
  0x9d   :  { %v2066_v53 = vpack.c.bf16 %v3295_v50, %v5400_v9  ;;  %v3298_v54 = vld [vmem:[%s5663_s0 + $0x5b8] sm:$0xff]  ;;  %3291 = vst [vmem:[%s5664_s1 + $0xb8] sm:$0xff] %v2050_v51 }
  0x9e   :  { %v3301_v55 = vld [vmem:[%s5663_s0 + $0x3f8] sm:$0xff]  ;;  %v2074_v57 = vpack.c.bf16 %v3298_v54, %v5426_v16  ;;  %3294 = vst [vmem:[%s5664_s1 + $0x198] sm:$0xff] %v2058_v52 }
  0x9f   :  { %v3304_v56 = vld [vmem:[%s5663_s0 + $0x238] sm:$0xff]  ;;  %v2082_v58 = vpack.c.bf16 %v3301_v55, %v5431_v17  ;;  %3297 = vst [vmem:[%s5664_s1 + $0x278] sm:$0xff] %v2066_v53 }
  0xa0   :  { %v2090_v59 = vpack.c.bf16 %v3304_v56, %v5436_v18  ;;  %v3307_v60 = vld [vmem:[%s5663_s0 + $0x78] sm:$0xff]  ;;  %3300 = vst [vmem:[%s5664_s1 + $0x358] sm:$0xff] %v2074_v57 }
  0xa1   :  { %v3310_v61 = vld [vmem:[%s5663_s0 + $0xab8] sm:$0xff]  ;;  %v2098_v63 = vpack.c.bf16 %v3307_v60, %v5462_v25  ;;  %3303 = vst [vmem:[%s5664_s1 + $0x438] sm:$0xff] %v2082_v58 }
  0xa2   :  { %v3313_v62 = vld [vmem:[%s5663_s0 + $0x8f8] sm:$0xff]  ;;  %v2106_v0 = vpack.c.bf16 %v3310_v61, %v5467_v26  ;;  %3306 = vst [vmem:[%s5664_s1 + $0x518] sm:$0xff] %v2090_v59 }
  0xa3   :  { %v2114_v1 = vpack.c.bf16 %v3313_v62, %v5472_v27  ;;  %v3316_v2 = vld [vmem:[%s5663_s0 + $0x738] sm:$0xff]  ;;  %3309 = vst [vmem:[%s5664_s1 + $0x5f8] sm:$0xff] %v2098_v63 }
  0xa4   :  { %v3319_v3 = vld [vmem:[%s5663_s0 + $0x578] sm:$0xff]  ;;  %v2122_v5 = vpack.c.bf16 %v3316_v2, %v5498_v34  ;;  %3312 = vst [vmem:[%s5664_s1 + $0xd8] sm:$0xff] %v2106_v0 }
  0xa5   :  { %v3322_v4 = vld [vmem:[%s5663_s0 + $0x3b8] sm:$0xff]  ;;  %v2130_v6 = vpack.c.bf16 %v3319_v3, %v5503_v35  ;;  %3315 = vst [vmem:[%s5664_s1 + $0x1b8] sm:$0xff] %v2114_v1 }
  0xa6   :  { %v2138_v7 = vpack.c.bf16 %v3322_v4, %v5508_v36  ;;  %v3325_v8 = vld [vmem:[%s5663_s0 + $0x1f8] sm:$0xff]  ;;  %3318 = vst [vmem:[%s5664_s1 + $0x298] sm:$0xff] %v2122_v5 }
  0xa7   :  { %v3328_v9 = vld [vmem:[%s5663_s0 + $0x38] sm:$0xff]  ;;  %v2146_v10 = vpack.c.bf16 %v3325_v8, %v2741_v43  ;;  %3321 = vst [vmem:[%s5664_s1 + $0x378] sm:$0xff] %v2130_v6 }
  0xa8   :  { %v2154_v11 = vpack.c.bf16 %v3328_v9, %v2742_v44  ;;  %3324 = vst [vmem:[%s5664_s1 + $0x458] sm:$0xff] %v2138_v7 }
  0xa9   :  { %3327 = vst [vmem:[%s5664_s1 + $0x538] sm:$0xff] %v2146_v10 }
  0xaa   :  { %3330 = vst [vmem:[%s5664_s1 + $0x618] sm:$0xff] %v2154_v11 }

// kernel: look_vit_forward.32
= control target key start
LH: loop header
LB: loop body
LE: loop exit
PB: predicated region body
PF: predicated region fallthrough
CT: control target
= control target key end

     0   :  { %vm16_vm0 = vcmask 261120   ;;  %v72_v30 = vlaneseq  ;;  %s151_s0 = inlined_call_operand.vmem [shape: f32[32,32], index: 0, kind: input, shape index: {}]   ;;  %s152_s1 = inlined_call_operand.vmem [shape: f32[1,32], index: 1, kind: input, shape index: {}]   ;;  %s153_s2 = inlined_call_operand.vmem [shape: f32[32,32], index: 2, kind: output, shape index: {}]  }
   0x1   :  { %v11_v0 = vld [vmem:[%s151_s0] sm:$0xff]  ;;  %v13_v1 = vld [vmem:[%s151_s0 + $0x10] sm:$0xff]  ;;  %v12_v2 = vld [vmem:[%s151_s0 + $0x8] sm:$0xff] }
   0x2   :  { %v17_v3 = vsel %vm16_vm0, %v11_v0, 0.0  ;;  %v23_v4 = vsel %vm16_vm0, %v13_v1, 0.0  ;;  %v14_v5 = vld [vmem:[%s151_s0 + $0x18] sm:$0xff]  ;;  %v20_v6 = vsel %vm16_vm0, %v12_v2, 0.0  ;;  %v73_v36 = vshrl.u32 %v72_v30, 7 }
   0x3   :  { %18 = vadd.xlane.f32.xlu0 %v17_v3  ;;  %24 = vadd.xlane.f32.xlu1 %v23_v4  ;;  %v26_v7 = vsel %vm16_vm0, %v14_v5, 0.0  ;;  %v15_v37 = vld [vmem:[%s152_s1] sm:$0x1] }
   0x4   :  { %v70_v42 = vadd.f32 1.0, %v15_v37  ;;  %v74_v43 = vsub.s32 0, %v73_v36 }
   0x6   :  { %v75_v45 = vrot.slane %v70_v42, %v74_v43 }
   0x7   :  { %21 = vadd.xlane.f32.xlu0 %v20_v6  ;;  %27 = vadd.xlane.f32.xlu1 %v26_v7 }
  0x90   :  { %v19_v8 = vpop.xlane.xlu0 %18  ;;  %v25_v9 = vpop.xlane.xlu1 %24 }
  0x91   :  { %v30_v10 = vmul.f32 0.03125, %v19_v8  ;;  %v32_v11 = vmul.f32 0.03125, %v25_v9 }
  0x93   :  { %v34_v12 = vsub.f32 %v11_v0, %v30_v10  ;;  %v36_v13 = vsub.f32 %v13_v1, %v32_v11 }
  0x94   :  { %v22_v14 = vpop.xlane.xlu0 %21  ;;  %v28_v15 = vpop.xlane.xlu1 %27 }
  0x95   :  { %v31_v16 = vmul.f32 0.03125, %v22_v14  ;;  %v33_v17 = vmul.f32 0.03125, %v28_v15  ;;  %v38_v18 = vmul.f32 %v34_v12, %v34_v12  ;;  %v40_v19 = vmul.f32 %v36_v13, %v36_v13 }
  0x97   :  { %v35_v20 = vsub.f32 %v12_v2, %v31_v16  ;;  %v37_v21 = vsub.f32 %v14_v5, %v33_v17  ;;  %v42_v22 = vsel %vm16_vm0, %v38_v18, 0.0  ;;  %v48_v23 = vsel %vm16_vm0, %v40_v19, 0.0 }
  0x98   :  { %43 = vadd.xlane.f32.xlu0 %v42_v22 }
  0x99   :  { %v39_v24 = vmul.f32 %v35_v20, %v35_v20  ;;  %v41_v25 = vmul.f32 %v37_v21, %v37_v21 }
  0x9b   :  { %v45_v26 = vsel %vm16_vm0, %v39_v24, 0.0  ;;  %v51_v27 = vsel %vm16_vm0, %v41_v25, 0.0 }
  0x9c   :  { %49 = vadd.xlane.f32.xlu0 %v48_v23  ;;  %46 = vadd.xlane.f32.xlu1 %v45_v26 }
  0xa0   :  { %52 = vadd.xlane.f32.xlu1 %v51_v27 }
 0x125   :  { %v44_v28 = vpop.xlane.xlu0 %43 }
 0x126   :  { %v54_v29 = vmul.f32 0.03125, %v44_v28 }
 0x128   :  { %v58_v31 = vadd.f32 1e-05, %v54_v29 }
 0x129   :  { %v47_v32 = vpop.xlane.xlu1 %46  ;;  %v50_v33 = vpop.xlane.xlu0 %49 }
 0x12a   :  { %89 = vrsqrt.f32 %v58_v31  ;;  %v55_v34 = vmul.f32 0.03125, %v47_v32  ;;  %v56_v35 = vmul.f32 0.03125, %v50_v33 }
 0x12c   :  { %v59_v38 = vadd.f32 1e-05, %v55_v34  ;;  %v60_v39 = vadd.f32 1e-05, %v56_v35 }
 0x12d   :  { %v53_v40 = vpop.xlane.xlu1 %52 }
 0x12e   :  { %91 = vrsqrt.f32 %v59_v38  ;;  %v57_v41 = vmul.f32 0.03125, %v53_v40 }
 0x12f   :  { %93 = vrsqrt.f32 %v60_v39 }
 0x130   :  { %v61_v44 = vadd.f32 1e-05, %v57_v41 }
 0x132   :  { %95 = vrsqrt.f32 %v61_v44 }
 0x134   :  { %v90_v46 = vpop.eup %89 }
 0x135   :  { %v66_v47 = vmul.f32 %v90_v46, %v34_v12 }
 0x137   :  { %v77_v48 = vmul.f32 %v75_v45, %v66_v47 }
 0x138   :  { %v92_v49 = vpop.eup %91 }
 0x139   :  { %v94_v50 = vpop.eup %93  ;;  %81 = vst.msk [vmem:[%s153_s2] sm:$0xff] %vm16_vm0, %v77_v48  ;;  %v67_v51 = vmul.f32 %v92_v49, %v35_v20 }
 0x13a   :  { %v68_v52 = vmul.f32 %v94_v50, %v36_v13 }
 0x13b   :  { %v78_v53 = vmul.f32 %v75_v45, %v67_v51 }
 0x13c   :  { %v96_v54 = vpop.eup %95  ;;  %v79_v55 = vmul.f32 %v75_v45, %v68_v52 }
 0x13d   :  { %82 = vst.msk [vmem:[%s153_s2 + $0x8] sm:$0xff] %vm16_vm0, %v78_v53  ;;  %v69_v56 = vmul.f32 %v96_v54, %v37_v21 }
 0x13e   :  { %83 = vst.msk [vmem:[%s153_s2 + $0x10] sm:$0xff] %vm16_vm0, %v79_v55 }
 0x13f   :  { %v80_v57 = vmul.f32 %v75_v45, %v69_v56 }
 0x141   :  { %84 = vst.msk [vmem:[%s153_s2 + $0x18] sm:$0xff] %vm16_vm0, %v80_v57 }

// kernel: look_vit_forward.34
= control target key start
LH: loop header
LB: loop body
LE: loop exit
PB: predicated region body
PF: predicated region fallthrough
CT: control target
= control target key end

     0   :  { %vm19_vm0 = vcmask 261120   ;;  %v246_v30 = vmov 0.0   ;;  %v85_v38 = vlaneseq  ;;  %vm202_vm1 = vcmask 257024   ;;  %s318_s0 = inlined_call_operand.vmem [shape: f32[32,32], index: 0, kind: input, shape index: {}]   ;;  %s319_s2 = inlined_call_operand.vmem [shape: bf16[32,32], index: 2, kind: input, shape index: {}]   ;;  %s320_s1 = inlined_call_operand.vmem [shape: f32[1,32], index: 1, kind: input, shape index: {}]   ;;  %s321_s3 = inlined_call_operand.vmem [shape: bf16[32,32], index: 3, kind: output, shape index: {}]  }
   0x1   :  { %v24_v0 = vld [vmem:[%s318_s0] sm:$0xff]  ;;  %v26_v1 = vld [vmem:[%s318_s0 + $0x10] sm:$0xff]  ;;  %v25_v2 = vld [vmem:[%s318_s0 + $0x8] sm:$0xff]  ;;  %22 = vst.msk [vmem:[#allocation2 + $0x10] sm:$0xff] %vm19_vm0, %v246_v30 }
   0x2   :  { %v30_v3 = vsel %vm19_vm0, %v24_v0, 0.0  ;;  %v36_v4 = vsel %vm19_vm0, %v26_v1, 0.0  ;;  %v27_v5 = vld [vmem:[%s318_s0 + $0x18] sm:$0xff]  ;;  %v33_v6 = vsel %vm19_vm0, %v25_v2, 0.0  ;;  %v236_v28 = vld [vmem:[%s319_s2] sm:$0xff]   ;;  %v237_v29 = vld [vmem:[%s319_s2 + $0x8] sm:$0xff]  }
   0x3   :  { %31 = vadd.xlane.f32.xlu0 %v30_v3  ;;  %37 = vadd.xlane.f32.xlu1 %v36_v4  ;;  %v39_v7 = vsel %vm19_vm0, %v27_v5, 0.0  ;;  %20 = vst.msk [vmem:[#allocation2] sm:$0xff] %vm19_vm0, %v246_v30  ;;  %21 = vst.msk [vmem:[#allocation2 + $0x8] sm:$0xff] %vm19_vm0, %v246_v30  ;;  %v86_v43 = vshrl.u32 %v85_v38, 7  ;;  %v28_v45 = vld [vmem:[%s320_s1] sm:$0x1] }
   0x4   :  { %227 = vmatprep.subr.bf16.mxu0 %v236_v28  ;;  %23 = vst.msk [vmem:[#allocation2 + $0x18] sm:$0xff] %vm19_vm0, %v246_v30  ;;  %v83_v46 = vadd.f32 1.0, %v28_v45 }
   0x5   :  { %228 = vmatpush3.bf16.msra.mxu0 %v236_v28  ;;  %v87_v47 = vsub.s32 0, %v86_v43 }
   0x6   :  { %229 = vmatprep.subr.bf16.mxu0 %v237_v29 }
   0x7   :  { %34 = vadd.xlane.f32.xlu0 %v33_v6  ;;  %40 = vadd.xlane.f32.xlu1 %v39_v7  ;;  %v88_v50 = vrot.slane %v83_v46, %v87_v47 }
   0x8   :  { %v96_v63 = vld [vmem:[#allocation2 + $0x10] sm:$0xff] }
   0x9   :  { %230 = vmatpush3.bf16.msra.mxu0 %v237_v29 }
  0x90   :  { %v32_v8 = vpop.xlane.xlu0 %31  ;;  %v38_v9 = vpop.xlane.xlu1 %37 }
  0x91   :  { %v43_v10 = vmul.f32 0.03125, %v32_v8  ;;  %v45_v11 = vmul.f32 0.03125, %v38_v9 }
  0x93   :  { %v47_v12 = vsub.f32 %v24_v0, %v43_v10  ;;  %v49_v13 = vsub.f32 %v26_v1, %v45_v11  ;;  %v94_v0 = vld [vmem:[#allocation2] sm:$0xff] }
  0x94   :  { %v35_v14 = vpop.xlane.xlu0 %34  ;;  %v41_v15 = vpop.xlane.xlu1 %40 }
  0x95   :  { %v44_v16 = vmul.f32 0.03125, %v35_v14  ;;  %v46_v17 = vmul.f32 0.03125, %v41_v15  ;;  %v51_v18 = vmul.f32 %v47_v12, %v47_v12  ;;  %v53_v19 = vmul.f32 %v49_v13, %v49_v13 }
  0x97   :  { %v48_v20 = vsub.f32 %v25_v2, %v44_v16  ;;  %v50_v21 = vsub.f32 %v27_v5, %v46_v17  ;;  %v55_v22 = vsel %vm19_vm0, %v51_v18, 0.0  ;;  %v61_v23 = vsel %vm19_vm0, %v53_v19, 0.0  ;;  %v97_v2 = vld [vmem:[#allocation2 + $0x18] sm:$0xff]  ;;  %v95_v5 = vld [vmem:[#allocation2 + $0x8] sm:$0xff] }
  0x98   :  { %56 = vadd.xlane.f32.xlu0 %v55_v22 }
  0x99   :  { %v52_v24 = vmul.f32 %v48_v20, %v48_v20  ;;  %v54_v25 = vmul.f32 %v50_v21, %v50_v21 }
  0x9b   :  { %v58_v26 = vsel %vm19_vm0, %v52_v24, 0.0  ;;  %v64_v27 = vsel %vm19_vm0, %v54_v25, 0.0 }
  0x9c   :  { %62 = vadd.xlane.f32.xlu0 %v61_v23  ;;  %59 = vadd.xlane.f32.xlu1 %v58_v26 }
  0xa0   :  { %65 = vadd.xlane.f32.xlu1 %v64_v27 }
 0x125   :  { %v57_v31 = vpop.xlane.xlu0 %56 }
 0x126   :  { %v67_v32 = vmul.f32 0.03125, %v57_v31 }
 0x128   :  { %v71_v33 = vadd.f32 1e-05, %v67_v32 }
 0x129   :  { %v60_v34 = vpop.xlane.xlu1 %59  ;;  %v63_v35 = vpop.xlane.xlu0 %62 }
 0x12a   :  { %238 = vrsqrt.f32 %v71_v33  ;;  %v68_v36 = vmul.f32 0.03125, %v60_v34  ;;  %v69_v37 = vmul.f32 0.03125, %v63_v35 }
 0x12c   :  { %v72_v39 = vadd.f32 1e-05, %v68_v36  ;;  %v73_v40 = vadd.f32 1e-05, %v69_v37 }
 0x12d   :  { %v66_v41 = vpop.xlane.xlu1 %65 }
 0x12e   :  { %240 = vrsqrt.f32 %v72_v39  ;;  %v70_v42 = vmul.f32 0.03125, %v66_v41 }
 0x12f   :  { %242 = vrsqrt.f32 %v73_v40 }
 0x130   :  { %v74_v44 = vadd.f32 1e-05, %v70_v42 }
 0x132   :  { %244 = vrsqrt.f32 %v74_v44 }
 0x134   :  { %v239_v48 = vpop.eup %238 }
 0x135   :  { %v79_v49 = vmul.f32 %v239_v48, %v47_v12 }
 0x137   :  { %v90_v54 = vmul.f32 %v88_v50, %v79_v49 }
 0x138   :  { %v241_v51 = vpop.eup %240 }
 0x139   :  { %v243_v52 = vpop.eup %242  ;;  %v80_v53 = vmul.f32 %v241_v51, %v48_v20 }
 0x13a   :  { %v81_v56 = vmul.f32 %v243_v52, %v49_v13 }
 0x13b   :  { %v91_v55 = vmul.f32 %v88_v50, %v80_v53 }
 0x13c   :  { %v245_v57 = vpop.eup %244  ;;  %v92_v60 = vmul.f32 %v88_v50, %v81_v56 }
 0x13d   :  { %v98_v58 = vpack.c.bf16 %v91_v55, %v90_v54  ;;  %v82_v59 = vmul.f32 %v245_v57, %v50_v21 }
 0x13f   :  { %231 = vmatprep.mubr.msk.bf16.mxu0 %vm19_vm0, %v98_v58  ;;  %v93_v61 = vmul.f32 %v88_v50, %v82_v59 }
 0x141   :  { %v99_v62 = vpack.c.bf16 %v93_v61, %v92_v60 }
 0x143   :  { %232 = vmatmul.mubr.msk.bf16.vlgmr.msra.gmra.mrb[0].mxu0 %vm19_vm0, %v99_v62 }
 0x216   :  { %v233_v1 = vpop.f32.mrb[0].mxu0 }
 0x217   :  { %v173_v3 = vadd.f32 %v233_v1, %v96_v63  ;;  %v156_v4 = vpop.f32.mrb[1].mxu0 }
 0x218   :  { %v171_v6 = vadd.f32 %v156_v4, %v94_v0  ;;  %v234_v7 = vpop.f32.mrb[2].mxu0 }
 0x219   :  { %177 = vst.msk [vmem:[#allocation2 + $0x10] sm:$0xff] %vm19_vm0, %v173_v3  ;;  %v174_v8 = vadd.f32 %v234_v7, %v97_v2  ;;  %v159_v9 = vpop.f32.mrb[3].mxu0 }
 0x21a   :  { %175 = vst.msk [vmem:[#allocation2] sm:$0xff] %vm19_vm0, %v171_v6  ;;  %v172_v10 = vadd.f32 %v159_v9, %v95_v5 }
 0x21b   :  { %178 = vst.msk [vmem:[#allocation2 + $0x18] sm:$0xff] %vm19_vm0, %v174_v8 }
 0x21c   :  { %176 = vst.msk [vmem:[#allocation2 + $0x8] sm:$0xff] %vm19_vm0, %v172_v10 }
 0x220   :  { %v184_v11 = vld [vmem:[#allocation2 + $0x10] sm:$0xff] }
 0x221   :  { %v221_v12 = vpack.c.bf16 %v184_v11, %v184_v11  ;;  %v182_v13 = vld [vmem:[#allocation2] sm:$0xff] }
 0x222   :  { %v219_v14 = vpack.c.bf16 %v182_v13, %v182_v13  ;;  %v185_v15 = vld [vmem:[#allocation2 + $0x18] sm:$0xff] }
 0x223   :  { %205 = vst.msk [vmem:[%s321_s3 + $0x8] sm:$0xf] %vm202_vm1, %v221_v12  ;;  %v222_v16 = vpack.c.bf16 %v185_v15, %v185_v15  ;;  %v183_v17 = vld [vmem:[#allocation2 + $0x8] sm:$0xff] }
 0x224   :  { %203 = vst.msk [vmem:[%s321_s3] sm:$0xf] %vm202_vm1, %v219_v14  ;;  %v220_v18 = vpack.c.bf16 %v183_v17, %v183_v17 }
 0x225   :  { %206 = vst.msk [vmem:[%s321_s3 + $0xc] sm:$0xf] %vm202_vm1, %v222_v16 }
 0x226   :  { %204 = vst.msk [vmem:[%s321_s3 + $0x4] sm:$0xf] %vm202_vm1, %v220_v18 }

// kernel: look_vit_forward.33
= control target key start
LH: loop header
LB: loop body
LE: loop exit
PB: predicated region body
PF: predicated region fallthrough
CT: control target
= control target key end

     0   :  { %vm29_vm0 = vcmask 261120   ;;  %vm19_vm1 = vcmask 523264   ;;  %v247_v30 = vmov 0.0   ;;  %v85_v38 = vlaneseq  ;;  %s319_s0 = inlined_call_operand.vmem [shape: f32[32,32], index: 0, kind: input, shape index: {}]   ;;  %s320_s2 = inlined_call_operand.vmem [shape: bf16[32,64], index: 2, kind: input, shape index: {}]   ;;  %s321_s1 = inlined_call_operand.vmem [shape: f32[1,32], index: 1, kind: input, shape index: {}]   ;;  %s322_s3 = inlined_call_operand.vmem [shape: bf16[32,64], index: 3, kind: output, shape index: {}]  }
   0x1   :  { %v24_v0 = vld [vmem:[%s319_s0] sm:$0xff]  ;;  %v26_v1 = vld [vmem:[%s319_s0 + $0x10] sm:$0xff]  ;;  %v25_v2 = vld [vmem:[%s319_s0 + $0x8] sm:$0xff]  ;;  %22 = vst.msk [vmem:[#allocation2 + $0x10] sm:$0xff] %vm19_vm1, %v247_v30  ;;  %vm203_vm2 = vcmask 519168  }
   0x2   :  { %v30_v3 = vsel %vm29_vm0, %v24_v0, 0.0  ;;  %v36_v4 = vsel %vm29_vm0, %v26_v1, 0.0  ;;  %v27_v5 = vld [vmem:[%s319_s0 + $0x18] sm:$0xff]  ;;  %v33_v6 = vsel %vm29_vm0, %v25_v2, 0.0  ;;  %v237_v28 = vld [vmem:[%s320_s2] sm:$0xff]   ;;  %v238_v29 = vld [vmem:[%s320_s2 + $0x8] sm:$0xff]  }
   0x3   :  { %31 = vadd.xlane.f32.xlu0 %v30_v3  ;;  %37 = vadd.xlane.f32.xlu1 %v36_v4  ;;  %v39_v7 = vsel %vm29_vm0, %v27_v5, 0.0  ;;  %20 = vst.msk [vmem:[#allocation2] sm:$0xff] %vm19_vm1, %v247_v30  ;;  %21 = vst.msk [vmem:[#allocation2 + $0x8] sm:$0xff] %vm19_vm1, %v247_v30  ;;  %v86_v43 = vshrl.u32 %v85_v38, 7  ;;  %v28_v45 = vld [vmem:[%s321_s1] sm:$0x1] }
   0x4   :  { %228 = vmatprep.subr.bf16.mxu0 %v237_v28  ;;  %23 = vst.msk [vmem:[#allocation2 + $0x18] sm:$0xff] %vm19_vm1, %v247_v30  ;;  %v83_v46 = vadd.f32 1.0, %v28_v45 }
   0x5   :  { %229 = vmatpush3.bf16.msra.mxu0 %v237_v28  ;;  %v87_v47 = vsub.s32 0, %v86_v43 }
   0x6   :  { %230 = vmatprep.subr.bf16.mxu0 %v238_v29 }
   0x7   :  { %34 = vadd.xlane.f32.xlu0 %v33_v6  ;;  %40 = vadd.xlane.f32.xlu1 %v39_v7  ;;  %v88_v50 = vrot.slane %v83_v46, %v87_v47 }
   0x8   :  { %v96_v63 = vld [vmem:[#allocation2 + $0x10] sm:$0xff] }
   0x9   :  { %231 = vmatpush3.bf16.msra.mxu0 %v238_v29 }
  0x90   :  { %v32_v8 = vpop.xlane.xlu0 %31  ;;  %v38_v9 = vpop.xlane.xlu1 %37 }
  0x91   :  { %v43_v10 = vmul.f32 0.03125, %v32_v8  ;;  %v45_v11 = vmul.f32 0.03125, %v38_v9 }
  0x93   :  { %v47_v12 = vsub.f32 %v24_v0, %v43_v10  ;;  %v49_v13 = vsub.f32 %v26_v1, %v45_v11  ;;  %v94_v0 = vld [vmem:[#allocation2] sm:$0xff] }
  0x94   :  { %v35_v14 = vpop.xlane.xlu0 %34  ;;  %v41_v15 = vpop.xlane.xlu1 %40 }
  0x95   :  { %v44_v16 = vmul.f32 0.03125, %v35_v14  ;;  %v46_v17 = vmul.f32 0.03125, %v41_v15  ;;  %v51_v18 = vmul.f32 %v47_v12, %v47_v12  ;;  %v53_v19 = vmul.f32 %v49_v13, %v49_v13 }
  0x97   :  { %v48_v20 = vsub.f32 %v25_v2, %v44_v16  ;;  %v50_v21 = vsub.f32 %v27_v5, %v46_v17  ;;  %v55_v22 = vsel %vm29_vm0, %v51_v18, 0.0  ;;  %v61_v23 = vsel %vm29_vm0, %v53_v19, 0.0  ;;  %v97_v2 = vld [vmem:[#allocation2 + $0x18] sm:$0xff]  ;;  %v95_v5 = vld [vmem:[#allocation2 + $0x8] sm:$0xff] }
  0x98   :  { %56 = vadd.xlane.f32.xlu0 %v55_v22 }
  0x99   :  { %v52_v24 = vmul.f32 %v48_v20, %v48_v20  ;;  %v54_v25 = vmul.f32 %v50_v21, %v50_v21 }
  0x9b   :  { %v58_v26 = vsel %vm29_vm0, %v52_v24, 0.0  ;;  %v64_v27 = vsel %vm29_vm0, %v54_v25, 0.0 }
  0x9c   :  { %62 = vadd.xlane.f32.xlu0 %v61_v23  ;;  %59 = vadd.xlane.f32.xlu1 %v58_v26 }
  0xa0   :  { %65 = vadd.xlane.f32.xlu1 %v64_v27 }
 0x125   :  { %v57_v31 = vpop.xlane.xlu0 %56 }
 0x126   :  { %v67_v32 = vmul.f32 0.03125, %v57_v31 }
 0x128   :  { %v71_v33 = vadd.f32 1e-05, %v67_v32 }
 0x129   :  { %v60_v34 = vpop.xlane.xlu1 %59  ;;  %v63_v35 = vpop.xlane.xlu0 %62 }
 0x12a   :  { %239 = vrsqrt.f32 %v71_v33  ;;  %v68_v36 = vmul.f32 0.03125, %v60_v34  ;;  %v69_v37 = vmul.f32 0.03125, %v63_v35 }
 0x12c   :  { %v72_v39 = vadd.f32 1e-05, %v68_v36  ;;  %v73_v40 = vadd.f32 1e-05, %v69_v37 }
 0x12d   :  { %v66_v41 = vpop.xlane.xlu1 %65 }
 0x12e   :  { %241 = vrsqrt.f32 %v72_v39  ;;  %v70_v42 = vmul.f32 0.03125, %v66_v41 }
 0x12f   :  { %243 = vrsqrt.f32 %v73_v40 }
 0x130   :  { %v74_v44 = vadd.f32 1e-05, %v70_v42 }
 0x132   :  { %245 = vrsqrt.f32 %v74_v44 }
 0x134   :  { %v240_v48 = vpop.eup %239 }
 0x135   :  { %v79_v49 = vmul.f32 %v240_v48, %v47_v12 }
 0x137   :  { %v90_v54 = vmul.f32 %v88_v50, %v79_v49 }
 0x138   :  { %v242_v51 = vpop.eup %241 }
 0x139   :  { %v244_v52 = vpop.eup %243  ;;  %v80_v53 = vmul.f32 %v242_v51, %v48_v20 }
 0x13a   :  { %v81_v56 = vmul.f32 %v244_v52, %v49_v13 }
 0x13b   :  { %v91_v55 = vmul.f32 %v88_v50, %v80_v53 }
 0x13c   :  { %v246_v57 = vpop.eup %245  ;;  %v92_v60 = vmul.f32 %v88_v50, %v81_v56 }
 0x13d   :  { %v98_v58 = vpack.c.bf16 %v91_v55, %v90_v54  ;;  %v82_v59 = vmul.f32 %v246_v57, %v50_v21 }
 0x13f   :  { %232 = vmatprep.mubr.msk.bf16.mxu0 %vm29_vm0, %v98_v58  ;;  %v93_v61 = vmul.f32 %v88_v50, %v82_v59 }
 0x141   :  { %v99_v62 = vpack.c.bf16 %v93_v61, %v92_v60 }
 0x143   :  { %233 = vmatmul.mubr.msk.bf16.vlgmr.msra.gmra.mrb[0].mxu0 %vm29_vm0, %v99_v62 }
 0x216   :  { %v234_v1 = vpop.f32.mrb[0].mxu0 }
 0x217   :  { %v173_v3 = vadd.f32 %v234_v1, %v96_v63  ;;  %v156_v4 = vpop.f32.mrb[1].mxu0 }
 0x218   :  { %v171_v6 = vadd.f32 %v156_v4, %v94_v0  ;;  %v235_v7 = vpop.f32.mrb[2].mxu0 }
 0x219   :  { %178 = vst.msk [vmem:[#allocation2 + $0x10] sm:$0xff] %vm19_vm1, %v173_v3  ;;  %v174_v8 = vadd.f32 %v235_v7, %v97_v2  ;;  %v159_v9 = vpop.f32.mrb[3].mxu0 }
 0x21a   :  { %176 = vst.msk [vmem:[#allocation2] sm:$0xff] %vm19_vm1, %v171_v6  ;;  %v172_v10 = vadd.f32 %v159_v9, %v95_v5 }
 0x21b   :  { %179 = vst.msk [vmem:[#allocation2 + $0x18] sm:$0xff] %vm19_vm1, %v174_v8 }
 0x21c   :  { %177 = vst.msk [vmem:[#allocation2 + $0x8] sm:$0xff] %vm19_vm1, %v172_v10 }
 0x220   :  { %v185_v11 = vld [vmem:[#allocation2 + $0x10] sm:$0xff] }
 0x221   :  { %v222_v12 = vpack.c.bf16 %v185_v11, %v185_v11  ;;  %v183_v13 = vld [vmem:[#allocation2] sm:$0xff] }
 0x222   :  { %v220_v14 = vpack.c.bf16 %v183_v13, %v183_v13  ;;  %v186_v15 = vld [vmem:[#allocation2 + $0x18] sm:$0xff] }
 0x223   :  { %206 = vst.msk [vmem:[%s322_s3 + $0x8] sm:$0xf] %vm203_vm2, %v222_v12  ;;  %v223_v16 = vpack.c.bf16 %v186_v15, %v186_v15  ;;  %v184_v17 = vld [vmem:[#allocation2 + $0x8] sm:$0xff] }
 0x224   :  { %204 = vst.msk [vmem:[%s322_s3] sm:$0xf] %vm203_vm2, %v220_v14  ;;  %v221_v18 = vpack.c.bf16 %v184_v17, %v184_v17 }
 0x225   :  { %207 = vst.msk [vmem:[%s322_s3 + $0xc] sm:$0xf] %vm203_vm2, %v223_v16 }
 0x226   :  { %205 = vst.msk [vmem:[%s322_s3 + $0x4] sm:$0xf] %vm203_vm2, %v221_v18 }

// kernel: look_vit_forward.35
= control target key start
LH: loop header
LB: loop body
LE: loop exit
PB: predicated region body
PF: predicated region fallthrough
CT: control target
= control target key end

     0   :  { %s746_s12 = smov 0   ;;  %s820_s0 = inlined_call_operand.vmem [shape: bf16[2,16,64], index: 0, kind: input, shape index: {}]   ;;  %s821_s1 = inlined_call_operand.vmem [shape: bf16[2,16,32], index: 1, kind: input, shape index: {}]   ;;  %s822_s2 = inlined_call_operand.vmem [shape: bf16[2,16,32], index: 2, kind: output, shape index: {0}]   ;;  %s823_s3 = inlined_call_operand.vmem [shape: bf16[2,2,16,16], index: 3, kind: output, shape index: {1}]  }
   0x1 LB: > { %s605_s13 = sadd.s32 4294967295, %s718_s12   ;;  %p609_p0 = scmp.ge.s32.totalorder %s718_s12, 1  ;;  %s718_s12 = sphi %s746_s12, %s14_s12  }
   0x2   : > { %p150_p1 = scmp.lt.s32.totalorder %s718_s12, 3 }
   0x4   : > { %p151_p2 = pnand %p609_p0, %p150_p1 }
   0x5   : > { %p184_p3 = scmp.lt.s32.totalorder (!%p151_p2), %s605_s13, 1  ;;  %v720_v0 = vmov (!%p151_p2), 0.0   ;;  %vm721_vm0 = vmmov (!%p151_p2), 0   ;;  %s722_s18 = smov (!%p151_p2), 96   ;;  %vm216_vm1 = vcmask (!%p151_p2), 130048   ;;  %vm345_vm2 = vcmask (!%p151_p2), 125952  }
   0x6   : > { %154 = sbr.rel (%p151_p2) target bundleno = 1544 (0x608), region = 28  ;;  %656 = vmatprep.subr.bf16.mxu0 (!%p151_p2), %v720_v0  ;;  %658 = vmatprep.mubr.msk.bf16.mxu0 (!%p151_p2), %vm721_vm0, %v720_v0  ;;  %s723_s26 = smov (!%p151_p2), 80   ;;  %vm491_vm3 = vcmask (!%p151_p2), 257152  }
   0x7   : > { %662 = vmatprep.subr.bf16.mxu1 (!%p151_p2), %v720_v0  ;;  %664 = vmatprep.mubr.msk.bf16.mxu1 (!%p151_p2), %vm721_vm0, %v720_v0  ;;  %s724_s27 = smov (!%p151_p2), 112   ;;  %s725_s4 = smov (!%p151_p2), 16  }
   0xd   : > { %s825_s13 = smov (!%p184_p3, %s605_s13), 1 }
   0xe   : > { %s760_s14 = sshll.u32 %s825_s13, 3  ;;  %s639_s19 = sshll.u32 %s825_s13, 4 }
   0xf   : > { %s188_s17 = scalar_lea.vmem %s820_s0, %s760_s14  ;;  %s774_s22 = scalar_lea.vmem %s823_s3, %s639_s19 }
  0x10   : > { %v694_v1 = vld [vmem:[%s188_s17] sm:$0xff]   ;;  %s193_s25 = scalar_lea.vmem %s821_s1, %s760_s14  ;;  %s799_s30 = scalar_lea.vmem %s822_s2, %s760_s14 }
  0x11   : > { %214 = vrot.lane.b32.xlu0 %v694_v1, %s722_s18  ;;  %v695_v22 = vld [vmem:[%s193_s25] sm:$0xff]  }
  0x12   : > { %663 = vmatpush3.bf16.msra.mxu1 %v695_v22 }
  0x13   : > { %668 = vmatprep.subr.bf16.mxu1 %v720_v0 }
  0x83   : > { %v215_v2 = vpop.permute.xlu0 %214 }
  0x84   : > { %v221_v3 = vsel %vm216_vm1, %v215_v2, 0 }
  0x85   : > { %657 = vmatpush3.bf16.xpose.msra.mxu0 %v221_v3 }
  0x86   : > { %674 = vmatprep.subr.bf16.mxu0 %v720_v0 }
  0x8c   : > { %659 = vmatmul.mubr.msk.bf16.vlgmr.msra.gmra.mrb[0].mxu0 %vm216_vm1, %v694_v1 }
  0x8d   : > { %676 = vmatprep.mubr.msk.bf16.mxu0 %vm721_vm0, %v720_v0 }
 0x15f   : > { %v257_v4 = vpop.f32.mrb[0].mxu0 }
 0x160   : > { %v642_v5 = vpack.c.bf16 %v257_v4, %v257_v4  ;;  %v660_v6 = vpop.f32.mrb[1].mxu0  ;;  %v264_v7 = vsel %vm216_vm1, %v257_v4, -inf }
 0x161   : > { %265 = vmax.xlane.f32.xlu0 %v264_v7  ;;  %v260_v8 = vpop.f32.mrb[2].mxu0 }
 0x162   : > { %356 = vst.msk [vmem:[%s774_s22] sm:$0xf] %vm345_vm2, %v642_v5  ;;  %v643_v9 = vpack.c.bf16 %v260_v8, %v260_v8  ;;  %v661_v10 = vpop.f32.mrb[3].mxu0  ;;  %v267_v11 = vsel %vm216_vm1, %v260_v8, -inf }
 0x163   : > { %268 = vmax.xlane.f32.xlu1 %v267_v11 }
 0x164   : > { %357 = vst.msk [vmem:[%s774_s22 + $0x4] sm:$0xf] %vm345_vm2, %v643_v9 }
 0x1ee   : > { %v266_v12 = vpop.xlane.xlu0 %265 }
 0x1ef   : > { %v270_v13 = vsub.f32 %v257_v4, %v266_v12 }
 0x1f0   : > { %v269_v14 = vpop.xlane.xlu1 %268 }
 0x1f1   : > { %v272_v15 = vmul.f32 1.442695, %v270_v13  ;;  %v271_v16 = vsub.f32 %v260_v8, %v269_v14 }
 0x1f3   : > { %696 = vpow2.f32 %v272_v15  ;;  %v274_v17 = vmul.f32 1.442695, %v271_v16 }
 0x1f5   : > { %698 = vpow2.f32 %v274_v17 }
 0x1fd   : > { %v697_v18 = vpop.eup %696 }
 0x1fe   : > { %v276_v19 = vsel %vm216_vm1, %v697_v18, 0.0 }
 0x1ff   : > { %v699_v20 = vpop.eup %698  ;;  %277 = vadd.xlane.f32.xlu1 %v276_v19 }
 0x200   : > { %v279_v21 = vsel %vm216_vm1, %v699_v20, 0.0 }
 0x203   : > { %280 = vadd.xlane.f32.xlu1 %v279_v21 }
 0x214   : > { %360 = vrot.lane.b32.xlu1 %v694_v1, %s723_s26 }
 0x218   : > { %358 = vrot.lane.b32.xlu1 %v694_v1, %s724_s27 }
 0x28c   : > { %v278_v23 = vpop.xlane.xlu1 %277 }
 0x28d   : > { %700 = vrcp.f32 %v278_v23 }
 0x290   : > { %v281_v24 = vpop.xlane.xlu1 %280 }
 0x291   : > { %702 = vrcp.f32 %v281_v24 }
 0x294   : > { %v361_v27 = vpop.permute.xlu1 %360 }
 0x295   : > { %v366_v30 = vsel %vm216_vm1, %v361_v27, 0 }
 0x297   : > { %v701_v25 = vpop.eup %700 }
 0x298   : > { %v284_v28 = vmul.f32 %v701_v25, %v697_v18  ;;  %v359_v32 = vpop.permute.xlu1 %358 }
 0x29b   : > { %v703_v26 = vpop.eup %702 }
 0x29c   : > { %v285_v29 = vmul.f32 %v703_v26, %v699_v20 }
 0x29e   : > { %v286_v31 = vpack.c.bf16 %v285_v29, %v284_v28 }
 0x2a0   : > { %665 = vmatmul.mubr.msk.bf16.vlgmr.msra.gmra.mrb[0].mxu1 %vm216_vm1, %v286_v31 }
 0x2a1   : > { %669 = vmatpush3.bf16.xpose.msra.mxu1 %v366_v30  ;;  %670 = vmatprep.mubr.msk.bf16.mxu1 %vm721_vm0, %v720_v0 }
 0x2a8   : > { %671 = vmatmul.mubr.msk.bf16.vlgmr.msra.gmra.mrb[4].mxu1 %vm216_vm1, %v359_v32 }
 0x373   : > { %v330_v33 = vpop.f32.mrb[0].mxu1 }
 0x374   : > { %v640_v34 = vpack.c.bf16 %v330_v33, %v330_v33  ;;  %v666_v35 = vpop.f32.mrb[1].mxu1 }
 0x375   : > { %v333_v36 = vpop.f32.mrb[2].mxu1 }
 0x376   : > { %346 = vst.msk [vmem:[%s799_s30] sm:$0xf] %vm345_vm2, %v640_v34  ;;  %v641_v37 = vpack.c.bf16 %v333_v36, %v333_v36  ;;  %v667_v38 = vpop.f32.mrb[3].mxu1 }
 0x378   : > { %347 = vst.msk [vmem:[%s799_s30 + $0x4] sm:$0xf] %vm345_vm2, %v641_v37 }
 0x37b   : > { %v402_v39 = vpop.f32.mrb[4].mxu1 }
 0x37c   : > { %v646_v40 = vpack.c.bf16 %v402_v39, %v402_v39  ;;  %v672_v41 = vpop.f32.mrb[5].mxu1  ;;  %v409_v42 = vsel %vm216_vm1, %v402_v39, -inf }
 0x37d   : > { %410 = vmax.xlane.f32.xlu1 %v409_v42  ;;  %v405_v43 = vpop.f32.mrb[6].mxu1 }
 0x37e   : > { %632 = vst.msk [vmem:[%s774_s22 + $0x8] sm:$0xf] %vm345_vm2, %v646_v40  ;;  %v647_v44 = vpack.c.bf16 %v405_v43, %v405_v43  ;;  %v673_v45 = vpop.f32.mrb[7].mxu1  ;;  %v412_v46 = vsel %vm216_vm1, %v405_v43, -inf }
 0x37f   : > { %413 = vmax.xlane.f32.xlu0 %v412_v46 }
 0x380   : > { %633 = vst.msk [vmem:[%s774_s22 + $0xc] sm:$0xf] %vm345_vm2, %v647_v44 }
 0x40a   : > { %v411_v47 = vpop.xlane.xlu1 %410 }
 0x40b   : > { %v415_v48 = vsub.f32 %v402_v39, %v411_v47 }
 0x40c   : > { %v414_v49 = vpop.xlane.xlu0 %413 }
 0x40d   : > { %v417_v50 = vmul.f32 1.442695, %v415_v48  ;;  %v416_v51 = vsub.f32 %v405_v43, %v414_v49 }
 0x40f   : > { %704 = vpow2.f32 %v417_v50  ;;  %v419_v52 = vmul.f32 1.442695, %v416_v51 }
 0x411   : > { %706 = vpow2.f32 %v419_v52 }
 0x419   : > { %v705_v53 = vpop.eup %704 }
 0x41a   : > { %v421_v54 = vsel %vm216_vm1, %v705_v53, 0.0 }
 0x41b   : > { %v707_v55 = vpop.eup %706  ;;  %422 = vadd.xlane.f32.xlu0 %v421_v54 }
 0x41c   : > { %v424_v56 = vsel %vm216_vm1, %v707_v55, 0.0 }
 0x41f   : > { %425 = vadd.xlane.f32.xlu0 %v424_v56 }
 0x435   : > { %432 = vrot.lane.b32.xlu0 %v695_v22, %s724_s27 }
 0x4a8   : > { %v423_v57 = vpop.xlane.xlu0 %422 }
 0x4a9   : > { %708 = vrcp.f32 %v423_v57 }
 0x4ac   : > { %v426_v58 = vpop.xlane.xlu0 %425 }
 0x4ad   : > { %710 = vrcp.f32 %v426_v58 }
 0x4b0   : > { %v433_v59 = vpop.permute.xlu0 %432 }
 0x4b1   : > { %675 = vmatpush3.bf16.msra.mxu0 %v433_v59 }
 0x4b3   : > { %v709_v60 = vpop.eup %708 }
 0x4b4   : > { %v429_v62 = vmul.f32 %v709_v60, %v705_v53 }
 0x4b7   : > { %v711_v61 = vpop.eup %710 }
 0x4b8   : > { %v430_v63 = vmul.f32 %v711_v61, %v707_v55 }
 0x4ba   : > { %v431_v0 = vpack.c.bf16 %v430_v63, %v429_v62 }
 0x4bc   : > { %677 = vmatmul.mubr.msk.bf16.vlgmr.msra.gmra.mrb[4].mxu0 %vm216_vm1, %v431_v0 }
 0x58f   : > { %v472_v1 = vpop.f32.mrb[4].mxu0 }
 0x590   : > { %v644_v2 = vpack.c.bf16 %v472_v1, %v472_v1  ;;  %v678_v3 = vpop.f32.mrb[5].mxu0 }
 0x591   : > { %v475_v4 = vpop.f32.mrb[6].mxu0 }
 0x592   : > { %v645_v5 = vpack.c.bf16 %v475_v4, %v475_v4  ;;  %485 = vrot.lane.b32.xlu0 %v644_v2, %s725_s4  ;;  %v679_v6 = vpop.f32.mrb[7].mxu0 }
 0x594   : > { %487 = vrot.lane.b32.xlu1 %v645_v5, %s725_s4 }
 0x604   : > { %v486_v7 = vpop.permute.xlu0 %485 }
 0x605   : > { %492 = vst.msk [vmem:[%s799_s30] sm:$0xf] %vm491_vm3, %v486_v7 }
 0x606   : > { %v488_v8 = vpop.permute.xlu1 %487 }
 0x607   : > { %493 = vst.msk [vmem:[%s799_s30 + $0x4] sm:$0xf] %vm491_vm3, %v488_v8 }
 0x608 PF: > { %s14_s12 = sadd.s32 1, %s718_s12  }
 0x609   : > { %p11_p4 = scmp.ge.s32.totalorder %s14_s12, 4  }
 0x60b   :  { %13 = sbr.rel (!%p11_p4) target bundleno = 1 (0x1), region = 74 }

// kernel: look_vit_forward.36
= control target key start
LH: loop header
LB: loop body
LE: loop exit
PB: predicated region body
PF: predicated region fallthrough
CT: control target
= control target key end

     0   :  { %vm19_vm0 = vcmask 261120   ;;  %v168_v1 = vmov 0.0   ;;  %s239_s1 = inlined_call_operand.vmem [shape: bf16[32,32], index: 1, kind: input, shape index: {}]   ;;  %s240_s0 = inlined_call_operand.vmem [shape: bf16[32,32], index: 0, kind: input, shape index: {}]   ;;  %s241_s2 = inlined_call_operand.vmem [shape: f32[32,32], index: 2, kind: input, shape index: {}]   ;;  %s242_s3 = inlined_call_operand.vmem [shape: f32[32,32], index: 3, kind: output, shape index: {}]  }
   0x1   :  { %v164_v0 = vld [vmem:[%s239_s1] sm:$0xff]   ;;  %22 = vst.msk [vmem:[#allocation2 + $0x10] sm:$0xff] %vm19_vm0, %v168_v1  ;;  %20 = vst.msk [vmem:[#allocation2] sm:$0xff] %vm19_vm0, %v168_v1  ;;  %v165_v2 = vld [vmem:[%s239_s1 + $0x8] sm:$0xff]  }
   0x2   :  { %21 = vst.msk [vmem:[#allocation2 + $0x8] sm:$0xff] %vm19_vm0, %v168_v1  ;;  %23 = vst.msk [vmem:[#allocation2 + $0x18] sm:$0xff] %vm19_vm0, %v168_v1  ;;  %155 = vmatprep.subr.bf16.mxu0 %v164_v0  ;;  %v166_v3 = vld [vmem:[%s240_s0] sm:$0xff]   ;;  %v167_v4 = vld [vmem:[%s240_s0 + $0x8] sm:$0xff]  }
   0x3   :  { %156 = vmatpush3.bf16.msra.mxu0 %v164_v0  ;;  %159 = vmatprep.mubr.msk.bf16.mxu0 %vm19_vm0, %v166_v3  ;;  %v131_v17 = vld [vmem:[%s241_s2 + $0x10] sm:$0xff]  ;;  %v129_v18 = vld [vmem:[%s241_s2] sm:$0xff]  ;;  %v132_v20 = vld [vmem:[%s241_s2 + $0x18] sm:$0xff] }
   0x4   :  { %157 = vmatprep.subr.bf16.mxu0 %v165_v2  ;;  %v130_v23 = vld [vmem:[%s241_s2 + $0x8] sm:$0xff] }
   0x7   :  { %158 = vmatpush3.bf16.msra.mxu0 %v165_v2 }
   0x8   :  { %v30_v5 = vld [vmem:[#allocation2 + $0x10] sm:$0xff]  ;;  %v28_v6 = vld [vmem:[#allocation2] sm:$0xff] }
   0x9   :  { %v31_v8 = vld [vmem:[#allocation2 + $0x18] sm:$0xff]  ;;  %v29_v11 = vld [vmem:[#allocation2 + $0x8] sm:$0xff] }
   0xa   :  { %160 = vmatmul.mubr.msk.bf16.vlgmr.msra.gmra.mrb[0].mxu0 %vm19_vm0, %v167_v4 }
  0xdd   :  { %v161_v7 = vpop.f32.mrb[0].mxu0 }
  0xde   :  { %v116_v9 = vadd.f32 %v161_v7, %v30_v5  ;;  %v99_v10 = vpop.f32.mrb[1].mxu0 }
  0xdf   :  { %v114_v12 = vadd.f32 %v99_v10, %v28_v6  ;;  %v162_v13 = vpop.f32.mrb[2].mxu0 }
  0xe0   :  { %120 = vst.msk [vmem:[#allocation2 + $0x10] sm:$0xff] %vm19_vm0, %v116_v9  ;;  %v117_v14 = vadd.f32 %v162_v13, %v31_v8  ;;  %v102_v15 = vpop.f32.mrb[3].mxu0 }
  0xe1   :  { %118 = vst.msk [vmem:[#allocation2] sm:$0xff] %vm19_vm0, %v114_v12  ;;  %v115_v16 = vadd.f32 %v102_v15, %v29_v11 }
  0xe2   :  { %121 = vst.msk [vmem:[#allocation2 + $0x18] sm:$0xff] %vm19_vm0, %v117_v14 }
  0xe3   :  { %119 = vst.msk [vmem:[#allocation2 + $0x8] sm:$0xff] %vm19_vm0, %v115_v16 }
  0xe7   :  { %v127_v19 = vld [vmem:[#allocation2 + $0x10] sm:$0xff] }
  0xe8   :  { %v135_v21 = vadd.f32 %v131_v17, %v127_v19  ;;  %v125_v22 = vld [vmem:[#allocation2] sm:$0xff] }
  0xe9   :  { %v133_v24 = vadd.f32 %v129_v18, %v125_v22  ;;  %v128_v25 = vld [vmem:[#allocation2 + $0x18] sm:$0xff] }
  0xea   :  { %139 = vst.msk [vmem:[%s242_s3 + $0x10] sm:$0xff] %vm19_vm0, %v135_v21  ;;  %v136_v26 = vadd.f32 %v132_v20, %v128_v25  ;;  %v126_v27 = vld [vmem:[#allocation2 + $0x8] sm:$0xff] }
  0xeb   :  { %137 = vst.msk [vmem:[%s242_s3] sm:$0xff] %vm19_vm0, %v133_v24  ;;  %v134_v28 = vadd.f32 %v130_v23, %v126_v27 }
  0xec   :  { %140 = vst.msk [vmem:[%s242_s3 + $0x18] sm:$0xff] %vm19_vm0, %v136_v26 }
  0xed   :  { %138 = vst.msk [vmem:[%s242_s3 + $0x8] sm:$0xff] %vm19_vm0, %v134_v28 }

// kernel: look_vit_forward.37
= control target key start
LH: loop header
LB: loop body
LE: loop exit
PB: predicated region body
PF: predicated region fallthrough
CT: control target
= control target key end

     0   :  { %vm29_vm0 = vcmask 261120   ;;  %vm19_vm1 = vcmask 785408   ;;  %v247_v30 = vmov 0.0   ;;  %v85_v38 = vlaneseq  ;;  %s319_s0 = inlined_call_operand.vmem [shape: f32[32,32], index: 0, kind: input, shape index: {}]   ;;  %s320_s2 = inlined_call_operand.vmem [shape: bf16[32,96], index: 2, kind: input, shape index: {}]   ;;  %s321_s1 = inlined_call_operand.vmem [shape: f32[1,32], index: 1, kind: input, shape index: {}]   ;;  %s322_s3 = inlined_call_operand.vmem [shape: bf16[32,96], index: 3, kind: output, shape index: {}]  }
   0x1   :  { %v24_v0 = vld [vmem:[%s319_s0] sm:$0xff]  ;;  %v26_v1 = vld [vmem:[%s319_s0 + $0x10] sm:$0xff]  ;;  %v25_v2 = vld [vmem:[%s319_s0 + $0x8] sm:$0xff]  ;;  %22 = vst.msk [vmem:[#allocation2 + $0x10] sm:$0xff] %vm19_vm1, %v247_v30  ;;  %vm203_vm2 = vcmask 781312  }
   0x2   :  { %v30_v3 = vsel %vm29_vm0, %v24_v0, 0.0  ;;  %v36_v4 = vsel %vm29_vm0, %v26_v1, 0.0  ;;  %v27_v5 = vld [vmem:[%s319_s0 + $0x18] sm:$0xff]  ;;  %v33_v6 = vsel %vm29_vm0, %v25_v2, 0.0  ;;  %v237_v28 = vld [vmem:[%s320_s2] sm:$0xff]   ;;  %v238_v29 = vld [vmem:[%s320_s2 + $0x8] sm:$0xff]  }
   0x3   :  { %31 = vadd.xlane.f32.xlu0 %v30_v3  ;;  %37 = vadd.xlane.f32.xlu1 %v36_v4  ;;  %v39_v7 = vsel %vm29_vm0, %v27_v5, 0.0  ;;  %20 = vst.msk [vmem:[#allocation2] sm:$0xff] %vm19_vm1, %v247_v30  ;;  %21 = vst.msk [vmem:[#allocation2 + $0x8] sm:$0xff] %vm19_vm1, %v247_v30  ;;  %v86_v43 = vshrl.u32 %v85_v38, 7  ;;  %v28_v45 = vld [vmem:[%s321_s1] sm:$0x1] }
   0x4   :  { %228 = vmatprep.subr.bf16.mxu0 %v237_v28  ;;  %23 = vst.msk [vmem:[#allocation2 + $0x18] sm:$0xff] %vm19_vm1, %v247_v30  ;;  %v83_v46 = vadd.f32 1.0, %v28_v45 }
   0x5   :  { %229 = vmatpush3.bf16.msra.mxu0 %v237_v28  ;;  %v87_v47 = vsub.s32 0, %v86_v43 }
   0x6   :  { %230 = vmatprep.subr.bf16.mxu0 %v238_v29 }
   0x7   :  { %34 = vadd.xlane.f32.xlu0 %v33_v6  ;;  %40 = vadd.xlane.f32.xlu1 %v39_v7  ;;  %v88_v50 = vrot.slane %v83_v46, %v87_v47 }
   0x8   :  { %v96_v63 = vld [vmem:[#allocation2 + $0x10] sm:$0xff] }
   0x9   :  { %231 = vmatpush3.bf16.msra.mxu0 %v238_v29 }
  0x90   :  { %v32_v8 = vpop.xlane.xlu0 %31  ;;  %v38_v9 = vpop.xlane.xlu1 %37 }
  0x91   :  { %v43_v10 = vmul.f32 0.03125, %v32_v8  ;;  %v45_v11 = vmul.f32 0.03125, %v38_v9 }
  0x93   :  { %v47_v12 = vsub.f32 %v24_v0, %v43_v10  ;;  %v49_v13 = vsub.f32 %v26_v1, %v45_v11  ;;  %v94_v0 = vld [vmem:[#allocation2] sm:$0xff] }
  0x94   :  { %v35_v14 = vpop.xlane.xlu0 %34  ;;  %v41_v15 = vpop.xlane.xlu1 %40 }
  0x95   :  { %v44_v16 = vmul.f32 0.03125, %v35_v14  ;;  %v46_v17 = vmul.f32 0.03125, %v41_v15  ;;  %v51_v18 = vmul.f32 %v47_v12, %v47_v12  ;;  %v53_v19 = vmul.f32 %v49_v13, %v49_v13 }
  0x97   :  { %v48_v20 = vsub.f32 %v25_v2, %v44_v16  ;;  %v50_v21 = vsub.f32 %v27_v5, %v46_v17  ;;  %v55_v22 = vsel %vm29_vm0, %v51_v18, 0.0  ;;  %v61_v23 = vsel %vm29_vm0, %v53_v19, 0.0  ;;  %v97_v2 = vld [vmem:[#allocation2 + $0x18] sm:$0xff]  ;;  %v95_v5 = vld [vmem:[#allocation2 + $0x8] sm:$0xff] }
  0x98   :  { %56 = vadd.xlane.f32.xlu0 %v55_v22 }
  0x99   :  { %v52_v24 = vmul.f32 %v48_v20, %v48_v20  ;;  %v54_v25 = vmul.f32 %v50_v21, %v50_v21 }
  0x9b   :  { %v58_v26 = vsel %vm29_vm0, %v52_v24, 0.0  ;;  %v64_v27 = vsel %vm29_vm0, %v54_v25, 0.0 }
  0x9c   :  { %62 = vadd.xlane.f32.xlu0 %v61_v23  ;;  %59 = vadd.xlane.f32.xlu1 %v58_v26 }
  0xa0   :  { %65 = vadd.xlane.f32.xlu1 %v64_v27 }
 0x125   :  { %v57_v31 = vpop.xlane.xlu0 %56 }
 0x126   :  { %v67_v32 = vmul.f32 0.03125, %v57_v31 }
 0x128   :  { %v71_v33 = vadd.f32 1e-05, %v67_v32 }
 0x129   :  { %v60_v34 = vpop.xlane.xlu1 %59  ;;  %v63_v35 = vpop.xlane.xlu0 %62 }
 0x12a   :  { %239 = vrsqrt.f32 %v71_v33  ;;  %v68_v36 = vmul.f32 0.03125, %v60_v34  ;;  %v69_v37 = vmul.f32 0.03125, %v63_v35 }
 0x12c   :  { %v72_v39 = vadd.f32 1e-05, %v68_v36  ;;  %v73_v40 = vadd.f32 1e-05, %v69_v37 }
 0x12d   :  { %v66_v41 = vpop.xlane.xlu1 %65 }
 0x12e   :  { %241 = vrsqrt.f32 %v72_v39  ;;  %v70_v42 = vmul.f32 0.03125, %v66_v41 }
 0x12f   :  { %243 = vrsqrt.f32 %v73_v40 }
 0x130   :  { %v74_v44 = vadd.f32 1e-05, %v70_v42 }
 0x132   :  { %245 = vrsqrt.f32 %v74_v44 }
 0x134   :  { %v240_v48 = vpop.eup %239 }
 0x135   :  { %v79_v49 = vmul.f32 %v240_v48, %v47_v12 }
 0x137   :  { %v90_v54 = vmul.f32 %v88_v50, %v79_v49 }
 0x138   :  { %v242_v51 = vpop.eup %241 }
 0x139   :  { %v244_v52 = vpop.eup %243  ;;  %v80_v53 = vmul.f32 %v242_v51, %v48_v20 }
 0x13a   :  { %v81_v56 = vmul.f32 %v244_v52, %v49_v13 }
 0x13b   :  { %v91_v55 = vmul.f32 %v88_v50, %v80_v53 }
 0x13c   :  { %v246_v57 = vpop.eup %245  ;;  %v92_v60 = vmul.f32 %v88_v50, %v81_v56 }
 0x13d   :  { %v98_v58 = vpack.c.bf16 %v91_v55, %v90_v54  ;;  %v82_v59 = vmul.f32 %v246_v57, %v50_v21 }
 0x13f   :  { %232 = vmatprep.mubr.msk.bf16.mxu0 %vm29_vm0, %v98_v58  ;;  %v93_v61 = vmul.f32 %v88_v50, %v82_v59 }
 0x141   :  { %v99_v62 = vpack.c.bf16 %v93_v61, %v92_v60 }
 0x143   :  { %233 = vmatmul.mubr.msk.bf16.vlgmr.msra.gmra.mrb[0].mxu0 %vm29_vm0, %v99_v62 }
 0x216   :  { %v234_v1 = vpop.f32.mrb[0].mxu0 }
 0x217   :  { %v173_v3 = vadd.f32 %v234_v1, %v96_v63  ;;  %v156_v4 = vpop.f32.mrb[1].mxu0 }
 0x218   :  { %v171_v6 = vadd.f32 %v156_v4, %v94_v0  ;;  %v235_v7 = vpop.f32.mrb[2].mxu0 }
 0x219   :  { %178 = vst.msk [vmem:[#allocation2 + $0x10] sm:$0xff] %vm19_vm1, %v173_v3  ;;  %v174_v8 = vadd.f32 %v235_v7, %v97_v2  ;;  %v159_v9 = vpop.f32.mrb[3].mxu0 }
 0x21a   :  { %176 = vst.msk [vmem:[#allocation2] sm:$0xff] %vm19_vm1, %v171_v6  ;;  %v172_v10 = vadd.f32 %v159_v9, %v95_v5 }
 0x21b   :  { %179 = vst.msk [vmem:[#allocation2 + $0x18] sm:$0xff] %vm19_vm1, %v174_v8 }
 0x21c   :  { %177 = vst.msk [vmem:[#allocation2 + $0x8] sm:$0xff] %vm19_vm1, %v172_v10 }
 0x220   :  { %v185_v11 = vld [vmem:[#allocation2 + $0x10] sm:$0xff] }
 0x221   :  { %v222_v12 = vpack.c.bf16 %v185_v11, %v185_v11  ;;  %v183_v13 = vld [vmem:[#allocation2] sm:$0xff] }
 0x222   :  { %v220_v14 = vpack.c.bf16 %v183_v13, %v183_v13  ;;  %v186_v15 = vld [vmem:[#allocation2 + $0x18] sm:$0xff] }
 0x223   :  { %206 = vst.msk [vmem:[%s322_s3 + $0x8] sm:$0xf] %vm203_vm2, %v222_v12  ;;  %v223_v16 = vpack.c.bf16 %v186_v15, %v186_v15  ;;  %v184_v17 = vld [vmem:[#allocation2 + $0x8] sm:$0xff] }
 0x224   :  { %204 = vst.msk [vmem:[%s322_s3] sm:$0xf] %vm203_vm2, %v220_v14  ;;  %v221_v18 = vpack.c.bf16 %v184_v17, %v184_v17 }
 0x225   :  { %207 = vst.msk [vmem:[%s322_s3 + $0xc] sm:$0xf] %vm203_vm2, %v223_v16 }
 0x226   :  { %205 = vst.msk [vmem:[%s322_s3 + $0x4] sm:$0xf] %vm203_vm2, %v221_v18 }

// kernel: look_vit_forward.41
= control target key start
LH: loop header
LB: loop body
LE: loop exit
PB: predicated region body
PF: predicated region fallthrough
CT: control target
= control target key end

     0   :  { %vm22_vm0 = vcmask 261120   ;;  %v255_v1 = vmov 0.0   ;;  %s350_s1 = inlined_call_operand.vmem [shape: bf16[128,32], index: 1, kind: input, shape index: {}]   ;;  %s351_s0 = inlined_call_operand.vmem [shape: bf16[32,128], index: 0, kind: input, shape index: {}]   ;;  %s352_s2 = inlined_call_operand.vmem [shape: f32[1,32], index: 2, kind: input, shape index: {}]   ;;  %s353_s3 = inlined_call_operand.vmem [shape: f32[32,32], index: 3, kind: input, shape index: {}]   ;;  %s354_s4 = inlined_call_operand.vmem [shape: f32[32,32], index: 4, kind: output, shape index: {}]  }
   0x1   :  { %v245_v0 = vld [vmem:[%s350_s1] sm:$0xff]   ;;  %25 = vst.msk [vmem:[#allocation2 + $0x10] sm:$0xff] %vm22_vm0, %v255_v1  ;;  %23 = vst.msk [vmem:[#allocation2] sm:$0xff] %vm22_vm0, %v255_v1  ;;  %v246_v2 = vld [vmem:[%s350_s1 + $0x8] sm:$0xff]  }
   0x2   :  { %24 = vst.msk [vmem:[#allocation2 + $0x8] sm:$0xff] %vm22_vm0, %v255_v1  ;;  %26 = vst.msk [vmem:[#allocation2 + $0x18] sm:$0xff] %vm22_vm0, %v255_v1  ;;  %224 = vmatprep.subr.bf16.mxu0 %v245_v0  ;;  %v247_v3 = vld [vmem:[%s350_s1 + $0x10] sm:$0xff]   ;;  %v248_v4 = vld [vmem:[%s350_s1 + $0x18] sm:$0xff]  }
   0x3   :  { %225 = vmatpush3.bf16.msra.mxu0 %v245_v0  ;;  %v253_v5 = vld [vmem:[%s351_s0] sm:$0xff]   ;;  %v250_v7 = vld [vmem:[%s350_s1 + $0x28] sm:$0xff]   ;;  %v251_v8 = vld [vmem:[%s350_s1 + $0x30] sm:$0xff]  }
   0x4   :  { %226 = vmatprep.subr.bf16.mxu0 %v246_v2  ;;  %240 = vmatprep.mubr.bf16.mxu0 %v253_v5  ;;  %v249_v6 = vld [vmem:[%s350_s1 + $0x20] sm:$0xff]   ;;  %v252_v9 = vld [vmem:[%s350_s1 + $0x38] sm:$0xff]   ;;  %v254_v10 = vld [vmem:[%s351_s0 + $0x8] sm:$0xff]  }
   0x5   :  { %v213_v23 = vld [vmem:[%s352_s2] ss:$0 sm:$0xff]  ;;  %v189_v25 = vld [vmem:[%s353_s3 + $0x10] sm:$0xff]  ;;  %v190_v31 = vld [vmem:[%s353_s3 + $0x18] sm:$0xff] }
   0x6   :  { %v187_v28 = vld [vmem:[%s353_s3] sm:$0xff]  ;;  %v188_v35 = vld [vmem:[%s353_s3 + $0x8] sm:$0xff] }
   0x7   :  { %227 = vmatpush3.bf16.msra.mxu0 %v246_v2 }
   0x8   :  { %228 = vmatprep.subr.bf16.mxu0 %v247_v3  ;;  %v33_v11 = vld [vmem:[#allocation2 + $0x10] sm:$0xff]  ;;  %v31_v12 = vld [vmem:[#allocation2] sm:$0xff] }
   0x9   :  { %v34_v14 = vld [vmem:[#allocation2 + $0x18] sm:$0xff]  ;;  %v32_v17 = vld [vmem:[#allocation2 + $0x8] sm:$0xff] }
   0xb   :  { %229 = vmatpush3.bf16.msra.mxu0 %v247_v3 }
   0xc   :  { %230 = vmatprep.subr.bf16.mxu0 %v248_v4 }
   0xf   :  { %231 = vmatpush3.bf16.msra.mxu0 %v248_v4 }
  0x10   :  { %232 = vmatprep.subr.bf16.mxu0 %v249_v6 }
  0x13   :  { %233 = vmatpush3.bf16.msra.mxu0 %v249_v6 }
  0x14   :  { %234 = vmatprep.subr.bf16.mxu0 %v250_v7 }
  0x17   :  { %235 = vmatpush3.bf16.msra.mxu0 %v250_v7 }
  0x18   :  { %236 = vmatprep.subr.bf16.mxu0 %v251_v8 }
  0x1b   :  { %237 = vmatpush3.bf16.msra.mxu0 %v251_v8 }
  0x1c   :  { %238 = vmatprep.subr.bf16.mxu0 %v252_v9 }
  0x1f   :  { %239 = vmatpush3.bf16.msra.mxu0 %v252_v9 }
  0x22   :  { %241 = vmatmul.mubr.bf16.vlgmr.msra.gmra.mrb[0].mxu0 %v254_v10 }
  0xf5   :  { %v242_v13 = vpop.f32.mrb[0].mxu0 }
  0xf6   :  { %v162_v15 = vadd.f32 %v242_v13, %v33_v11  ;;  %v145_v16 = vpop.f32.mrb[1].mxu0 }
  0xf7   :  { %v160_v18 = vadd.f32 %v145_v16, %v31_v12  ;;  %v243_v19 = vpop.f32.mrb[2].mxu0 }
  0xf8   :  { %167 = vst.msk [vmem:[#allocation2 + $0x10] sm:$0xff] %vm22_vm0, %v162_v15  ;;  %v163_v20 = vadd.f32 %v243_v19, %v34_v14  ;;  %v148_v21 = vpop.f32.mrb[3].mxu0 }
  0xf9   :  { %165 = vst.msk [vmem:[#allocation2] sm:$0xff] %vm22_vm0, %v160_v18  ;;  %v161_v22 = vadd.f32 %v148_v21, %v32_v17 }
  0xfa   :  { %168 = vst.msk [vmem:[#allocation2 + $0x18] sm:$0xff] %vm22_vm0, %v163_v20 }
  0xfb   :  { %166 = vst.msk [vmem:[#allocation2 + $0x8] sm:$0xff] %vm22_vm0, %v161_v22 }
  0xff   :  { %v174_v24 = vld [vmem:[#allocation2 + $0x10] sm:$0xff] }
 0x100   :  { %v185_v26 = vadd.f32 %v213_v23, %v174_v24  ;;  %v172_v27 = vld [vmem:[#allocation2] sm:$0xff] }
 0x101   :  { %v183_v29 = vadd.f32 %v213_v23, %v172_v27  ;;  %v175_v30 = vld [vmem:[#allocation2 + $0x18] sm:$0xff] }
 0x102   :  { %v193_v32 = vadd.f32 %v189_v25, %v185_v26  ;;  %v186_v33 = vadd.f32 %v213_v23, %v175_v30  ;;  %v173_v34 = vld [vmem:[#allocation2 + $0x8] sm:$0xff] }
 0x103   :  { %v191_v36 = vadd.f32 %v187_v28, %v183_v29  ;;  %v184_v37 = vadd.f32 %v213_v23, %v173_v34 }
 0x104   :  { %197 = vst.msk [vmem:[%s354_s4 + $0x10] sm:$0xff] %vm22_vm0, %v193_v32  ;;  %v194_v38 = vadd.f32 %v190_v31, %v186_v33 }
 0x105   :  { %195 = vst.msk [vmem:[%s354_s4] sm:$0xff] %vm22_vm0, %v191_v36  ;;  %v192_v39 = vadd.f32 %v188_v35, %v184_v37 }
 0x106   :  { %198 = vst.msk [vmem:[%s354_s4 + $0x18] sm:$0xff] %vm22_vm0, %v194_v38 }
 0x107   :  { %196 = vst.msk [vmem:[%s354_s4 + $0x8] sm:$0xff] %vm22_vm0, %v192_v39 }

// kernel: look_vit_forward.38
= control target key start
LH: loop header
LB: loop body
LE: loop exit
PB: predicated region body
PF: predicated region fallthrough
CT: control target
= control target key end

     0   :  { %s564_s6 = smov 0   ;;  %s628_s0 = inlined_call_operand.vmem [shape: bf16[2,16,96], index: 0, kind: input, shape index: {}]   ;;  %s629_s1 = inlined_call_operand.vmem [shape: bf16[2,16,32], index: 1, kind: output, shape index: {}]  }
   0x1 LB: > { %s447_s7 = sadd.s32 4294967295, %s544_s6   ;;  %p451_p0 = scmp.ge.s32.totalorder %s544_s6, 1  ;;  %s544_s6 = sphi %s564_s6, %s11_s6  }
   0x2   : > { %p87_p1 = scmp.lt.s32.totalorder %s544_s6, 3 }
   0x4   : > { %p88_p2 = pnand %p451_p0, %p87_p1 }
   0x5   : > { %p107_p3 = scmp.lt.s32.totalorder (!%p88_p2), %s447_s7, 1  ;;  %v546_v0 = vmov (!%p88_p2), 0.0   ;;  %vm547_vm0 = vmmov (!%p88_p2), 0   ;;  %s548_s12 = smov (!%p88_p2), 96   ;;  %vm127_vm1 = vcmask (!%p88_p2), 130048   ;;  %vm253_vm2 = vcmask (!%p88_p2), 125952  }
   0x6   : > { %91 = sbr.rel (%p88_p2) target bundleno = 1546 (0x60a), region = 24  ;;  %481 = vmatprep.subr.bf16.mxu0 (!%p88_p2), %v546_v0  ;;  %483 = vmatprep.mubr.msk.bf16.mxu0 (!%p88_p2), %vm547_vm0, %v546_v0  ;;  %s549_s13 = smov (!%p88_p2), 64   ;;  %vm389_vm3 = vcmask (!%p88_p2), 257152  }
   0x7   : > { %487 = vmatprep.subr.bf16.mxu1 (!%p88_p2), %v546_v0  ;;  %489 = vmatprep.mubr.msk.bf16.mxu1 (!%p88_p2), %vm547_vm0, %v546_v0  ;;  %s550_s14 = smov (!%p88_p2), 80   ;;  %s551_s15 = smov (!%p88_p2), 112  }
   0x8   : > { %s552_s19 = smov (!%p88_p2), 48   ;;  %s553_s20 = smov (!%p88_p2), 16  }
   0xd   : > { %s631_s7 = smov (!%p107_p3, %s447_s7), 1 }
   0xe   : > { %s467_s8 = sshll.u32 %s631_s7, 3 }
   0xf   : > { %s111_s11 = scalar_lea.vmem %s628_s0, %s467_s8  ;;  %s613_s18 = scalar_lea.vmem %s629_s1, %s467_s8 }
  0x10   : > { %v586_v1 = vld [vmem:[%s111_s11] sm:$0xff]  }
  0x11   : > { %125 = vrot.lane.b32.xlu0 %v586_v1, %s548_s12 }
  0x83   : > { %v126_v2 = vpop.permute.xlu0 %125 }
  0x84   : > { %v132_v3 = vsel %vm127_vm1, %v126_v2, 0 }
  0x85   : > { %482 = vmatpush3.bf16.xpose.msra.mxu0 %v132_v3 }
  0x86   : > { %499 = vmatprep.subr.bf16.mxu0 %v546_v0 }
  0x8c   : > { %484 = vmatmul.mubr.msk.bf16.vlgmr.msra.gmra.mrb[0].mxu0 %vm127_vm1, %v586_v1 }
  0x8d   : > { %501 = vmatprep.mubr.msk.bf16.mxu0 %vm547_vm0, %v546_v0 }
 0x15f   : > { %v168_v4 = vpop.f32.mrb[0].mxu0 }
 0x160   : > { %v485_v5 = vpop.f32.mrb[1].mxu0  ;;  %v175_v6 = vsel %vm127_vm1, %v168_v4, -inf }
 0x161   : > { %176 = vmax.xlane.f32.xlu0 %v175_v6  ;;  %v171_v7 = vpop.f32.mrb[2].mxu0 }
 0x162   : > { %v486_v8 = vpop.f32.mrb[3].mxu0  ;;  %v178_v9 = vsel %vm127_vm1, %v171_v7, -inf }
 0x163   : > { %179 = vmax.xlane.f32.xlu1 %v178_v9 }
 0x174   : > { %198 = vrot.lane.b32.xlu1 %v586_v1, %s549_s13 }
 0x1ee   : > { %v177_v10 = vpop.xlane.xlu0 %176 }
 0x1ef   : > { %v181_v11 = vsub.f32 %v168_v4, %v177_v10 }
 0x1f0   : > { %v180_v12 = vpop.xlane.xlu1 %179 }
 0x1f1   : > { %v183_v13 = vmul.f32 1.442695, %v181_v11  ;;  %v182_v14 = vsub.f32 %v171_v7, %v180_v12 }
 0x1f3   : > { %522 = vpow2.f32 %v183_v13  ;;  %v185_v15 = vmul.f32 1.442695, %v182_v14 }
 0x1f4   : > { %v199_v16 = vpop.permute.xlu1 %198 }
 0x1f5   : > { %524 = vpow2.f32 %v185_v15  ;;  %488 = vmatpush3.bf16.msra.mxu1 %v199_v16 }
 0x1f6   : > { %493 = vmatprep.subr.bf16.mxu1 %v546_v0 }
 0x1fd   : > { %v523_v17 = vpop.eup %522 }
 0x1fe   : > { %v187_v18 = vsel %vm127_vm1, %v523_v17, 0.0 }
 0x1ff   : > { %v525_v19 = vpop.eup %524  ;;  %188 = vadd.xlane.f32.xlu1 %v187_v18 }
 0x200   : > { %v190_v20 = vsel %vm127_vm1, %v525_v19, 0.0 }
 0x203   : > { %191 = vadd.xlane.f32.xlu1 %v190_v20 }
 0x214   : > { %258 = vrot.lane.b32.xlu1 %v586_v1, %s550_s14 }
 0x218   : > { %256 = vrot.lane.b32.xlu1 %v586_v1, %s551_s15 }
 0x28c   : > { %v189_v21 = vpop.xlane.xlu1 %188 }
 0x28d   : > { %526 = vrcp.f32 %v189_v21 }
 0x290   : > { %v192_v22 = vpop.xlane.xlu1 %191 }
 0x291   : > { %528 = vrcp.f32 %v192_v22 }
 0x294   : > { %v259_v25 = vpop.permute.xlu1 %258 }
 0x295   : > { %v264_v28 = vsel %vm127_vm1, %v259_v25, 0 }
 0x297   : > { %v527_v23 = vpop.eup %526 }
 0x298   : > { %v195_v26 = vmul.f32 %v527_v23, %v523_v17  ;;  %v257_v30 = vpop.permute.xlu1 %256 }
 0x29b   : > { %v529_v24 = vpop.eup %528 }
 0x29c   : > { %v196_v27 = vmul.f32 %v529_v24, %v525_v19 }
 0x29e   : > { %v197_v29 = vpack.c.bf16 %v196_v27, %v195_v26 }
 0x2a0   : > { %490 = vmatmul.mubr.msk.bf16.vlgmr.msra.gmra.mrb[0].mxu1 %vm127_vm1, %v197_v29 }
 0x2a1   : > { %494 = vmatpush3.bf16.xpose.msra.mxu1 %v264_v28  ;;  %495 = vmatprep.mubr.msk.bf16.mxu1 %vm547_vm0, %v546_v0 }
 0x2a8   : > { %496 = vmatmul.mubr.msk.bf16.vlgmr.msra.gmra.mrb[4].mxu1 %vm127_vm1, %v257_v30 }
 0x373   : > { %v238_v31 = vpop.f32.mrb[0].mxu1 }
 0x374   : > { %v469_v32 = vpack.c.bf16 %v238_v31, %v238_v31  ;;  %v491_v33 = vpop.f32.mrb[1].mxu1 }
 0x375   : > { %v241_v34 = vpop.f32.mrb[2].mxu1 }
 0x376   : > { %254 = vst.msk [vmem:[%s613_s18] sm:$0xf] %vm253_vm2, %v469_v32  ;;  %v470_v35 = vpack.c.bf16 %v241_v34, %v241_v34  ;;  %v492_v36 = vpop.f32.mrb[3].mxu1 }
 0x378   : > { %255 = vst.msk [vmem:[%s613_s18 + $0x4] sm:$0xf] %vm253_vm2, %v470_v35 }
 0x37b   : > { %v300_v37 = vpop.f32.mrb[4].mxu1 }
 0x37c   : > { %v497_v38 = vpop.f32.mrb[5].mxu1  ;;  %v307_v39 = vsel %vm127_vm1, %v300_v37, -inf }
 0x37d   : > { %308 = vmax.xlane.f32.xlu0 %v307_v39  ;;  %v303_v40 = vpop.f32.mrb[6].mxu1 }
 0x37e   : > { %v498_v41 = vpop.f32.mrb[7].mxu1  ;;  %v310_v42 = vsel %vm127_vm1, %v303_v40, -inf }
 0x37f   : > { %311 = vmax.xlane.f32.xlu1 %v310_v42 }
 0x40a   : > { %v309_v43 = vpop.xlane.xlu0 %308 }
 0x40b   : > { %v313_v44 = vsub.f32 %v300_v37, %v309_v43 }
 0x40c   : > { %v312_v45 = vpop.xlane.xlu1 %311 }
 0x40d   : > { %v315_v46 = vmul.f32 1.442695, %v313_v44  ;;  %v314_v47 = vsub.f32 %v303_v40, %v312_v45 }
 0x40f   : > { %530 = vpow2.f32 %v315_v46  ;;  %v317_v48 = vmul.f32 1.442695, %v314_v47 }
 0x411   : > { %532 = vpow2.f32 %v317_v48 }
 0x419   : > { %v531_v49 = vpop.eup %530 }
 0x41a   : > { %v319_v50 = vsel %vm127_vm1, %v531_v49, 0.0 }
 0x41b   : > { %v533_v51 = vpop.eup %532  ;;  %320 = vadd.xlane.f32.xlu0 %v319_v50 }
 0x41c   : > { %v322_v52 = vsel %vm127_vm1, %v533_v51, 0.0 }
 0x41f   : > { %323 = vadd.xlane.f32.xlu0 %v322_v52 }
 0x435   : > { %330 = vrot.lane.b32.xlu0 %v586_v1, %s552_s19 }
 0x4a8   : > { %v321_v53 = vpop.xlane.xlu0 %320 }
 0x4a9   : > { %534 = vrcp.f32 %v321_v53 }
 0x4ac   : > { %v324_v54 = vpop.xlane.xlu0 %323 }
 0x4ad   : > { %536 = vrcp.f32 %v324_v54 }
 0x4b0   : > { %v331_v55 = vpop.permute.xlu0 %330 }
 0x4b1   : > { %500 = vmatpush3.bf16.msra.mxu0 %v331_v55 }
 0x4b3   : > { %v535_v56 = vpop.eup %534 }
 0x4b4   : > { %v327_v58 = vmul.f32 %v535_v56, %v531_v49 }
 0x4b7   : > { %v537_v57 = vpop.eup %536 }
 0x4b8   : > { %v328_v59 = vmul.f32 %v537_v57, %v533_v51 }
 0x4ba   : > { %v329_v60 = vpack.c.bf16 %v328_v59, %v327_v58 }
 0x4bc   : > { %502 = vmatmul.mubr.msk.bf16.vlgmr.msra.gmra.mrb[4].mxu0 %vm127_vm1, %v329_v60 }
 0x58f   : > { %v370_v61 = vpop.f32.mrb[4].mxu0 }
 0x590   : > { %v471_v62 = vpack.c.bf16 %v370_v61, %v370_v61  ;;  %v503_v63 = vpop.f32.mrb[5].mxu0 }
 0x591   : > { %v373_v0 = vpop.f32.mrb[6].mxu0 }
 0x592   : > { %383 = vrot.lane.b32.xlu0 %v471_v62, %s553_s20  ;;  %v504_v1 = vpop.f32.mrb[7].mxu0  ;;  %v472_v2 = vpack.c.bf16 %v373_v0, %v373_v0 }
 0x596   : > { %385 = vrot.lane.b32.xlu0 %v472_v2, %s553_s20 }
 0x604   : > { %v384_v3 = vpop.permute.xlu0 %383 }
 0x605   : > { %390 = vst.msk [vmem:[%s613_s18] sm:$0xf] %vm389_vm3, %v384_v3 }
 0x608   : > { %v386_v4 = vpop.permute.xlu0 %385 }
 0x609   : > { %391 = vst.msk [vmem:[%s613_s18 + $0x4] sm:$0xf] %vm389_vm3, %v386_v4 }
 0x60a PF: > { %s11_s6 = sadd.s32 1, %s544_s6  }
 0x60b   : > { %p8_p4 = scmp.ge.s32.totalorder %s11_s6, 4  }
 0x60d   :  { %10 = sbr.rel (!%p8_p4) target bundleno = 1 (0x1), region = 54 }

// kernel: look_vit_forward.40
= control target key start
LH: loop header
LB: loop body
LE: loop exit
PB: predicated region body
PF: predicated region fallthrough
CT: control target
= control target key end

     0   :  { %vm31_vm0 = vcmask 261120   ;;  %v87_v37 = vlaneseq  ;;  %s362_s0 = inlined_call_operand.vmem [shape: f32[32,32], index: 0, kind: input, shape index: {}]   ;;  %s363_s2 = inlined_call_operand.vmem [shape: bf16[32,128], index: 2, kind: input, shape index: {}]   ;;  %s364_s1 = inlined_call_operand.vmem [shape: f32[1,32], index: 1, kind: input, shape index: {}]   ;;  %s365_s3 = inlined_call_operand.vmem [shape: f32[1,128], index: 3, kind: input, shape index: {}]   ;;  %s366_s4 = inlined_call_operand.vmem [shape: bf16[32,128], index: 4, kind: output, shape index: {}]  }
   0x1   :  { %v26_v0 = vld [vmem:[%s362_s0] sm:$0xff]  ;;  %v28_v1 = vld [vmem:[%s362_s0 + $0x10] sm:$0xff]  ;;  %v27_v2 = vld [vmem:[%s362_s0 + $0x8] sm:$0xff] }
   0x2   :  { %v32_v3 = vsel %vm31_vm0, %v26_v0, 0.0  ;;  %v38_v4 = vsel %vm31_vm0, %v28_v1, 0.0  ;;  %v29_v5 = vld [vmem:[%s362_s0 + $0x18] sm:$0xff]  ;;  %v35_v6 = vsel %vm31_vm0, %v27_v2, 0.0  ;;  %v279_v28 = vld [vmem:[%s363_s2] sm:$0xff]   ;;  %v280_v29 = vld [vmem:[%s363_s2 + $0x8] sm:$0xff]  }
   0x3   :  { %33 = vadd.xlane.f32.xlu0 %v32_v3  ;;  %39 = vadd.xlane.f32.xlu1 %v38_v4  ;;  %v41_v7 = vsel %vm31_vm0, %v29_v5, 0.0  ;;  %v88_v42 = vshrl.u32 %v87_v37, 7  ;;  %v30_v44 = vld [vmem:[%s364_s1] sm:$0x1] }
   0x4   :  { %271 = vmatprep.subr.bf16.mxu0 %v279_v28  ;;  %v85_v45 = vadd.f32 1.0, %v30_v44  ;;  %v247_v62 = vld [vmem:[%s365_s3] ss:$0 sm:$0xff] }
   0x5   :  { %272 = vmatpush3.bf16.msra.mxu0 %v279_v28  ;;  %v89_v46 = vsub.s32 0, %v88_v42 }
   0x6   :  { %273 = vmatprep.subr.bf16.mxu0 %v280_v29 }
   0x7   :  { %36 = vadd.xlane.f32.xlu0 %v35_v6  ;;  %42 = vadd.xlane.f32.xlu1 %v41_v7  ;;  %v90_v49 = vrot.slane %v85_v45, %v89_v46 }
   0x9   :  { %274 = vmatpush3.bf16.msra.mxu0 %v280_v29 }
  0x90   :  { %v34_v8 = vpop.xlane.xlu0 %33  ;;  %v40_v9 = vpop.xlane.xlu1 %39 }
  0x91   :  { %v45_v10 = vmul.f32 0.03125, %v34_v8  ;;  %v47_v11 = vmul.f32 0.03125, %v40_v9 }
  0x93   :  { %v49_v12 = vsub.f32 %v26_v0, %v45_v10  ;;  %v51_v13 = vsub.f32 %v28_v1, %v47_v11 }
  0x94   :  { %v37_v14 = vpop.xlane.xlu0 %36  ;;  %v43_v15 = vpop.xlane.xlu1 %42 }
  0x95   :  { %v46_v16 = vmul.f32 0.03125, %v37_v14  ;;  %v48_v17 = vmul.f32 0.03125, %v43_v15  ;;  %v53_v18 = vmul.f32 %v49_v12, %v49_v12  ;;  %v55_v19 = vmul.f32 %v51_v13, %v51_v13 }
  0x97   :  { %v50_v20 = vsub.f32 %v27_v2, %v46_v16  ;;  %v52_v21 = vsub.f32 %v29_v5, %v48_v17  ;;  %v57_v22 = vsel %vm31_vm0, %v53_v18, 0.0  ;;  %v63_v23 = vsel %vm31_vm0, %v55_v19, 0.0 }
  0x98   :  { %58 = vadd.xlane.f32.xlu0 %v57_v22 }
  0x99   :  { %v54_v24 = vmul.f32 %v50_v20, %v50_v20  ;;  %v56_v25 = vmul.f32 %v52_v21, %v52_v21 }
  0x9b   :  { %v60_v26 = vsel %vm31_vm0, %v54_v24, 0.0  ;;  %v66_v27 = vsel %vm31_vm0, %v56_v25, 0.0 }
  0x9c   :  { %64 = vadd.xlane.f32.xlu0 %v63_v23  ;;  %61 = vadd.xlane.f32.xlu1 %v60_v26 }
  0xa0   :  { %67 = vadd.xlane.f32.xlu1 %v66_v27 }
 0x125   :  { %v59_v30 = vpop.xlane.xlu0 %58 }
 0x126   :  { %v69_v31 = vmul.f32 0.03125, %v59_v30 }
 0x128   :  { %v73_v32 = vadd.f32 1e-05, %v69_v31 }
 0x129   :  { %v62_v33 = vpop.xlane.xlu1 %61  ;;  %v65_v34 = vpop.xlane.xlu0 %64 }
 0x12a   :  { %281 = vrsqrt.f32 %v73_v32  ;;  %v70_v35 = vmul.f32 0.03125, %v62_v33  ;;  %v71_v36 = vmul.f32 0.03125, %v65_v34 }
 0x12c   :  { %v74_v38 = vadd.f32 1e-05, %v70_v35  ;;  %v75_v39 = vadd.f32 1e-05, %v71_v36 }
 0x12d   :  { %v68_v40 = vpop.xlane.xlu1 %67 }
 0x12e   :  { %283 = vrsqrt.f32 %v74_v38  ;;  %v72_v41 = vmul.f32 0.03125, %v68_v40 }
 0x12f   :  { %285 = vrsqrt.f32 %v75_v39 }
 0x130   :  { %v76_v43 = vadd.f32 1e-05, %v72_v41 }
 0x132   :  { %287 = vrsqrt.f32 %v76_v43 }
 0x134   :  { %v282_v47 = vpop.eup %281 }
 0x135   :  { %v81_v48 = vmul.f32 %v282_v47, %v49_v12 }
 0x137   :  { %v92_v53 = vmul.f32 %v90_v49, %v81_v48 }
 0x138   :  { %v284_v50 = vpop.eup %283 }
 0x139   :  { %v286_v51 = vpop.eup %285  ;;  %v82_v52 = vmul.f32 %v284_v50, %v50_v20 }
 0x13a   :  { %v83_v55 = vmul.f32 %v286_v51, %v51_v13 }
 0x13b   :  { %v93_v54 = vmul.f32 %v90_v49, %v82_v52 }
 0x13c   :  { %v288_v56 = vpop.eup %287  ;;  %v94_v59 = vmul.f32 %v90_v49, %v83_v55 }
 0x13d   :  { %v100_v57 = vpack.c.bf16 %v93_v54, %v92_v53  ;;  %v84_v58 = vmul.f32 %v288_v56, %v52_v21 }
 0x13f   :  { %275 = vmatprep.mubr.msk.bf16.mxu0 %vm31_vm0, %v100_v57  ;;  %v95_v60 = vmul.f32 %v90_v49, %v84_v58 }
 0x141   :  { %v101_v61 = vpack.c.bf16 %v95_v60, %v94_v59 }
 0x143   :  { %276 = vmatmul.mubr.msk.bf16.vlgmr.msra.gmra.mrb[0].mxu0 %vm31_vm0, %v101_v61 }
 0x216   :  { %v277_v63 = vpop.f32.mrb[0].mxu0 }
 0x217   :  { %v197_v0 = vadd.f32 %v277_v63, %v247_v62  ;;  %v158_v1 = vpop.f32.mrb[1].mxu0 }
 0x218   :  { %v195_v2 = vadd.f32 %v247_v62, %v158_v1  ;;  %v278_v3 = vpop.f32.mrb[2].mxu0 }
 0x219   :  { %v205_v4 = vmul.f32 0.70710677, %v197_v0  ;;  %v198_v5 = vadd.f32 %v278_v3, %v247_v62  ;;  %v161_v6 = vpop.f32.mrb[3].mxu0  ;;  %v201_v17 = vmul.f32 0.5, %v197_v0 }
 0x21a   :  { %v203_v7 = vmul.f32 0.70710677, %v195_v2  ;;  %v196_v8 = vadd.f32 %v247_v62, %v161_v6  ;;  %v199_v20 = vmul.f32 0.5, %v195_v2 }
 0x21b   :  { %289 = verf.f32 %v205_v4  ;;  %v206_v9 = vmul.f32 0.70710677, %v198_v5  ;;  %v202_v18 = vmul.f32 0.5, %v198_v5 }
 0x21c   :  { %291 = verf.f32 %v203_v7  ;;  %v204_v10 = vmul.f32 0.70710677, %v196_v8  ;;  %v200_v21 = vmul.f32 0.5, %v196_v8 }
 0x21d   :  { %293 = verf.f32 %v206_v9 }
 0x21e   :  { %295 = verf.f32 %v204_v10 }
 0x225   :  { %v290_v11 = vpop.eup %289 }
 0x226   :  { %v292_v12 = vpop.eup %291  ;;  %v213_v13 = vadd.f32 1.0, %v290_v11 }
 0x227   :  { %v294_v14 = vpop.eup %293  ;;  %v211_v15 = vadd.f32 1.0, %v292_v12 }
 0x228   :  { %v296_v16 = vpop.eup %295  ;;  %v214_v19 = vadd.f32 1.0, %v294_v14  ;;  %v217_v23 = vmul.f32 %v213_v13, %v201_v17 }
 0x229   :  { %v212_v22 = vadd.f32 1.0, %v296_v16  ;;  %v215_v25 = vmul.f32 %v211_v15, %v199_v20 }
 0x22a   :  { %v218_v24 = vmul.f32 %v214_v19, %v202_v18 }
 0x22b   :  { %v216_v26 = vmul.f32 %v212_v22, %v200_v21 }
 0x22c   :  { %v264_v27 = vpack.c.bf16 %v218_v24, %v217_v23 }
 0x22d   :  { %v259_v28 = vpack.c.bf16 %v216_v26, %v215_v25 }
 0x22e   :  { %266 = vst [vmem:[%s366_s4 + $0x8] sm:$0xff] %v264_v27  }
 0x22f   :  { %260 = vst [vmem:[%s366_s4] sm:$0xff] %v259_v28  }

// kernel: look_vit_forward.43
= control target key start
LH: loop header
LB: loop body
LE: loop exit
PB: predicated region body
PF: predicated region fallthrough
CT: control target
= control target key end

     0   :  { %s562_s9 = smov 0   ;;  %s600_s0 = inlined_call_operand.vmem [shape: bf16[2,2,16,16], index: 0, kind: input, shape index: {}]   ;;  %s601_s1 = inlined_call_operand.vmem [shape: bf16[2,16,32], index: 1, kind: input, shape index: {}]   ;;  %s602_s2 = inlined_call_operand.vmem [shape: bf16[2,16,32], index: 2, kind: output, shape index: {}]  }
   0x1 LB: > { %s455_s10 = sadd.s32 4294967295, %s541_s9   ;;  %p459_p0 = scmp.ge.s32.totalorder %s541_s9, 1  ;;  %s541_s9 = sphi %s562_s9, %s12_s9  }
   0x2   : > { %p122_p1 = scmp.lt.s32.totalorder %s541_s9, 3 }
   0x4   : > { %p123_p2 = pnand %p459_p0, %p122_p1 }
   0x5   : > { %p149_p3 = scmp.lt.s32.totalorder (!%p123_p2), %s455_s10, 1  ;;  %v543_v0 = vmov (!%p123_p2), 0.0   ;;  %vm544_vm0 = vmmov (!%p123_p2), 0   ;;  %vm171_vm1 = vcmask (!%p123_p2), 130048   ;;  %s545_s19 = smov (!%p123_p2), 112   ;;  %vm274_vm2 = vcmask (!%p123_p2), 125952  }
   0x6   : > { %126 = sbr.rel (%p123_p2) target bundleno = 517 (0x205), region = 28  ;;  %503 = vmatprep.subr.bf16.mxu1 (!%p123_p2), %v543_v0  ;;  %505 = vmatprep.mubr.msk.bf16.mxu1 (!%p123_p2), %vm544_vm0, %v543_v0  ;;  %s546_s23 = smov (!%p123_p2), 16   ;;  %vm385_vm3 = vcmask (!%p123_p2), 257152  }
   0x7   : > { %497 = vmatprep.subr.bf16.mxu0 (!%p123_p2), %v543_v0  ;;  %499 = vmatprep.mubr.msk.bf16.mxu0 (!%p123_p2), %vm544_vm0, %v543_v0 }
   0xd   : > { %s604_s10 = smov (!%p149_p3, %s455_s10), 1 }
   0xe   : > { %s478_s11 = sshll.u32 %s604_s10, 3  ;;  %s477_s12 = sshll.u32 %s604_s10, 4 }
   0xf   : > { %s158_s15 = scalar_lea.vmem %s601_s1, %s478_s11  ;;  %s153_s18 = scalar_lea.vmem %s600_s0, %s477_s12 }
  0x10   : > { %v522_v1 = vld [vmem:[%s158_s15] sm:$0xff]   ;;  %v492_v3 = vld [vmem:[%s153_s18 + $0x8] sm:$0xff]   ;;  %s163_s22 = scalar_lea.vmem %s602_s2, %s478_s11 }
  0x11   : > { %v485_v2 = vld [vmem:[%s153_s18] sm:$0xff]   ;;  %326 = vrot.lane.b32.xlu0 %v522_v1, %s545_s19  ;;  %v490_v6 = vunpack.c.l.bf16 %v492_v3  ;;  %v491_v7 = vunpack.c.h.bf16 %v492_v3  ;;  %498 = vmatpush3.bf16.msra.mxu0 %v522_v1 }
  0x12   : > { %v486_v4 = vunpack.c.l.bf16 %v485_v2  ;;  %v487_v5 = vunpack.c.h.bf16 %v485_v2 }
  0x13   : > { %v282_v10 = vsel %vm171_vm1, %v490_v6, -inf  ;;  %v283_v11 = vsel %vm171_vm1, %v491_v7, -inf }
  0x14   : > { %v172_v8 = vsel %vm171_vm1, %v486_v4, -inf  ;;  %v173_v9 = vsel %vm171_vm1, %v487_v5, -inf  ;;  %v284_v13 = vmax.f32 %v282_v10, %v283_v11 }
  0x15   : > { %v174_v12 = vmax.f32 %v172_v8, %v173_v9 }
  0x16   : > { %v285_v15 = vrot.slane %v284_v13, 4 }
  0x17   : > { %v175_v14 = vrot.slane %v174_v12, 4 }
  0x18   : > { %v286_v17 = vmax.f32 %v284_v13, %v285_v15 }
  0x19   : > { %v176_v16 = vmax.f32 %v174_v12, %v175_v14 }
  0x1a   : > { %v287_v19 = vrot.slane %v286_v17, 2 }
  0x1b   : > { %v177_v18 = vrot.slane %v176_v16, 2 }
  0x1c   : > { %v288_v21 = vmax.f32 %v286_v17, %v287_v19 }
  0x1d   : > { %v178_v20 = vmax.f32 %v176_v16, %v177_v18 }
  0x1e   : > { %v289_v23 = vrot.slane %v288_v21, 1 }
  0x1f   : > { %v179_v22 = vrot.slane %v178_v20, 1 }
  0x20   : > { %v290_v25 = vmax.f32 %v288_v21, %v289_v23 }
  0x21   : > { %v180_v24 = vmax.f32 %v178_v20, %v179_v22 }
  0x22   : > { %v291_v28 = vsub.f32 %v490_v6, %v290_v25  ;;  %v292_v29 = vsub.f32 %v491_v7, %v290_v25 }
  0x23   : > { %v181_v26 = vsub.f32 %v486_v4, %v180_v24  ;;  %v182_v27 = vsub.f32 %v487_v5, %v180_v24 }
  0x24   : > { %v293_v31 = vmul.f32 1.442695, %v291_v28  ;;  %v295_v33 = vmul.f32 1.442695, %v292_v29 }
  0x25   : > { %v183_v30 = vmul.f32 1.442695, %v181_v26  ;;  %v185_v32 = vmul.f32 1.442695, %v182_v27 }
  0x26   : > { %523 = vpow2.f32 %v293_v31 }
  0x27   : > { %525 = vpow2.f32 %v295_v33 }
  0x28   : > { %527 = vpow2.f32 %v183_v30 }
  0x29   : > { %529 = vpow2.f32 %v185_v32 }
  0x30   : > { %v524_v34 = vpop.eup %523 }
  0x31   : > { %v526_v35 = vpop.eup %525  ;;  %v297_v36 = vsel %vm171_vm1, %v524_v34, 0.0 }
  0x32   : > { %v528_v37 = vpop.eup %527  ;;  %v298_v38 = vsel %vm171_vm1, %v526_v35, 0.0 }
  0x33   : > { %v530_v39 = vpop.eup %529  ;;  %v299_v40 = vadd.f32 %v298_v38, %v297_v36  ;;  %v187_v41 = vsel %vm171_vm1, %v528_v37, 0.0 }
  0x34   : > { %v188_v42 = vsel %vm171_vm1, %v530_v39, 0.0 }
  0x35   : > { %v300_v43 = vrot.slane %v299_v40, 4  ;;  %v189_v44 = vadd.f32 %v188_v42, %v187_v41 }
  0x37   : > { %v301_v45 = vadd.f32 %v300_v43, %v299_v40  ;;  %v190_v46 = vrot.slane %v189_v44, 4 }
  0x39   : > { %v302_v47 = vrot.slane %v301_v45, 2  ;;  %v191_v48 = vadd.f32 %v190_v46, %v189_v44 }
  0x3b   : > { %v303_v49 = vadd.f32 %v302_v47, %v301_v45  ;;  %v192_v50 = vrot.slane %v191_v48, 2 }
  0x3d   : > { %v304_v51 = vrot.slane %v303_v49, 1  ;;  %v193_v52 = vadd.f32 %v192_v50, %v191_v48 }
  0x3f   : > { %v305_v53 = vadd.f32 %v304_v51, %v303_v49  ;;  %v194_v54 = vrot.slane %v193_v52, 1 }
  0x41   : > { %531 = vrcp.f32 %v305_v53  ;;  %v195_v55 = vadd.f32 %v194_v54, %v193_v52 }
  0x43   : > { %533 = vrcp.f32 %v195_v55 }
  0x4b   : > { %v532_v56 = vpop.eup %531 }
  0x4c   : > { %v307_v57 = vmul.f32 %v532_v56, %v524_v34  ;;  %v308_v58 = vmul.f32 %v532_v56, %v526_v35 }
  0x4d   : > { %v534_v59 = vpop.eup %533 }
  0x4e   : > { %v309_v60 = vpack.c.bf16 %v308_v58, %v307_v57  ;;  %v197_v61 = vmul.f32 %v534_v59, %v528_v37  ;;  %v198_v62 = vmul.f32 %v534_v59, %v530_v39 }
  0x50   : > { %310 = vxpose.xlu0.c.b16.start.end [1/1] (short) (narrow) %v309_v60, 16  ;;  %v199_v63 = vpack.c.bf16 %v198_v62, %v197_v61 }
  0x52   : > { %200 = vxpose.xlu1.c.b16.start.end [1/1] (short) (narrow) %v199_v63, 16 }
  0x83   : > { %v327_v0 = vpop.permute.xlu0 %326 }
  0x84   : > { %504 = vmatpush3.bf16.msra.mxu1 %v327_v0 }
  0xb6   : > { %v318_v1 = vpop.trf.xlu0 }
  0xb7   : > { %506 = vmatmul.mubr.msk.bf16.vlgmr.msra.gmra.mrb[0].mxu1 %vm171_vm1, %v318_v1 }
  0xb8   : > { %v208_v2 = vpop.trf.xlu1 }
  0xb9   : > { %500 = vmatmul.mubr.msk.bf16.vlgmr.msra.gmra.mrb[0].mxu0 %vm171_vm1, %v208_v2 }
 0x18a   : > { %v366_v3 = vpop.f32.mrb[0].mxu1 }
 0x18b   : > { %v482_v4 = vpack.c.bf16 %v366_v3, %v366_v3  ;;  %v507_v5 = vpop.f32.mrb[1].mxu1 }
 0x18c   : > { %v369_v6 = vpop.f32.mrb[2].mxu1  ;;  %v259_v7 = vpop.f32.mrb[0].mxu0 }
 0x18d   : > { %v508_v8 = vpop.f32.mrb[3].mxu1  ;;  %379 = vrot.lane.b32.xlu1 %v482_v4, %s546_s23  ;;  %v480_v9 = vpack.c.bf16 %v259_v7, %v259_v7  ;;  %v501_v10 = vpop.f32.mrb[1].mxu0  ;;  %v483_v12 = vpack.c.bf16 %v369_v6, %v369_v6 }
 0x18e   : > { %v262_v11 = vpop.f32.mrb[2].mxu0 }
 0x18f   : > { %275 = vst.msk [vmem:[%s163_s22] sm:$0xf] %vm274_vm2, %v480_v9  ;;  %v481_v13 = vpack.c.bf16 %v262_v11, %v262_v11  ;;  %v502_v14 = vpop.f32.mrb[3].mxu0 }
 0x191   : > { %381 = vrot.lane.b32.xlu1 %v483_v12, %s546_s23  ;;  %276 = vst.msk [vmem:[%s163_s22 + $0x4] sm:$0xf] %vm274_vm2, %v481_v13 }
 0x1ff   : > { %v380_v15 = vpop.permute.xlu1 %379 }
 0x200   : > { %386 = vst.msk [vmem:[%s163_s22] sm:$0xf] %vm385_vm3, %v380_v15 }
 0x203   : > { %v382_v16 = vpop.permute.xlu1 %381 }
 0x204   : > { %387 = vst.msk [vmem:[%s163_s22 + $0x4] sm:$0xf] %vm385_vm3, %v382_v16 }
 0x205 PF: > { %s12_s9 = sadd.s32 1, %s541_s9  }
 0x206   : > { %p9_p4 = scmp.ge.s32.totalorder %s12_s9, 4  }
 0x208   :  { %11 = sbr.rel (!%p9_p4) target bundleno = 1 (0x1), region = 62 }

// kernel: look_vit_forward.63
= control target key start
LH: loop header
LB: loop body
LE: loop exit
PB: predicated region body
PF: predicated region fallthrough
CT: control target
= control target key end

     0   :  { %v147_v1 = vmov 0.0   ;;  %vm148_vm0 = vmmov 0   ;;  %vm17_vm1 = vcmask 74752   ;;  %s189_s0 = inlined_call_operand.vmem [shape: f32[2,32], index: 0, kind: input, shape index: {}]   ;;  %s190_s1 = inlined_call_operand.vmem [shape: bf16[32,10], index: 1, kind: input, shape index: {}]   ;;  %s191_s2 = inlined_call_operand.hbm [shape: f32[2,10], index: 2, kind: output, shape index: {}]  }
   0x1   :  { %v121_v0 = vld [vmem:[%s190_s1] sm:$0xff]   ;;  %110 = vmatprep.subr.bf16.mxu0 %v147_v1  ;;  %v122_v2 = vld [vmem:[%s190_s1 + $0x8] sm:$0xff]   ;;  %114 = vmatprep.mubr.msk.bf16.mxu0 %vm148_vm0, %v147_v1 }
   0x2   :  { %111 = vmatpush3.bf16.msra.mxu0 %v121_v0  ;;  %v19_v3 = vld [vmem:[%s189_s0] sm:$0x3] }
   0x3   :  { %7 = vsyncpa [#allocation4], 0  ;;  %112 = vmatprep.subr.bf16.mxu0 %v147_v1  ;;  %18 = vst.msk [vmem:[#allocation2] sm:$0x3] %vm17_vm1, %v147_v1  ;;  %v21_v4 = vpack.c.bf16 %v19_v3, %v19_v3  ;;  %vm38_vm2 = vcmask 261120   ;;  %s149_s1 = smov [#allocation3]  }
   0x4   :  { %s96_s15 = sshll.u32 %s149_s1, 4  ;;  %s97_s15 = int_to_ptr.vmem [resolvable:$true] %s96_s15 }
   0x5   :  { %s123_s0 = scalar_lea.vmem %s97_s15, 32  ;;  %p128_p1 = scmp.lt.s32.totalorder %s97_s15, %s97_s15 }
   0x6   :  { %113 = vmatpush3.bf16.msra.mxu0 %v122_v2  ;;  %p124_p0 = scmp.ne.s32.totalorder %s97_s15, %s123_s0  ;;  %p129_p2 = scmp.lt.s32.totalorder %s123_s0, %s123_s0 }
   0x8   :  { %p130_p3 = por %p129_p2, %p128_p1 }
   0x9   :  { %115 = vmatmul.mubr.msk.bf16.vlgmr.msra.gmra.mrb[0].mxu0 %vm38_vm2, %v21_v4 }
   0xa   :  { %v20_v5 = vld [vmem:[#allocation2] sm:$0x3]  ;;  %p131_p4 = pnand %p130_p3, %p124_p0 }
  0xdc   :  { %v76_v6 = vpop.f32.mrb[0].mxu0 }
  0xdd   :  { %v82_v7 = vadd.f32 %v76_v6, %v20_v5  ;;  %v116_v8 = vpop.f32.mrb[1].mxu0 }
  0xde   :  { %v79_v9 = vpop.f32.mrb[2].mxu0 }
  0xdf   :  { %84 = vst.msk [vmem:[#allocation2] sm:$0x3] %vm17_vm1, %v82_v7  ;;  %v117_v10 = vpop.f32.mrb[3].mxu0 }
  0xe6   :  { %v88_v11 = vld [vmem:[#allocation2] sm:$0x3] }
  0xe7   :  { %89 = vst.msk [vmem:[#allocation3] sm:$0x3] %vm17_vm1, %v88_v11 }
  0xe8   :  { %134 = shalt.err (!%p131_p4)
}
  0xe9   :  { %s135_s18 = scalar_lea.hbm %s191_s2, 32 }
  0xea   :  { %p136_p5 = scmp.ne.s32.totalorder %s191_s2, %s135_s18  ;;  %p139_p6 = scmp.lt.u32.totalorder %s135_s18, %s191_s2 }
  0xec   :  { %p141_p7 = pnand %p139_p6, %p136_p5 }
  0xee   :  { %144 = shalt.err (!%p141_p7)
}
  0xef   :  { %99 = dma.vmem_to_hbm [thread:$0]  %s97_s15, 32, %s191_s2, [#allocation4]  }
  0xf0   :  { %145 = dma.done.wait [#allocation4], 32  }
  0xf1   :  { %146 = vsyncadd [#allocation4], 4294967264 }
  0xf2   :  { %103 = vsyncpa [#allocation4], 1 }

// kernel: look_vit_forward.44
= control target key start
LH: loop header
LB: loop body
LE: loop exit
PB: predicated region body
PF: predicated region fallthrough
CT: control target
= control target key end

     0   :  { %vm22_vm0 = vcmask 261120   ;;  %v244_v1 = vmov 0.0   ;;  %v196_v55 = vlaneseq  ;;  %s331_s1 = inlined_call_operand.vmem [shape: bf16[32,32], index: 1, kind: input, shape index: {}]   ;;  %s332_s0 = inlined_call_operand.vmem [shape: bf16[32,32], index: 0, kind: input, shape index: {}]   ;;  %s333_s2 = inlined_call_operand.vmem [shape: f32[32,32], index: 2, kind: input, shape index: {}]   ;;  %s334_s3 = inlined_call_operand.vmem [shape: f32[1,32], index: 3, kind: input, shape index: {}]   ;;  %s335_s4 = inlined_call_operand.vmem [shape: f32[32,32], index: 4, kind: output, shape index: {}]  }
   0x1   :  { %v232_v0 = vld [vmem:[%s331_s1] sm:$0xff]   ;;  %25 = vst.msk [vmem:[#allocation2 + $0x10] sm:$0xff] %vm22_vm0, %v244_v1  ;;  %23 = vst.msk [vmem:[#allocation2] sm:$0xff] %vm22_vm0, %v244_v1  ;;  %v233_v2 = vld [vmem:[%s331_s1 + $0x8] sm:$0xff]  }
   0x2   :  { %24 = vst.msk [vmem:[#allocation2 + $0x8] sm:$0xff] %vm22_vm0, %v244_v1  ;;  %26 = vst.msk [vmem:[#allocation2 + $0x18] sm:$0xff] %vm22_vm0, %v244_v1  ;;  %223 = vmatprep.subr.bf16.mxu0 %v232_v0  ;;  %v234_v3 = vld [vmem:[%s332_s0] sm:$0xff]   ;;  %v235_v4 = vld [vmem:[%s332_s0 + $0x8] sm:$0xff]   ;;  %v197_v61 = vshrl.u32 %v196_v55, 7 }
   0x3   :  { %224 = vmatpush3.bf16.msra.mxu0 %v232_v0  ;;  %227 = vmatprep.mubr.msk.bf16.mxu0 %vm22_vm0, %v234_v3  ;;  %v134_v17 = vld [vmem:[%s333_s2 + $0x10] sm:$0xff]  ;;  %v132_v18 = vld [vmem:[%s333_s2] sm:$0xff]  ;;  %v135_v20 = vld [vmem:[%s333_s2 + $0x18] sm:$0xff] }
   0x4   :  { %225 = vmatprep.subr.bf16.mxu0 %v233_v2  ;;  %v133_v23 = vld [vmem:[%s333_s2 + $0x8] sm:$0xff]  ;;  %v140_v62 = vld [vmem:[%s334_s3] sm:$0x1] }
   0x5   :  { %v194_v3 = vadd.f32 1.0, %v140_v62 }
   0x7   :  { %226 = vmatpush3.bf16.msra.mxu0 %v233_v2 }
   0x8   :  { %v33_v5 = vld [vmem:[#allocation2 + $0x10] sm:$0xff]  ;;  %v31_v6 = vld [vmem:[#allocation2] sm:$0xff] }
   0x9   :  { %v34_v8 = vld [vmem:[#allocation2 + $0x18] sm:$0xff]  ;;  %v32_v11 = vld [vmem:[#allocation2 + $0x8] sm:$0xff] }
   0xa   :  { %228 = vmatmul.mubr.msk.bf16.vlgmr.msra.gmra.mrb[0].mxu0 %vm22_vm0, %v235_v4  ;;  %v198_v4 = vsub.s32 0, %v197_v61 }
  0xdd   :  { %v229_v7 = vpop.f32.mrb[0].mxu0 }
  0xde   :  { %v119_v9 = vadd.f32 %v229_v7, %v33_v5  ;;  %v102_v10 = vpop.f32.mrb[1].mxu0 }
  0xdf   :  { %v117_v12 = vadd.f32 %v102_v10, %v31_v6  ;;  %v230_v13 = vpop.f32.mrb[2].mxu0  ;;  %v199_v6 = vrot.slane %v194_v3, %v198_v4 }
  0xe0   :  { %123 = vst.msk [vmem:[#allocation2 + $0x10] sm:$0xff] %vm22_vm0, %v119_v9  ;;  %v120_v14 = vadd.f32 %v230_v13, %v34_v8  ;;  %v105_v15 = vpop.f32.mrb[3].mxu0 }
  0xe1   :  { %121 = vst.msk [vmem:[#allocation2] sm:$0xff] %vm22_vm0, %v117_v12  ;;  %v118_v16 = vadd.f32 %v105_v15, %v32_v11 }
  0xe2   :  { %124 = vst.msk [vmem:[#allocation2 + $0x18] sm:$0xff] %vm22_vm0, %v120_v14 }
  0xe3   :  { %122 = vst.msk [vmem:[#allocation2 + $0x8] sm:$0xff] %vm22_vm0, %v118_v16 }
  0xe7   :  { %v130_v19 = vld [vmem:[#allocation2 + $0x10] sm:$0xff] }
  0xe8   :  { %v138_v21 = vadd.f32 %v134_v17, %v130_v19  ;;  %v128_v22 = vld [vmem:[#allocation2] sm:$0xff] }
  0xe9   :  { %v136_v24 = vadd.f32 %v132_v18, %v128_v22  ;;  %v131_v25 = vld [vmem:[#allocation2 + $0x18] sm:$0xff] }
  0xea   :  { %v147_v26 = vsel %vm22_vm0, %v138_v21, 0.0  ;;  %v139_v27 = vadd.f32 %v135_v20, %v131_v25  ;;  %v129_v28 = vld [vmem:[#allocation2 + $0x8] sm:$0xff] }
  0xeb   :  { %148 = vadd.xlane.f32.xlu1 %v147_v26  ;;  %v141_v29 = vsel %vm22_vm0, %v136_v24, 0.0  ;;  %v137_v30 = vadd.f32 %v133_v23, %v129_v28 }
  0xec   :  { %142 = vadd.xlane.f32.xlu0 %v141_v29  ;;  %v150_v31 = vsel %vm22_vm0, %v139_v27, 0.0 }
  0xed   :  { %v144_v32 = vsel %vm22_vm0, %v137_v30, 0.0 }
  0xef   :  { %151 = vadd.xlane.f32.xlu1 %v150_v31 }
  0xf0   :  { %145 = vadd.xlane.f32.xlu0 %v144_v32 }
 0x178   :  { %v149_v33 = vpop.xlane.xlu1 %148 }
 0x179   :  { %v156_v34 = vmul.f32 0.03125, %v149_v33  ;;  %v143_v35 = vpop.xlane.xlu0 %142 }
 0x17a   :  { %v154_v36 = vmul.f32 0.03125, %v143_v35 }
 0x17b   :  { %v160_v37 = vsub.f32 %v138_v21, %v156_v34 }
 0x17c   :  { %v158_v38 = vsub.f32 %v136_v24, %v154_v36  ;;  %v152_v39 = vpop.xlane.xlu1 %151 }
 0x17d   :  { %v157_v40 = vmul.f32 0.03125, %v152_v39  ;;  %v146_v41 = vpop.xlane.xlu0 %145  ;;  %v164_v47 = vmul.f32 %v160_v37, %v160_v37 }
 0x17e   :  { %v155_v42 = vmul.f32 0.03125, %v146_v41  ;;  %v162_v43 = vmul.f32 %v158_v38, %v158_v38 }
 0x17f   :  { %v161_v44 = vsub.f32 %v139_v27, %v157_v40  ;;  %v172_v49 = vsel %vm22_vm0, %v164_v47, 0.0 }
 0x180   :  { %v159_v45 = vsub.f32 %v137_v30, %v155_v42  ;;  %v166_v46 = vsel %vm22_vm0, %v162_v43, 0.0 }
 0x181   :  { %167 = vadd.xlane.f32.xlu0 %v166_v46  ;;  %v165_v51 = vmul.f32 %v161_v44, %v161_v44 }
 0x182   :  { %v163_v48 = vmul.f32 %v159_v45, %v159_v45 }
 0x183   :  { %v175_v52 = vsel %vm22_vm0, %v165_v51, 0.0 }
 0x184   :  { %v169_v50 = vsel %vm22_vm0, %v163_v48, 0.0 }
 0x185   :  { %173 = vadd.xlane.f32.xlu0 %v172_v49  ;;  %170 = vadd.xlane.f32.xlu1 %v169_v50 }
 0x189   :  { %176 = vadd.xlane.f32.xlu1 %v175_v52 }
 0x20e   :  { %v168_v53 = vpop.xlane.xlu0 %167 }
 0x20f   :  { %v178_v54 = vmul.f32 0.03125, %v168_v53 }
 0x211   :  { %v182_v56 = vadd.f32 1e-05, %v178_v54 }
 0x212   :  { %v171_v57 = vpop.xlane.xlu1 %170  ;;  %v174_v58 = vpop.xlane.xlu0 %173 }
 0x213   :  { %236 = vrsqrt.f32 %v182_v56  ;;  %v179_v59 = vmul.f32 0.03125, %v171_v57  ;;  %v180_v60 = vmul.f32 0.03125, %v174_v58 }
 0x215   :  { %v183_v63 = vadd.f32 1e-05, %v179_v59  ;;  %v184_v0 = vadd.f32 1e-05, %v180_v60 }
 0x216   :  { %v177_v1 = vpop.xlane.xlu1 %176 }
 0x217   :  { %238 = vrsqrt.f32 %v183_v63  ;;  %v181_v2 = vmul.f32 0.03125, %v177_v1 }
 0x218   :  { %240 = vrsqrt.f32 %v184_v0 }
 0x219   :  { %v185_v5 = vadd.f32 1e-05, %v181_v2 }
 0x21b   :  { %242 = vrsqrt.f32 %v185_v5 }
 0x21d   :  { %v237_v7 = vpop.eup %236 }
 0x21e   :  { %v190_v8 = vmul.f32 %v237_v7, %v158_v38 }
 0x220   :  { %v201_v9 = vmul.f32 %v199_v6, %v190_v8 }
 0x221   :  { %v239_v10 = vpop.eup %238 }
 0x222   :  { %v241_v11 = vpop.eup %240  ;;  %205 = vst.msk [vmem:[%s335_s4] sm:$0xff] %vm22_vm0, %v201_v9  ;;  %v191_v12 = vmul.f32 %v239_v10, %v159_v45 }
 0x223   :  { %v192_v13 = vmul.f32 %v241_v11, %v160_v37 }
 0x224   :  { %v202_v14 = vmul.f32 %v199_v6, %v191_v12 }
 0x225   :  { %v243_v15 = vpop.eup %242  ;;  %v203_v16 = vmul.f32 %v199_v6, %v192_v13 }
 0x226   :  { %206 = vst.msk [vmem:[%s335_s4 + $0x8] sm:$0xff] %vm22_vm0, %v202_v14  ;;  %v193_v17 = vmul.f32 %v243_v15, %v161_v44 }
 0x227   :  { %207 = vst.msk [vmem:[%s335_s4 + $0x10] sm:$0xff] %vm22_vm0, %v203_v16 }
 0x228   :  { %v204_v18 = vmul.f32 %v199_v6, %v193_v17 }
 0x22a   :  { %208 = vst.msk [vmem:[%s335_s4 + $0x18] sm:$0xff] %vm22_vm0, %v204_v18 }

</bundles_post_ra>
